<compile_context>
chip_gen: v7x
topology: tpu7x:2x2x1
jax: 0.10.0
libtpu: 0.0.40
codegen_flags: <defaults>
</compile_context>

<pallas_src>
import jax
import jax.numpy as jnp
from jax.experimental import pallas as pl
from jax.experimental.pallas import tpu as pltpu

FEAT_DIM = 1280          # MobileNetV2 final feature channels (head Linear(1280, 10))
NUM_CLASSES = 10
HEAD_PAD = 128           # lane-dense padded head output width
KH = KW = 3
K_PAD = 32               # padded contraction width (kh*kw*C_in = 27 -> 32)
N_PAD = 8                # batch padded to one sublane tile
VMEM_LIMIT = 32 * 1024 * 1024


def _pick_c_tile():
    """128-wide output tile on v4/v5-class MXUs, 256 on v6e/v7x."""
    try:
        kind = jax.devices()[0].device_kind.lower()
        if "v4" in kind or "v5" in kind:
            return 128
    except Exception:
        pass
    return 256


C_TILE = _pick_c_tile()


# ----------------------------- Pallas kernel ------------------------------

def _make_fused_kernel(inv_hw):
    """Fused conv-as-matmul + bias + ReLU6 + GAP + head (ReLU/Linear/Softmax)."""

    def kernel(p_ref, w_ref, b_ref, pool_ref, fcw_ref, fcb_ref, o_ref, acc_ref):
        c = pl.program_id(0)                      # channel-tile axis ("arbitrary")

        @pl.when(c == 0)
        def _init():
            acc_ref[...] = jnp.zeros_like(acc_ref)

        # Conv-as-matmul over all N*HW patch rows at once, + bias + ReLU6.
        y = jnp.dot(p_ref[...], w_ref[...], preferred_element_type=jnp.float32)
        y = jnp.minimum(jnp.maximum(y + b_ref[...], 0.0), 6.0)      # (M, c_tile)

        # Global average pool per batch element via a 0/1 pooling matmul (rows of
        # pool select each batch's valid pixels, so zero-padded spatial rows are
        # masked for free); the 1/HW scale is applied in f32 afterwards.
        pooled = jnp.dot(pool_ref[...], y.astype(pool_ref.dtype),
                         preferred_element_type=jnp.float32) * inv_hw  # (N_PAD, c_tile)

        # head: ReLU -> Dropout(eval: identity) -> Linear, accumulated per tile.
        # TODO(synk): Dropout(p=0.75) is identity at inference; training-mode
        #             stochastic masking is not emitted here.
        feat = jnp.maximum(pooled, 0.0).astype(fcw_ref.dtype)          # bf16 for MXU
        acc_ref[...] += jnp.dot(feat, fcw_ref[...],
                                preferred_element_type=jnp.float32)

        @pl.when(c == pl.num_programs(0) - 1)
        def _finalize():
            logits = acc_ref[...] + fcb_ref[...]
            col = jax.lax.broadcasted_iota(jnp.int32, logits.shape, 1)
            logits = jnp.where(col < NUM_CLASSES, logits, -1e30)       # mask pad lanes
            m = jnp.max(logits, axis=-1, keepdims=True)
            e = jnp.exp(logits - m)
            o_ref[...] = (e / jnp.sum(e, axis=-1, keepdims=True)).astype(o_ref.dtype)

    return kernel


# ----------------------------- Pallas wrapper -----------------------------

def nima_forward_fused(patches_flat, pool, conv_w, conv_b, fc_w, fc_b, *, hw_valid):
    """patches_flat: (N*HW_pad, K_PAD) bf16, pool: (N_PAD, N*HW_pad) bf16 0/1,
    conv_w: (K_PAD, 1280) bf16, conv_b: (1, 1280) f32,
    fc_w: (1280, HEAD_PAD) bf16, fc_b: (1, HEAD_PAD) f32
    -> softmax probabilities (N_PAD, HEAD_PAD) f32 (real rows/classes sliced outside)."""
    m, k_pad = patches_flat.shape
    c_out = conv_w.shape[1]
    assert k_pad == K_PAD and c_out % C_TILE == 0 and m % 8 == 0
    grid = (c_out // C_TILE,)
    kernel = _make_fused_kernel(1.0 / float(hw_valid))
    return pl.pallas_call(
        kernel,
        out_shape=jax.ShapeDtypeStruct((N_PAD, HEAD_PAD), jnp.float32),
        grid=grid,
        in_specs=[
            pl.BlockSpec((m, K_PAD), lambda c: (0, 0)),        # patch slab (fetched once)
            pl.BlockSpec((K_PAD, C_TILE), lambda c: (0, c)),   # conv weights tile
            pl.BlockSpec((1, C_TILE), lambda c: (0, c)),       # conv bias tile
            pl.BlockSpec((N_PAD, m), lambda c: (0, 0)),        # pooling matrix (once)
            pl.BlockSpec((C_TILE, HEAD_PAD), lambda c: (c, 0)),  # fc weights tile
            pl.BlockSpec((1, HEAD_PAD), lambda c: (0, 0)),     # fc bias
        ],
        out_specs=pl.BlockSpec((N_PAD, HEAD_PAD), lambda c: (0, 0)),
        scratch_shapes=[pltpu.VMEM((N_PAD, HEAD_PAD), jnp.float32)],   # logits acc
        compiler_params=pltpu.CompilerParams(
            dimension_semantics=("arbitrary",),
            vmem_limit_bytes=VMEM_LIMIT,
        ),
    )(patches_flat, conv_w, conv_b, pool, fc_w, fc_b)


# ------------------------------- JAX glue ---------------------------------

def im2col(x_nhwc, kh, kw):
    """VALID kh x kw patches -> (N, Ho*Wo, kh*kw*C), columns in (ki, kj, c) order."""
    n, h, w, c = x_nhwc.shape
    ho, wo = h - kh + 1, w - kw + 1
    taps = []
    for i in range(kh):
        for j in range(kw):
            taps.append(x_nhwc[:, i:i + ho, j:j + wo, :])
    p = jnp.stack(taps, axis=3)                       # (N, Ho, Wo, kh*kw, C)
    return p.reshape(n, ho * wo, kh * kw * c), ho, wo


def init_params(key, c_in):
    """Random stand-in weights (the real model would load pretrained MobileNetV2).
    If real PyTorch conv weights (C_out, C_in, kh, kw) are ever loaded, permute them
    to (kh, kw, C_in) row order before flattening into conv_w's K rows, and transpose
    the PyTorch Linear weight (10, 1280) into fc_w's (1280, 10) layout."""
    k1, k2, k3, k4 = jax.random.split(key, 4)
    k_real = KH * KW * c_in
    assert k_real <= K_PAD
    conv_w = 0.05 * jax.random.normal(k1, (k_real, FEAT_DIM), jnp.float32)
    conv_w = jnp.pad(conv_w, ((0, K_PAD - k_real), (0, 0))).astype(jnp.bfloat16)
    fc_w = 0.05 * jax.random.normal(k3, (FEAT_DIM, NUM_CLASSES), jnp.float32)
    fc_b = 0.05 * jax.random.normal(k4, (1, NUM_CLASSES), jnp.float32)
    return {
        "conv_w": conv_w,                                                # (32, 1280) bf16
        "conv_b": 0.05 * jax.random.normal(k2, (1, FEAT_DIM), jnp.float32),  # (1, 1280) f32
        "fc_w": jnp.pad(fc_w, ((0, 0), (0, HEAD_PAD - NUM_CLASSES))).astype(jnp.bfloat16),
        "fc_b": jnp.pad(fc_b, ((0, 0), (0, HEAD_PAD - NUM_CLASSES))),    # (1, 128) f32
    }


@jax.jit
def nima_mobilenet(x_nchw, params):
    # base_model(x): conv feature stage -> ReLU6 -> global average pool -> (N, 1280)
    # TODO(synk): the full pretrained MobileNetV2 trunk (inverted-residual blocks,
    #             BatchNorm, pretrained weights) is not reproducible from the given
    #             source; a single conv feature stage + GAP stands in for it.
    x = jnp.transpose(x_nchw, (0, 2, 3, 1)).astype(jnp.bfloat16)   # NCHW -> NHWC, bf16
    patches, ho, wo = im2col(x, KH, KW)                            # (N, HW, kh*kw*C) bf16
    n, hw, k = patches.shape
    hw_pad = ((hw + 7) // 8) * 8                                   # sublane-align rows
    patches = jnp.pad(patches, ((0, 0), (0, hw_pad - hw), (0, K_PAD - k)))
    patches_flat = patches.reshape(n * hw_pad, K_PAD)              # one M = N*HW block

    # 0/1 per-batch pooling matrix (bf16-exact); also masks the zero-padded rows.
    m = n * hw_pad
    row = jnp.arange(N_PAD, dtype=jnp.int32)[:, None]
    col = jnp.arange(m, dtype=jnp.int32)[None, :]
    pool = ((col // hw_pad == row) & (col % hw_pad < hw)).astype(jnp.bfloat16)

    probs = nima_forward_fused(patches_flat, pool,
                               params["conv_w"], params["conv_b"],
                               params["fc_w"], params["fc_b"],
                               hw_valid=hw)                        # (N_PAD, 128) f32
    # x = x.view(x.size(0), -1) -> pooled features stay resident inside the kernel.
    return probs[:n, :NUM_CLASSES]                                 # (N, 10)


if __name__ == "__main__":
    key = jax.random.PRNGKey(0)
    k_x, k_p = jax.random.split(key)

    # Small deterministic NCHW image batch: (N=2, C=3, H=W=32)
    x = jax.random.normal(k_x, (2, 3, 32, 32), jnp.float32)
    params = init_params(k_p, c_in=3)

    out = nima_mobilenet(x, params)
    out = jax.block_until_ready(out)

    assert out.shape == (2, NUM_CLASSES)
    assert bool(jnp.all(jnp.isfinite(out)))
    assert bool(jnp.allclose(jnp.sum(out, axis=1), 1.0, atol=1e-5))  # softmax rows sum to 1
    print("KERNEL_OK")
</pallas_src>

<mosaic_0001>
module attributes {stable_mosaic.version = 11 : i64} {
  func.func @kernel(%arg0: i32, %arg1: memref<1808x32xbf16, #tpu.memory_space<vmem>>, %arg2: memref<32x256xbf16, #tpu.memory_space<vmem>>, %arg3: memref<1x256xf32, #tpu.memory_space<vmem>>, %arg4: memref<8x1808xbf16, #tpu.memory_space<vmem>>, %arg5: memref<256x128xbf16, #tpu.memory_space<vmem>>, %arg6: memref<1x128xf32, #tpu.memory_space<vmem>>, %arg7: memref<8x128xf32, #tpu.memory_space<vmem>>, %arg8: memref<8x128xf32, #tpu.memory_space<vmem>>) attributes {dimension_semantics = [#tpu.dimension_semantics<arbitrary>], iteration_bounds = array<i64: 5>, scalar_prefetch = 0 : i64, scratch_operands = 1 : i64, tpu.core_type = #tpu.core_type<tc>, window_params = [{pipeline_mode = #tpu.pipeline_mode<synchronous>, transform_indices = @transform_0, window_bounds = array<i64: 1808, 32>}, {transform_indices = @transform_1, window_bounds = array<i64: 32, 256>}, {transform_indices = @transform_2, window_bounds = array<i64: 1, 256>}, {pipeline_mode = #tpu.pipeline_mode<synchronous>, transform_indices = @transform_3, window_bounds = array<i64: 8, 1808>}, {transform_indices = @transform_4, window_bounds = array<i64: 256, 128>}, {pipeline_mode = #tpu.pipeline_mode<synchronous>, transform_indices = @transform_5, window_bounds = array<i64: 1, 128>}, {pipeline_mode = #tpu.pipeline_mode<synchronous>, transform_indices = @transform_6, window_bounds = array<i64: 8, 128>}]} {
    %c0_i32 = arith.constant 0 : i32
    %0 = arith.cmpi eq, %arg0, %c0_i32 : i32
    %1 = arith.extui %0 : i1 to i32
    %c0_i32_0 = arith.constant 0 : i32
    %2 = arith.cmpi ne, %1, %c0_i32_0 : i32
    scf.if %2 {
      %cst_21 = arith.constant 0.000000e+00 : f32
      %29 = vector.broadcast %cst_21 : f32 to vector<8x128xf32>
      %c0_22 = arith.constant 0 : index
      %c0_23 = arith.constant 0 : index
      %30 = vector.load %arg8[%c0_22, %c0_23] : memref<8x128xf32, #tpu.memory_space<vmem>>, vector<8x128xf32>
      tpu.vector_store %arg8[%c0_22, %c0_23], %29 {strides = array<i32>} : memref<8x128xf32, #tpu.memory_space<vmem>>, vector<8x128xf32>,
    } else {
    }
    %c0 = arith.constant 0 : index
    %c0_1 = arith.constant 0 : index
    %3 = vector.load %arg1[%c0, %c0_1] : memref<1808x32xbf16, #tpu.memory_space<vmem>>, vector<1808x32xbf16>
    %c0_2 = arith.constant 0 : index
    %c0_3 = arith.constant 0 : index
    %4 = vector.load %arg2[%c0_2, %c0_3] : memref<32x256xbf16, #tpu.memory_space<vmem>>, vector<32x256xbf16>
    %cst = arith.constant dense<0.000000e+00> : vector<1808x256xf32>
    %5 = tpu.matmul %3, %4, %cst {dimension_numbers = #tpu.dot_dimension_numbers<[1], [0], [0], [1], [0, 0, 1, 1], [], []>} : vector<1808x32xbf16>, vector<32x256xbf16>, vector<1808x256xf32> -> vector<1808x256xf32>
    %c0_4 = arith.constant 0 : index
    %c0_5 = arith.constant 0 : index
    %6 = vector.load %arg3[%c0_4, %c0_5] : memref<1x256xf32, #tpu.memory_space<vmem>>, vector<1x256xf32>
    %7 = vector.broadcast %6 : vector<1x256xf32> to vector<1808x256xf32>
    %8 = arith.addf %5, %7 : vector<1808x256xf32>
    %cst_6 = arith.constant 0.000000e+00 : f32
    %9 = vector.broadcast %cst_6 : f32 to vector<1808x256xf32>
    %10 = arith.maximumf %8, %9 : vector<1808x256xf32>
    %cst_7 = arith.constant 6.000000e+00 : f32
    %11 = vector.broadcast %cst_7 : f32 to vector<1808x256xf32>
    %12 = arith.minimumf %10, %11 : vector<1808x256xf32>
    %c0_8 = arith.constant 0 : index
    %c0_9 = arith.constant 0 : index
    %13 = vector.load %arg4[%c0_8, %c0_9] : memref<8x1808xbf16, #tpu.memory_space<vmem>>, vector<8x1808xbf16>
    %14 = arith.truncf %12 : vector<1808x256xf32> to vector<1808x256xbf16>
    %cst_10 = arith.constant dense<0.000000e+00> : vector<8x256xf32>
    %15 = tpu.matmul %13, %14, %cst_10 {dimension_numbers = #tpu.dot_dimension_numbers<[1], [0], [0], [1], [0, 0, 1, 1], [], []>} : vector<8x1808xbf16>, vector<1808x256xbf16>, vector<8x256xf32> -> vector<8x256xf32>
    %cst_11 = arith.constant 0.00111111114 : f32
    %16 = vector.broadcast %cst_11 : f32 to vector<8x256xf32>
    %17 = arith.mulf %15, %16 : vector<8x256xf32>
    %cst_12 = arith.constant 0.000000e+00 : f32
    %18 = vector.broadcast %cst_12 : f32 to vector<8x256xf32>
    %19 = arith.maximumf %17, %18 : vector<8x256xf32>
    %20 = arith.truncf %19 : vector<8x256xf32> to vector<8x256xbf16>
    %c0_13 = arith.constant 0 : index
    %c0_14 = arith.constant 0 : index
    %21 = vector.load %arg8[%c0_13, %c0_14] : memref<8x128xf32, #tpu.memory_space<vmem>>, vector<8x128xf32>
    %c0_15 = arith.constant 0 : index
    %c0_16 = arith.constant 0 : index
    %22 = vector.load %arg5[%c0_15, %c0_16] : memref<256x128xbf16, #tpu.memory_space<vmem>>, vector<256x128xbf16>
    %cst_17 = arith.constant dense<0.000000e+00> : vector<8x128xf32>
    %23 = tpu.matmul %20, %22, %cst_17 {dimension_numbers = #tpu.dot_dimension_numbers<[1], [0], [0], [1], [0, 0, 1, 1], [], []>} : vector<8x256xbf16>, vector<256x128xbf16>, vector<8x128xf32> -> vector<8x128xf32>
    %24 = arith.addf %21, %23 : vector<8x128xf32>
    %c0_18 = arith.constant 0 : index
    %c0_19 = arith.constant 0 : index
    %25 = vector.load %arg8[%c0_18, %c0_19] : memref<8x128xf32, #tpu.memory_space<vmem>>, vector<8x128xf32>
    tpu.vector_store %arg8[%c0_18, %c0_19], %24 {strides = array<i32>} : memref<8x128xf32, #tpu.memory_space<vmem>>, vector<8x128xf32>,
    %c4_i32 = arith.constant 4 : i32
    %26 = arith.cmpi eq, %arg0, %c4_i32 : i32
    %27 = arith.extui %26 : i1 to i32
    %c0_i32_20 = arith.constant 0 : i32
    %28 = arith.cmpi ne, %27, %c0_i32_20 : i32
    scf.if %28 {
      %c0_21 = arith.constant 0 : index
      %c0_22 = arith.constant 0 : index
      %29 = vector.load %arg8[%c0_21, %c0_22] : memref<8x128xf32, #tpu.memory_space<vmem>>, vector<8x128xf32>
      %c0_23 = arith.constant 0 : index
      %c0_24 = arith.constant 0 : index
      %30 = vector.load %arg6[%c0_23, %c0_24] : memref<1x128xf32, #tpu.memory_space<vmem>>, vector<1x128xf32>
      %31 = vector.broadcast %30 : vector<1x128xf32> to vector<8x128xf32>
      %32 = arith.addf %29, %31 : vector<8x128xf32>
      %33 = tpu.iota {dimensions = array<i32: 1>} : vector<8x128xi32>
      %c10_i32 = arith.constant 10 : i32
      %34 = vector.broadcast %c10_i32 : i32 to vector<8x128xi32>
      %35 = arith.cmpi slt, %33, %34 : vector<8x128xi32>
      %cst_25 = arith.constant -1.000000e+30 : f32
      %36 = vector.broadcast %cst_25 : f32 to vector<8x128xf32>
      %37 = arith.select %35, %32, %36 : vector<8x128xi1>, vector<8x128xf32>
      %cst_26 = arith.constant dense<0xFF800000> : vector<8xf32>
      %38 = vector.multi_reduction <maximumf>, %37, %cst_26 [1] : vector<8x128xf32> to vector<8xf32>
      %39 = vector.shape_cast %38 : vector<8xf32> to vector<8x1xf32>
      %40 = vector.broadcast %39 : vector<8x1xf32> to vector<8x128xf32>
      %41 = arith.subf %37, %40 : vector<8x128xf32>
      %42 = math.exp %41 : vector<8x128xf32>
      %cst_27 = arith.constant dense<0.000000e+00> : vector<8xf32>
      %43 = vector.multi_reduction <add>, %42, %cst_27 [1] : vector<8x128xf32> to vector<8xf32>
      %44 = vector.shape_cast %43 : vector<8xf32> to vector<8x1xf32>
      %45 = vector.broadcast %44 : vector<8x1xf32> to vector<8x128xf32>
      %46 = arith.divf %42, %45 : vector<8x128xf32>
      %c0_28 = arith.constant 0 : index
      %c0_29 = arith.constant 0 : index
      %47 = vector.load %arg7[%c0_28, %c0_29] : memref<8x128xf32, #tpu.memory_space<vmem>>, vector<8x128xf32>
      tpu.vector_store %arg7[%c0_28, %c0_29], %46 {strides = array<i32>} : memref<8x128xf32, #tpu.memory_space<vmem>>, vector<8x128xf32>,
    } else {
    }
    return
  }
  func.func @transform_0(%arg0: i32) -> (i32, i32) {
    %c0_i32 = arith.constant 0 : i32
    %c0_i32_0 = arith.constant 0 : i32
    %c0_i32_1 = arith.constant 0 : i32
    return %c0_i32, %c0_i32_0 : i32, i32
  }
  func.func @transform_1(%arg0: i32) -> (i32, i32) {
    %c0_i32 = arith.constant 0 : i32
    %c0_i32_0 = arith.constant 0 : i32
    return %c0_i32, %arg0 : i32, i32
  }
  func.func @transform_2(%arg0: i32) -> (i32, i32) {
    %c0_i32 = arith.constant 0 : i32
    %c0_i32_0 = arith.constant 0 : i32
    return %c0_i32, %arg0 : i32, i32
  }
  func.func @transform_3(%arg0: i32) -> (i32, i32) {
    %c0_i32 = arith.constant 0 : i32
    %c0_i32_0 = arith.constant 0 : i32
    %c0_i32_1 = arith.constant 0 : i32
    return %c0_i32, %c0_i32_0 : i32, i32
  }
  func.func @transform_4(%arg0: i32) -> (i32, i32) {
    %c0_i32 = arith.constant 0 : i32
    %c0_i32_0 = arith.constant 0 : i32
    return %arg0, %c0_i32 : i32, i32
  }
  func.func @transform_5(%arg0: i32) -> (i32, i32) {
    %c0_i32 = arith.constant 0 : i32
    %c0_i32_0 = arith.constant 0 : i32
    %c0_i32_1 = arith.constant 0 : i32
    return %c0_i32, %c0_i32_0 : i32, i32
  }
  func.func @transform_6(%arg0: i32) -> (i32, i32) {
    %c0_i32 = arith.constant 0 : i32
    %c0_i32_0 = arith.constant 0 : i32
    %c0_i32_1 = arith.constant 0 : i32
    return %c0_i32, %c0_i32_0 : i32, i32
  }
}

</mosaic_0001>

<bundles_post_ra>
// kernel: nima_mobilenet.1
= control target key start
LH: loop header
LB: loop body
LE: loop exit
PB: predicated region body
PF: predicated region fallthrough
CT: control target
= control target key end

     0   :  { %s5019_s21 = smov 0   ;;  %s5021_s22 = smov 0   ;;  %s6710_s0 = inlined_call_operand.vmem [shape: bf16[1808,32], index: 0, kind: input, shape index: {}]   ;;  %s6711_s1 = inlined_call_operand.vmem [shape: bf16[32,1280], index: 1, kind: input, shape index: {}]   ;;  %s6712_s2 = inlined_call_operand.vmem [shape: f32[1,1280], index: 2, kind: input, shape index: {}]   ;;  %s6713_s3 = inlined_call_operand.vmem [shape: bf16[8,1808], index: 3, kind: input, shape index: {}]   ;;  %s6714_s4 = inlined_call_operand.vmem [shape: bf16[1280,128], index: 4, kind: input, shape index: {}]   ;;  %s6715_s5 = inlined_call_operand.vmem [shape: f32[1,128], index: 5, kind: input, shape index: {}]   ;;  %s6716_s6 = inlined_call_operand.vmem [shape: f32[8,128], index: 6, kind: output, shape index: {}]  }
   0x1   :  { %s5023_s23 = smov 0  }
   0x2 LB: > { %s5035_s24 = sadd.s32 4294967295, %s4980_s23   ;;  %s5038_s25 = sadd.s32 1, %s4980_s23   ;;  %s4980_s23 = sphi %s5023_s23, %s7015_s23   ;;  %s4976_s22 = sphi %s5021_s22, %s7014_s22   ;;  %s4972_s21 = sphi %s5019_s21, %s7013_s21  }
   0x3   : > { %s41_s26 = ssub.s32 %s4980_s23, %s5038_s25  ;;  %s44_s27 = sadd.s32 1, %s4976_s22 }
   0x4   : > { %p42_p0 = scmp.eq.s32.totalorder %s41_s26, 0  ;;  %p51_p1 = scmp.ne.s32.totalorder %s4976_s22, %s4972_s21 }
   0x5   : > { %p52_p2 = scmp.eq.s32.totalorder %s4980_s23, 0  ;;  %p4445_p4 = scmp.ge.s32.totalorder %s4980_s23, 5 }
   0x6   : > { %s5047_s28 = scalar_select %p42_p0, %s4976_s22, %s44_s27  }
   0x7   : > { %p53_p3 = por %p52_p2, %p51_p1  ;;  %201 = sbr.rel (%p4445_p4) target bundleno = 21 (0x15), region = 28 }
   0xe   : > { %204 = sbr.rel (!%p53_p3) target bundleno = 21 (0x15), region = 32  ;;  %s206_s29 = sand.u32 (%p53_p3), 1, %s4976_s22  }
   0xf   : > { %s4721_s30 = sshll.u32 (%p53_p3), %s4980_s23, 3  ;;  %s4446_s7 = sshll.u32 (%p53_p3), %s206_s29, 5 }
  0x10   : > { %s211_s10 = scalar_lea.vmem (%p53_p3), %s6711_s1, %s4721_s30  ;;  %s208_s11 = scalar_lea.vmem (%p53_p3), [#allocation3], %s4446_s7 }
  0x11   : > { %v245_v0 = vld [vmem:[%s211_s10] sm:$0xff] (%p53_p3)  ;;  %v247_v1 = vld [vmem:[%s211_s10 + $0x28] sm:$0xff] (%p53_p3)  ;;  %v249_v2 = vld [vmem:[%s211_s10 + $0x50] sm:$0xff] (%p53_p3) }
  0x12   : > { %246 = vst [vmem:[%s208_s11] sm:$0xff] (%p53_p3), %v245_v0  ;;  %248 = vst [vmem:[%s208_s11 + $0x8] sm:$0xff] (%p53_p3), %v247_v1  ;;  %v251_v3 = vld [vmem:[%s211_s10 + $0x78] sm:$0xff] (%p53_p3) }
  0x13   : > { %250 = vst [vmem:[%s208_s11 + $0x10] sm:$0xff] (%p53_p3), %v249_v2  ;;  %252 = vst [vmem:[%s208_s11 + $0x18] sm:$0xff] (%p53_p3), %v251_v3 }
  0x15 PF: > { %p4449_p5 = scmp.ge.s32.totalorder %s4980_s23, 1  ;;  %p274_p6 = scmp.lt.s32.totalorder %s4980_s23, 6 }
  0x17   : > { %p275_p7 = pnand %p4449_p5, %p274_p6 }
  0x19   : > { %278 = sbr.rel (%p275_p7) target bundleno = 1831 (0x727), region = 78 }
  0x20   : > { %s281_s12 = sand.u32 1, %s4972_s21   ;;  %s4451_s13 = sshll.u32 %s5035_s24, 1 }
  0x21   : > { %s4450_s14 = sshll.u32 %s281_s12, 5  ;;  %p316_p8 = scmp.lt.s32.totalorder %s4451_s13, 9 }
  0x22   : > { %s4452_s15 = sshll.u32 %s5035_s24, 5  ;;  %s283_s21 = scalar_lea.vmem [#allocation3], %s4450_s14 }
  0x23   : > { %s7017_s13 = smov (!%p316_p8, %s4451_s13), 9  ;;  %p321_p9 = scmp.lt.s32.totalorder %s4452_s15, 159 }
  0x24   : > { %s318_s18 = scalar_lea.vmem %s6712_s2, %s7017_s13  ;;  %p4454_p10 = scmp.ne.s32.totalorder %s5035_s24, 0 }
  0x25   : > { %s7019_s15 = smov (!%p321_p9, %s4452_s15), 159  ;;  %v4982_v4 = vmov (!%p4454_p10), 0.0  }
  0x26   : > { %s4453_s19 = sshll.u32 %s7019_s15, 2  ;;  %330 = sbr.rel (%p4454_p10) target bundleno = 45 (0x2d), region = 86  ;;  %331 = vst [vmem:[#allocation2] sm:$0xff] (!%p4454_p10), %v4982_v4 }
  0x27   : > { %s5069_s26 = scalar_lea.vmem %s6714_s4, %s4453_s19 }
  0x2d PF: > { %v4802_v5 = vld [vmem:[%s283_s21 + $0x4] ss:$8 sps:$4 sm:$0xff]   ;;  %v4804_v6 = vld [vmem:[%s283_s21] ss:$8 sps:$4 sm:$0xff]   ;;  %v6720_v7 = vmov 0   ;;  %v4808_v10 = vld [vmem:[%s6710_s0] sm:$0xff]   ;;  %v6717_v60 = vlaneseq }
  0x2e   : > { %1531 = vmatprep.mubr.bf16.mxu0 %v6720_v7  ;;  %2371 = vmatprep.mubr.bf16.mxu1 %v6720_v7  ;;  %v4805_v8 = vld [vmem:[%s283_s21 + $0x14] ss:$8 sps:$4 sm:$0xff]   ;;  %v4807_v9 = vld [vmem:[%s283_s21 + $0x10] ss:$8 sps:$4 sm:$0xff]   ;;  %vm1159_vm0 = vcmask 261120   ;;  %v4809_v11 = vld [vmem:[%s6710_s0 + $0x8] sm:$0xff]  }
  0x2f   : > { %1499 = vmatprep.subr.bf16.mxu0 %v4802_v5  ;;  %4744 = vmatprep.subr.bf16.mxu1 %v4802_v5  ;;  %v4824_v12 = vld [vmem:[%s6710_s0 + $0x2a0] sm:$0xff]   ;;  %v4810_v13 = vld [vmem:[%s6710_s0 + $0x10] sm:$0xff]   ;;  %v4826_v14 = vld [vmem:[%s6710_s0 + $0x2a8] sm:$0xff]   ;;  %v565_v62 = vshrl.u32 %v6717_v60, 7  ;;  %vm3852_vm1 = vcmask 130048   ;;  %p4717_p11 = scmp.ne.s32.totalorder %s5035_s24, 4 }
  0x30   : > { %1500 = vmatpush1.bf16.msra.mxu0 %v4804_v6  ;;  %4746 = vmatpush1.bf16.msra.mxu1 %v4804_v6  ;;  %v4811_v15 = vld [vmem:[%s6710_s0 + $0x18] sm:$0xff]   ;;  %v4828_v16 = vld [vmem:[%s6710_s0 + $0x2b0] sm:$0xff]   ;;  %v4812_v17 = vld [vmem:[%s6710_s0 + $0x20] sm:$0xff]  }
  0x31   : > { %1501 = vmatprep.subr.bf16.mxu0 %v4805_v8  ;;  %4745 = vmatprep.subr.bf16.mxu1 %v4805_v8  ;;  %v4830_v18 = vld [vmem:[%s6710_s0 + $0x2b8] sm:$0xff]   ;;  %v4813_v19 = vld [vmem:[%s6710_s0 + $0x28] sm:$0xff]   ;;  %v4832_v20 = vld [vmem:[%s6710_s0 + $0x2c0] sm:$0xff]   ;;  %v566_v0 = vsub.s32 0, %v565_v62  ;;  %v570_v2 = vsub.s32 1, %v565_v62 }
  0x32   : > { %v4814_v21 = vld [vmem:[%s6710_s0 + $0x30] sm:$0xff]   ;;  %v4834_v22 = vld [vmem:[%s6710_s0 + $0x2c8] sm:$0xff]   ;;  %v4815_v23 = vld [vmem:[%s6710_s0 + $0x38] sm:$0xff]  }
  0x33   : > { %v4836_v24 = vld [vmem:[%s6710_s0 + $0x2d0] sm:$0xff]   ;;  %v4816_v25 = vld [vmem:[%s6710_s0 + $0x40] sm:$0xff]   ;;  %v4838_v26 = vld [vmem:[%s6710_s0 + $0x2d8] sm:$0xff]  }
  0x34   : > { %1502 = vmatpush1.bf16.msra.mxu0 %v4807_v9  ;;  %4747 = vmatpush1.bf16.msra.mxu1 %v4807_v9  ;;  %v4817_v27 = vld [vmem:[%s6710_s0 + $0x48] sm:$0xff]   ;;  %v4840_v28 = vld [vmem:[%s6710_s0 + $0x2e0] sm:$0xff]   ;;  %v4818_v29 = vld [vmem:[%s6710_s0 + $0x50] sm:$0xff]  }
  0x35   : > { %v4842_v30 = vld [vmem:[%s6710_s0 + $0x2e8] sm:$0xff]   ;;  %v4819_v31 = vld [vmem:[%s6710_s0 + $0x58] sm:$0xff]   ;;  %v4844_v32 = vld [vmem:[%s6710_s0 + $0x2f0] sm:$0xff]  }
  0x36   : > { %v4820_v33 = vld [vmem:[%s6710_s0 + $0x60] sm:$0xff]   ;;  %v4846_v34 = vld [vmem:[%s6710_s0 + $0x2f8] sm:$0xff]   ;;  %v4821_v35 = vld [vmem:[%s6710_s0 + $0x68] sm:$0xff]  }
  0x37   : > { %4572 = vmatmul.mubr.msk.bf16.vlgmr.msra.gmra.mrb[0].mxu0 %vm1159_vm0, %v4808_v10  ;;  %4656 = vmatmul.mubr.msk.bf16.vlgmr.msra.gmra.mrb[0].mxu1 %vm1159_vm0, %v4824_v12  ;;  %v4848_v36 = vld [vmem:[%s6710_s0 + $0x300] sm:$0xff]   ;;  %v4822_v37 = vld [vmem:[%s6710_s0 + $0x70] sm:$0xff]   ;;  %v4850_v38 = vld [vmem:[%s6710_s0 + $0x308] sm:$0xff]  }
  0x38   : > { %1541 = vmatprep.mubr.bf16.mxu0 %v6720_v7  ;;  %2381 = vmatprep.mubr.bf16.mxu1 %v6720_v7  ;;  %v4823_v39 = vld [vmem:[%s6710_s0 + $0x78] sm:$0xff]   ;;  %v4852_v40 = vld [vmem:[%s6710_s0 + $0x310] sm:$0xff]   ;;  %v4825_v41 = vld [vmem:[%s6710_s0 + $0x80] sm:$0xff]  }
  0x39   : > { %v4854_v42 = vld [vmem:[%s6710_s0 + $0x318] sm:$0xff]   ;;  %v4827_v43 = vld [vmem:[%s6710_s0 + $0x88] sm:$0xff]   ;;  %v4856_v44 = vld [vmem:[%s6710_s0 + $0x320] sm:$0xff]  }
  0x3a   : > { %v4829_v45 = vld [vmem:[%s6710_s0 + $0x90] sm:$0xff]   ;;  %v4858_v46 = vld [vmem:[%s6710_s0 + $0x328] sm:$0xff]   ;;  %v4831_v47 = vld [vmem:[%s6710_s0 + $0x98] sm:$0xff]  }
  0x3b   : > { %v4860_v48 = vld [vmem:[%s6710_s0 + $0x330] sm:$0xff]   ;;  %v4833_v49 = vld [vmem:[%s6710_s0 + $0xa0] sm:$0xff]   ;;  %v4862_v50 = vld [vmem:[%s6710_s0 + $0x338] sm:$0xff]  }
  0x3c   : > { %v4835_v51 = vld [vmem:[%s6710_s0 + $0xa8] sm:$0xff]   ;;  %v4864_v52 = vld [vmem:[%s6710_s0 + $0x340] sm:$0xff]   ;;  %v4837_v53 = vld [vmem:[%s6710_s0 + $0xb0] sm:$0xff]  }
  0x3d   : > { %v4866_v54 = vld [vmem:[%s6710_s0 + $0x348] sm:$0xff]   ;;  %v4839_v55 = vld [vmem:[%s6710_s0 + $0xb8] sm:$0xff]   ;;  %v4868_v56 = vld [vmem:[%s6710_s0 + $0x350] sm:$0xff]  }
  0x3e   : > { %v4841_v57 = vld [vmem:[%s6710_s0 + $0xc0] sm:$0xff]   ;;  %v4870_v58 = vld [vmem:[%s6710_s0 + $0x358] sm:$0xff]   ;;  %v4843_v59 = vld [vmem:[%s6710_s0 + $0xc8] sm:$0xff]  }
  0x3f   : > { %4573 = vmatmul.mubr.msk.bf16.gmra.mrb[4].mxu0 %vm1159_vm0, %v4809_v11  ;;  %4657 = vmatmul.mubr.msk.bf16.gmra.mrb[4].mxu1 %vm1159_vm0, %v4826_v14  ;;  %v4872_v61 = vld [vmem:[%s6710_s0 + $0x360] sm:$0xff]   ;;  %v4845_v63 = vld [vmem:[%s6710_s0 + $0xd0] sm:$0xff]   ;;  %v4874_v3 = vld [vmem:[%s6710_s0 + $0x368] sm:$0xff]  }
  0x40   : > { %1551 = vmatprep.mubr.bf16.mxu0 %v6720_v7  ;;  %2391 = vmatprep.mubr.bf16.mxu1 %v6720_v7  ;;  %v562_v1 = vld [vmem:[%s318_s18] sm:$0x3]  ;;  %v4847_v10 = vld [vmem:[%s6710_s0 + $0xd8] sm:$0xff]  }
  0x41   : > { %v5342_v4 = vrot.slane %v562_v1, %v566_v0  ;;  %v5344_v5 = vrot.slane %v562_v1, %v570_v2 }
  0x47   : > { %4574 = vmatmul.mubr.msk.bf16.gmra.mrb[8].mxu0 %vm1159_vm0, %v4810_v13  ;;  %4658 = vmatmul.mubr.msk.bf16.gmra.mrb[8].mxu1 %vm1159_vm0, %v4828_v16 }
  0x48   : > { %1561 = vmatprep.mubr.bf16.mxu0 %v6720_v7  ;;  %2401 = vmatprep.mubr.bf16.mxu1 %v6720_v7 }
  0x4f   : > { %4575 = vmatmul.mubr.msk.bf16.gmra.mrb[12].mxu0 %vm1159_vm0, %v4811_v15  ;;  %4659 = vmatmul.mubr.msk.bf16.gmra.mrb[12].mxu1 %vm1159_vm0, %v4830_v18  ;;  %v4876_v18 = vld [vmem:[%s6710_s0 + $0x370] sm:$0xff]  }
  0x50   : > { %1571 = vmatprep.mubr.bf16.mxu0 %v6720_v7  ;;  %2411 = vmatprep.mubr.bf16.mxu1 %v6720_v7 }
  0x57   : > { %4576 = vmatmul.mubr.msk.bf16.gmra.mrb[16].mxu0 %vm1159_vm0, %v4812_v17  ;;  %4660 = vmatmul.mubr.msk.bf16.gmra.mrb[16].mxu1 %vm1159_vm0, %v4832_v20 }
  0x58   : > { %1581 = vmatprep.mubr.bf16.mxu0 %v6720_v7  ;;  %2421 = vmatprep.mubr.bf16.mxu1 %v6720_v7 }
  0x5f   : > { %4577 = vmatmul.mubr.msk.bf16.gmra.mrb[20].mxu0 %vm1159_vm0, %v4813_v19  ;;  %4661 = vmatmul.mubr.msk.bf16.gmra.mrb[20].mxu1 %vm1159_vm0, %v4834_v22 }
  0x60   : > { %1591 = vmatprep.mubr.bf16.mxu0 %v6720_v7  ;;  %2431 = vmatprep.mubr.bf16.mxu1 %v6720_v7 }
  0x67   : > { %4578 = vmatmul.mubr.msk.bf16.gmra.mrb[24].mxu0 %vm1159_vm0, %v4814_v21  ;;  %4662 = vmatmul.mubr.msk.bf16.gmra.mrb[24].mxu1 %vm1159_vm0, %v4836_v24 }
  0x68   : > { %1601 = vmatprep.mubr.bf16.mxu0 %v6720_v7  ;;  %2441 = vmatprep.mubr.bf16.mxu1 %v6720_v7 }
  0x6f   : > { %4579 = vmatmul.mubr.msk.bf16.gmra.mrb[28].mxu0 %vm1159_vm0, %v4815_v23  ;;  %4663 = vmatmul.mubr.msk.bf16.gmra.mrb[28].mxu1 %vm1159_vm0, %v4838_v26 }
  0x70   : > { %1611 = vmatprep.mubr.bf16.mxu0 %v6720_v7  ;;  %2451 = vmatprep.mubr.bf16.mxu1 %v6720_v7 }
  0x77   : > { %4580 = vmatmul.mubr.msk.bf16.gmra.mrb[32].mxu0 %vm1159_vm0, %v4816_v25  ;;  %4664 = vmatmul.mubr.msk.bf16.gmra.mrb[32].mxu1 %vm1159_vm0, %v4840_v28 }
  0x78   : > { %1621 = vmatprep.mubr.bf16.mxu0 %v6720_v7  ;;  %2461 = vmatprep.mubr.bf16.mxu1 %v6720_v7 }
  0x7f   : > { %4581 = vmatmul.mubr.msk.bf16.gmra.mrb[36].mxu0 %vm1159_vm0, %v4817_v27  ;;  %4665 = vmatmul.mubr.msk.bf16.gmra.mrb[36].mxu1 %vm1159_vm0, %v4842_v30 }
  0x80   : > { %1631 = vmatprep.mubr.bf16.mxu0 %v6720_v7  ;;  %2471 = vmatprep.mubr.bf16.mxu1 %v6720_v7 }
  0x87   : > { %4582 = vmatmul.mubr.msk.bf16.gmra.mrb[40].mxu0 %vm1159_vm0, %v4818_v29  ;;  %4666 = vmatmul.mubr.msk.bf16.gmra.mrb[40].mxu1 %vm1159_vm0, %v4844_v32  ;;  %v4849_v29 = vld [vmem:[%s6710_s0 + $0xe0] sm:$0xff]  }
  0x88   : > { %1641 = vmatprep.mubr.bf16.mxu0 %v6720_v7  ;;  %2481 = vmatprep.mubr.bf16.mxu1 %v6720_v7 }
  0x8f   : > { %4583 = vmatmul.mubr.msk.bf16.gmra.mrb[44].mxu0 %vm1159_vm0, %v4819_v31  ;;  %4667 = vmatmul.mubr.msk.bf16.gmra.mrb[44].mxu1 %vm1159_vm0, %v4846_v34 }
  0x90   : > { %1651 = vmatprep.mubr.bf16.mxu0 %v6720_v7  ;;  %2491 = vmatprep.mubr.bf16.mxu1 %v6720_v7 }
  0x97   : > { %4584 = vmatmul.mubr.msk.bf16.gmra.mrb[48].mxu0 %vm1159_vm0, %v4820_v33  ;;  %4668 = vmatmul.mubr.msk.bf16.gmra.mrb[48].mxu1 %vm1159_vm0, %v4848_v36 }
  0x98   : > { %1661 = vmatprep.mubr.bf16.mxu0 %v6720_v7  ;;  %2501 = vmatprep.mubr.bf16.mxu1 %v6720_v7 }
  0x9f   : > { %4585 = vmatmul.mubr.msk.bf16.gmra.mrb[52].mxu0 %vm1159_vm0, %v4821_v35  ;;  %4669 = vmatmul.mubr.msk.bf16.gmra.mrb[52].mxu1 %vm1159_vm0, %v4850_v38  ;;  %v4878_v38 = vld [vmem:[%s6710_s0 + $0x378] sm:$0xff]  }
  0xa0   : > { %1671 = vmatprep.mubr.bf16.mxu0 %v6720_v7  ;;  %2511 = vmatprep.mubr.bf16.mxu1 %v6720_v7 }
  0xa7   : > { %4586 = vmatmul.mubr.msk.bf16.gmra.mrb[56].mxu0 %vm1159_vm0, %v4822_v37  ;;  %4670 = vmatmul.mubr.msk.bf16.gmra.mrb[56].mxu1 %vm1159_vm0, %v4852_v40 }
  0xa8   : > { %1681 = vmatprep.mubr.bf16.mxu0 %v6720_v7  ;;  %2521 = vmatprep.mubr.bf16.mxu1 %v6720_v7 }
  0xaf   : > { %4587 = vmatmul.mubr.msk.bf16.gmra.mrb[60].mxu0 %vm1159_vm0, %v4823_v39  ;;  %4671 = vmatmul.mubr.msk.bf16.gmra.mrb[60].mxu1 %vm1159_vm0, %v4854_v42 }
  0xb0   : > { %1691 = vmatprep.mubr.bf16.mxu0 %v6720_v7  ;;  %2531 = vmatprep.mubr.bf16.mxu1 %v6720_v7 }
  0xb7   : > { %4588 = vmatmul.mubr.msk.bf16.gmra.mrb[64].mxu0 %vm1159_vm0, %v4825_v41  ;;  %4672 = vmatmul.mubr.msk.bf16.gmra.mrb[64].mxu1 %vm1159_vm0, %v4856_v44 }
  0xb8   : > { %1701 = vmatprep.mubr.bf16.mxu0 %v6720_v7  ;;  %2541 = vmatprep.mubr.bf16.mxu1 %v6720_v7 }
  0xbf   : > { %4589 = vmatmul.mubr.msk.bf16.gmra.mrb[68].mxu0 %vm1159_vm0, %v4827_v43  ;;  %4673 = vmatmul.mubr.msk.bf16.gmra.mrb[68].mxu1 %vm1159_vm0, %v4858_v46 }
  0xc0   : > { %1711 = vmatprep.mubr.bf16.mxu0 %v6720_v7  ;;  %2551 = vmatprep.mubr.bf16.mxu1 %v6720_v7 }
  0xc7   : > { %4590 = vmatmul.mubr.msk.bf16.gmra.mrb[72].mxu0 %vm1159_vm0, %v4829_v45  ;;  %4674 = vmatmul.mubr.msk.bf16.gmra.mrb[72].mxu1 %vm1159_vm0, %v4860_v48 }
  0xc8   : > { %1721 = vmatprep.mubr.bf16.mxu0 %v6720_v7  ;;  %2561 = vmatprep.mubr.bf16.mxu1 %v6720_v7 }
  0xcf   : > { %4591 = vmatmul.mubr.msk.bf16.gmra.mrb[76].mxu0 %vm1159_vm0, %v4831_v47  ;;  %4675 = vmatmul.mubr.msk.bf16.gmra.mrb[76].mxu1 %vm1159_vm0, %v4862_v50 }
  0xd0   : > { %1731 = vmatprep.mubr.bf16.mxu0 %v6720_v7  ;;  %2571 = vmatprep.mubr.bf16.mxu1 %v6720_v7 }
  0xd7   : > { %4592 = vmatmul.mubr.msk.bf16.gmra.mrb[80].mxu0 %vm1159_vm0, %v4833_v49  ;;  %4676 = vmatmul.mubr.msk.bf16.gmra.mrb[80].mxu1 %vm1159_vm0, %v4864_v52  ;;  %v4851_v49 = vld [vmem:[%s6710_s0 + $0xe8] sm:$0xff]  }
  0xd8   : > { %1741 = vmatprep.mubr.bf16.mxu0 %v6720_v7  ;;  %2581 = vmatprep.mubr.bf16.mxu1 %v6720_v7 }
  0xdf   : > { %4593 = vmatmul.mubr.msk.bf16.gmra.mrb[84].mxu0 %vm1159_vm0, %v4835_v51  ;;  %4677 = vmatmul.mubr.msk.bf16.gmra.mrb[84].mxu1 %vm1159_vm0, %v4866_v54 }
  0xe0   : > { %1751 = vmatprep.mubr.bf16.mxu0 %v6720_v7  ;;  %2591 = vmatprep.mubr.bf16.mxu1 %v6720_v7 }
  0xe7   : > { %4594 = vmatmul.mubr.msk.bf16.gmra.mrb[88].mxu0 %vm1159_vm0, %v4837_v53  ;;  %4678 = vmatmul.mubr.msk.bf16.gmra.mrb[88].mxu1 %vm1159_vm0, %v4868_v56  ;;  %v5385_v53 = vld [vmem:[%s6713_s3] sm:$0xff] }
  0xe8   : > { %1761 = vmatprep.mubr.bf16.mxu0 %v6720_v7  ;;  %2601 = vmatprep.mubr.bf16.mxu1 %v6720_v7  ;;  %v4686_v62 = vcombine.high %v5385_v53, %v5385_v53 }
  0xef   : > { %4595 = vmatmul.mubr.msk.bf16.gmra.mrb[92].mxu0 %vm1159_vm0, %v4839_v55  ;;  %4679 = vmatmul.mubr.msk.bf16.gmra.mrb[92].mxu1 %vm1159_vm0, %v4870_v58 }
  0xf0   : > { %1771 = vmatprep.mubr.bf16.mxu0 %v6720_v7  ;;  %2611 = vmatprep.mubr.bf16.mxu1 %v6720_v7 }
  0xf7   : > { %4596 = vmatmul.mubr.msk.bf16.gmra.mrb[96].mxu0 %vm1159_vm0, %v4841_v57  ;;  %4680 = vmatmul.mubr.msk.bf16.gmra.mrb[96].mxu1 %vm1159_vm0, %v4872_v61 }
  0xf8   : > { %1781 = vmatprep.mubr.bf16.mxu0 %v6720_v7  ;;  %2621 = vmatprep.mubr.bf16.mxu1 %v6720_v7 }
  0xff   : > { %4597 = vmatmul.mubr.msk.bf16.gmra.mrb[100].mxu0 %vm1159_vm0, %v4843_v59  ;;  %4681 = vmatmul.mubr.msk.bf16.gmra.mrb[100].mxu1 %vm1159_vm0, %v4874_v3  ;;  %v4880_v59 = vld [vmem:[%s6710_s0 + $0x380] sm:$0xff]  }
 0x100   : > { %1791 = vmatprep.mubr.bf16.mxu0 %v6720_v7  ;;  %2631 = vmatprep.mubr.bf16.mxu1 %v6720_v7 }
 0x107   : > { %4598 = vmatmul.mubr.msk.bf16.gmra.mrb[104].mxu0 %vm1159_vm0, %v4845_v63  ;;  %4682 = vmatmul.mubr.msk.bf16.gmra.mrb[104].mxu1 %vm1159_vm0, %v4876_v18 }
 0x108   : > { %1801 = vmatprep.mubr.bf16.mxu0 %v6720_v7  ;;  %2641 = vmatprep.mubr.bf16.mxu1 %v6720_v7 }
 0x10a   : > { %v1533_v6 = vpop.f32.mrb[0].mxu0 }
 0x10b   : > { %v1534_v8 = vadd.f32 %v1533_v6, %v5342_v4  ;;  %v1535_v9 = vpop.f32.mrb[1].mxu0 }
 0x10c   : > { %v1536_v11 = vadd.f32 %v1535_v9, %v5344_v5  ;;  %v1537_v12 = vpop.f32.mrb[2].mxu0 }
 0x10d   : > { %v2662_v13 = vmax.f32 %v1534_v8, 0.0  ;;  %v1538_v14 = vadd.f32 %v1537_v12, %v5342_v4  ;;  %v1539_v15 = vpop.f32.mrb[3].mxu0 }
 0x10e   : > { %v2663_v16 = vmax.f32 %v1536_v11, 0.0  ;;  %v1540_v17 = vadd.f32 %v1539_v15, %v5344_v5  ;;  %v4853_v11 = vld [vmem:[%s6710_s0 + $0xf0] sm:$0xff]  }
 0x10f   : > { %v2664_v19 = vmax.f32 %v1538_v14, 0.0  ;;  %4599 = vmatmul.mubr.msk.bf16.gmra.mrb[108].mxu0 %vm1159_vm0, %v4847_v10  ;;  %v3114_v21 = vmin.f32 %v2662_v13, 6.0  ;;  %4683 = vmatmul.mubr.msk.bf16.gmra.mrb[108].mxu1 %vm1159_vm0, %v4878_v38 }
 0x110   : > { %v2665_v20 = vmax.f32 %v1540_v17, 0.0  ;;  %1811 = vmatprep.mubr.bf16.mxu0 %v6720_v7  ;;  %v3115_v23 = vmin.f32 %v2663_v16, 6.0  ;;  %2651 = vmatprep.mubr.bf16.mxu1 %v6720_v7 }
 0x111   : > { %v3116_v22 = vmin.f32 %v2664_v19, 6.0 }
 0x112   : > { %v3117_v24 = vmin.f32 %v2665_v20, 6.0  ;;  %v1543_v25 = vpop.f32.mrb[4].mxu0 }
 0x113   : > { %v3574_v26 = vpack.c.bf16 %v3116_v22, %v3114_v21  ;;  %v1544_v27 = vadd.f32 %v1543_v25, %v5342_v4  ;;  %v1545_v28 = vpop.f32.mrb[5].mxu0 }
 0x114   : > { %v1546_v30 = vadd.f32 %v1545_v28, %v5344_v5  ;;  %v1547_v31 = vpop.f32.mrb[6].mxu0  ;;  %v3575_v32 = vpack.c.bf16 %v3117_v24, %v3115_v23 }
 0x115   : > { %v2666_v33 = vmax.f32 %v1544_v27, 0.0  ;;  %v1548_v34 = vadd.f32 %v1547_v31, %v5342_v4  ;;  %v1549_v35 = vpop.f32.mrb[7].mxu0 }
 0x116   : > { %v2667_v36 = vmax.f32 %v1546_v30, 0.0  ;;  %v1550_v37 = vadd.f32 %v1549_v35, %v5344_v5  ;;  %3856 = vmatprep.subr.bf16.mxu1 %v3575_v32  ;;  %v4855_v30 = vld [vmem:[%s6710_s0 + $0xf8] sm:$0xff]  }
 0x117   : > { %v2668_v39 = vmax.f32 %v1548_v34, 0.0  ;;  %4600 = vmatmul.mubr.msk.bf16.gmra.mrb[112].mxu0 %vm1159_vm0, %v4849_v29  ;;  %3857 = vmatpush1.bf16.msra.mxu1 %v3574_v26  ;;  %v3118_v41 = vmin.f32 %v2666_v33, 6.0 }
 0x118   : > { %v2669_v40 = vmax.f32 %v1550_v37, 0.0  ;;  %1821 = vmatprep.mubr.bf16.mxu0 %v6720_v7  ;;  %v3119_v43 = vmin.f32 %v2667_v36, 6.0  ;;  %4684 = vmatmul.mubr.msk.bf16.gmra.mrb[112].mxu1 %vm1159_vm0, %v4880_v59 }
 0x119   : > { %v3120_v42 = vmin.f32 %v2668_v39, 6.0  ;;  %3888 = vmatprep.mubr.bf16.mxu1 %v4686_v62 }
 0x11a   : > { %v3121_v44 = vmin.f32 %v2669_v40, 6.0  ;;  %v1553_v45 = vpop.f32.mrb[8].mxu0 }
 0x11b   : > { %v3576_v46 = vpack.c.bf16 %v3120_v42, %v3118_v41  ;;  %v1554_v47 = vadd.f32 %v1553_v45, %v5342_v4  ;;  %v1555_v48 = vpop.f32.mrb[9].mxu0 }
 0x11c   : > { %v1556_v50 = vadd.f32 %v1555_v48, %v5344_v5  ;;  %v1557_v51 = vpop.f32.mrb[10].mxu0  ;;  %v3577_v52 = vpack.c.bf16 %v3121_v44, %v3119_v43 }
 0x11d   : > { %v2670_v54 = vmax.f32 %v1554_v47, 0.0  ;;  %v1558_v55 = vadd.f32 %v1557_v51, %v5342_v4  ;;  %v1559_v56 = vpop.f32.mrb[11].mxu0 }
 0x11e   : > { %v2671_v57 = vmax.f32 %v1556_v50, 0.0  ;;  %v1560_v58 = vadd.f32 %v1559_v56, %v5344_v5  ;;  %3858 = vmatprep.subr.bf16.mxu1 %v3577_v52 }
 0x11f   : > { %v2672_v61 = vmax.f32 %v1558_v55, 0.0  ;;  %4601 = vmatmul.mubr.msk.bf16.gmra.mrb[116].mxu0 %vm1159_vm0, %v4851_v49  ;;  %3859 = vmatpush1.bf16.msra.mxu1 %v3576_v46  ;;  %v3122_v0 = vmin.f32 %v2670_v54, 6.0  ;;  %v4857_v49 = vld [vmem:[%s6710_s0 + $0x100] sm:$0xff]  }
 0x120   : > { %v2673_v63 = vmax.f32 %v1560_v58, 0.0  ;;  %1831 = vmatprep.mubr.bf16.mxu0 %v6720_v7  ;;  %v3123_v2 = vmin.f32 %v2671_v57, 6.0 }
 0x121   : > { %v3124_v1 = vmin.f32 %v2672_v61, 6.0 }
 0x122   : > { %v3125_v3 = vmin.f32 %v2673_v63, 6.0  ;;  %v1563_v6 = vpop.f32.mrb[12].mxu0 }
 0x123   : > { %v3578_v8 = vpack.c.bf16 %v3124_v1, %v3122_v0  ;;  %v1564_v9 = vadd.f32 %v1563_v6, %v5342_v4  ;;  %v1565_v10 = vpop.f32.mrb[13].mxu0 }
 0x124   : > { %v1566_v12 = vadd.f32 %v1565_v10, %v5344_v5  ;;  %v1567_v13 = vpop.f32.mrb[14].mxu0  ;;  %v3579_v14 = vpack.c.bf16 %v3125_v3, %v3123_v2 }
 0x125   : > { %v2674_v15 = vmax.f32 %v1564_v9, 0.0  ;;  %v1568_v16 = vadd.f32 %v1567_v13, %v5342_v4  ;;  %v1569_v17 = vpop.f32.mrb[15].mxu0  ;;  %v4859_v9 = vld [vmem:[%s6710_s0 + $0x108] sm:$0xff]  }
 0x126   : > { %v2675_v18 = vmax.f32 %v1566_v12, 0.0  ;;  %v1570_v19 = vadd.f32 %v1569_v17, %v5344_v5  ;;  %3860 = vmatprep.subr.bf16.mxu1 %v3579_v14 }
 0x127   : > { %v2676_v20 = vmax.f32 %v1568_v16, 0.0  ;;  %4602 = vmatmul.mubr.msk.bf16.gmra.mrb[120].mxu0 %vm1159_vm0, %v4853_v11  ;;  %3861 = vmatpush1.bf16.msra.mxu1 %v3578_v8  ;;  %v3126_v22 = vmin.f32 %v2674_v15, 6.0 }
 0x128   : > { %v2677_v21 = vmax.f32 %v1570_v19, 0.0  ;;  %1841 = vmatprep.mubr.bf16.mxu0 %v6720_v7  ;;  %v3127_v24 = vmin.f32 %v2675_v18, 6.0 }
 0x129   : > { %v3128_v23 = vmin.f32 %v2676_v20, 6.0 }
 0x12a   : > { %v3129_v25 = vmin.f32 %v2677_v21, 6.0  ;;  %v1573_v26 = vpop.f32.mrb[16].mxu0 }
 0x12b   : > { %v3580_v27 = vpack.c.bf16 %v3128_v23, %v3126_v22  ;;  %v1574_v28 = vadd.f32 %v1573_v26, %v5342_v4  ;;  %v1575_v29 = vpop.f32.mrb[17].mxu0 }
 0x12c   : > { %v1576_v31 = vadd.f32 %v1575_v29, %v5344_v5  ;;  %v1577_v32 = vpop.f32.mrb[18].mxu0  ;;  %v3581_v33 = vpack.c.bf16 %v3129_v25, %v3127_v24 }
 0x12d   : > { %v2678_v34 = vmax.f32 %v1574_v28, 0.0  ;;  %v1578_v35 = vadd.f32 %v1577_v32, %v5342_v4  ;;  %v1579_v36 = vpop.f32.mrb[19].mxu0  ;;  %v4861_v28 = vld [vmem:[%s6710_s0 + $0x110] sm:$0xff]  }
 0x12e   : > { %v2679_v37 = vmax.f32 %v1576_v31, 0.0  ;;  %v1580_v38 = vadd.f32 %v1579_v36, %v5344_v5  ;;  %3862 = vmatprep.subr.bf16.mxu1 %v3581_v33 }
 0x12f   : > { %v2680_v39 = vmax.f32 %v1578_v35, 0.0  ;;  %4603 = vmatmul.mubr.msk.bf16.gmra.mrb[124].mxu0 %vm1159_vm0, %v4855_v30  ;;  %3863 = vmatpush1.bf16.msra.mxu1 %v3580_v27  ;;  %v3130_v41 = vmin.f32 %v2678_v34, 6.0 }
 0x130   : > { %v2681_v40 = vmax.f32 %v1580_v38, 0.0  ;;  %1851 = vmatprep.mubr.bf16.mxu0 %v6720_v7  ;;  %v3131_v43 = vmin.f32 %v2679_v37, 6.0 }
 0x131   : > { %v3132_v42 = vmin.f32 %v2680_v39, 6.0 }
 0x132   : > { %v3133_v44 = vmin.f32 %v2681_v40, 6.0  ;;  %v1583_v45 = vpop.f32.mrb[20].mxu0 }
 0x133   : > { %v3582_v46 = vpack.c.bf16 %v3132_v42, %v3130_v41  ;;  %v1584_v47 = vadd.f32 %v1583_v45, %v5342_v4  ;;  %v1585_v48 = vpop.f32.mrb[21].mxu0 }
 0x134   : > { %v1586_v50 = vadd.f32 %v1585_v48, %v5344_v5  ;;  %v1587_v51 = vpop.f32.mrb[22].mxu0  ;;  %v3583_v52 = vpack.c.bf16 %v3133_v44, %v3131_v43 }
 0x135   : > { %v2682_v54 = vmax.f32 %v1584_v47, 0.0  ;;  %v1588_v55 = vadd.f32 %v1587_v51, %v5342_v4  ;;  %v1589_v56 = vpop.f32.mrb[23].mxu0  ;;  %v4863_v47 = vld [vmem:[%s6710_s0 + $0x118] sm:$0xff]  }
 0x136   : > { %v2683_v57 = vmax.f32 %v1586_v50, 0.0  ;;  %v1590_v58 = vadd.f32 %v1589_v56, %v5344_v5  ;;  %3864 = vmatprep.subr.bf16.mxu1 %v3583_v52 }
 0x137   : > { %v2684_v59 = vmax.f32 %v1588_v55, 0.0  ;;  %4604 = vmatmul.mubr.msk.bf16.gmra.mrb[128].mxu0 %vm1159_vm0, %v4857_v49  ;;  %3865 = vmatpush1.bf16.msra.mxu1 %v3582_v46  ;;  %v3134_v62 = vmin.f32 %v2682_v54, 6.0 }
 0x138   : > { %v2685_v61 = vmax.f32 %v1590_v58, 0.0  ;;  %1861 = vmatprep.mubr.bf16.mxu0 %v6720_v7  ;;  %v3135_v0 = vmin.f32 %v2683_v57, 6.0 }
 0x139   : > { %v3136_v63 = vmin.f32 %v2684_v59, 6.0 }
 0x13a   : > { %v3137_v1 = vmin.f32 %v2685_v61, 6.0  ;;  %v1593_v2 = vpop.f32.mrb[24].mxu0 }
 0x13b   : > { %v3584_v3 = vpack.c.bf16 %v3136_v63, %v3134_v62  ;;  %v1594_v6 = vadd.f32 %v1593_v2, %v5342_v4  ;;  %v1595_v8 = vpop.f32.mrb[25].mxu0 }
 0x13c   : > { %v1596_v10 = vadd.f32 %v1595_v8, %v5344_v5  ;;  %v1597_v11 = vpop.f32.mrb[26].mxu0  ;;  %v3585_v12 = vpack.c.bf16 %v3137_v1, %v3135_v0 }
 0x13d   : > { %v2686_v13 = vmax.f32 %v1594_v6, 0.0  ;;  %v1598_v14 = vadd.f32 %v1597_v11, %v5342_v4  ;;  %v1599_v15 = vpop.f32.mrb[27].mxu0  ;;  %v4865_v6 = vld [vmem:[%s6710_s0 + $0x120] sm:$0xff]  }
 0x13e   : > { %v2687_v16 = vmax.f32 %v1596_v10, 0.0  ;;  %v1600_v17 = vadd.f32 %v1599_v15, %v5344_v5  ;;  %3866 = vmatprep.subr.bf16.mxu1 %v3585_v12 }
 0x13f   : > { %v2688_v18 = vmax.f32 %v1598_v14, 0.0  ;;  %4605 = vmatmul.mubr.msk.bf16.gmra.mrb[132].mxu0 %vm1159_vm0, %v4859_v9  ;;  %3867 = vmatpush1.bf16.msra.mxu1 %v3584_v3  ;;  %v3138_v20 = vmin.f32 %v2686_v13, 6.0 }
 0x140   : > { %v2689_v19 = vmax.f32 %v1600_v17, 0.0  ;;  %1871 = vmatprep.mubr.bf16.mxu0 %v6720_v7  ;;  %v3139_v22 = vmin.f32 %v2687_v16, 6.0 }
 0x141   : > { %v3140_v21 = vmin.f32 %v2688_v18, 6.0 }
 0x142   : > { %v3141_v23 = vmin.f32 %v2689_v19, 6.0  ;;  %v1603_v24 = vpop.f32.mrb[28].mxu0 }
 0x143   : > { %v3586_v25 = vpack.c.bf16 %v3140_v21, %v3138_v20  ;;  %v1604_v26 = vadd.f32 %v1603_v24, %v5342_v4  ;;  %v1605_v27 = vpop.f32.mrb[29].mxu0 }
 0x144   : > { %v1606_v29 = vadd.f32 %v1605_v27, %v5344_v5  ;;  %v1607_v30 = vpop.f32.mrb[30].mxu0  ;;  %v3587_v31 = vpack.c.bf16 %v3141_v23, %v3139_v22 }
 0x145   : > { %v2690_v32 = vmax.f32 %v1604_v26, 0.0  ;;  %v1608_v33 = vadd.f32 %v1607_v30, %v5342_v4  ;;  %v1609_v34 = vpop.f32.mrb[31].mxu0  ;;  %v4867_v26 = vld [vmem:[%s6710_s0 + $0x128] sm:$0xff]  }
 0x146   : > { %v2691_v35 = vmax.f32 %v1606_v29, 0.0  ;;  %v1610_v36 = vadd.f32 %v1609_v34, %v5344_v5  ;;  %3868 = vmatprep.subr.bf16.mxu1 %v3587_v31 }
 0x147   : > { %v2692_v37 = vmax.f32 %v1608_v33, 0.0  ;;  %4606 = vmatmul.mubr.msk.bf16.gmra.mrb[136].mxu0 %vm1159_vm0, %v4861_v28  ;;  %3869 = vmatpush1.bf16.msra.mxu1 %v3586_v25  ;;  %v3142_v39 = vmin.f32 %v2690_v32, 6.0 }
 0x148   : > { %v2693_v38 = vmax.f32 %v1610_v36, 0.0  ;;  %1881 = vmatprep.mubr.bf16.mxu0 %v6720_v7  ;;  %v3143_v41 = vmin.f32 %v2691_v35, 6.0 }
 0x149   : > { %v3144_v40 = vmin.f32 %v2692_v37, 6.0 }
 0x14a   : > { %v3145_v42 = vmin.f32 %v2693_v38, 6.0  ;;  %v1613_v43 = vpop.f32.mrb[32].mxu0 }
 0x14b   : > { %v3588_v44 = vpack.c.bf16 %v3144_v40, %v3142_v39  ;;  %v1614_v45 = vadd.f32 %v1613_v43, %v5342_v4  ;;  %v1615_v46 = vpop.f32.mrb[33].mxu0 }
 0x14c   : > { %v1616_v48 = vadd.f32 %v1615_v46, %v5344_v5  ;;  %v1617_v49 = vpop.f32.mrb[34].mxu0  ;;  %v3589_v50 = vpack.c.bf16 %v3145_v42, %v3143_v41 }
 0x14d   : > { %v2694_v51 = vmax.f32 %v1614_v45, 0.0  ;;  %v1618_v52 = vadd.f32 %v1617_v49, %v5342_v4  ;;  %v1619_v54 = vpop.f32.mrb[35].mxu0  ;;  %v4869_v45 = vld [vmem:[%s6710_s0 + $0x130] sm:$0xff]  }
 0x14e   : > { %v2695_v55 = vmax.f32 %v1616_v48, 0.0  ;;  %v1620_v56 = vadd.f32 %v1619_v54, %v5344_v5  ;;  %3870 = vmatprep.subr.bf16.mxu1 %v3589_v50 }
 0x14f   : > { %v2696_v57 = vmax.f32 %v1618_v52, 0.0  ;;  %4607 = vmatmul.mubr.msk.bf16.gmra.mrb[140].mxu0 %vm1159_vm0, %v4863_v47  ;;  %3871 = vmatpush1.bf16.msra.mxu1 %v3588_v44  ;;  %v3146_v59 = vmin.f32 %v2694_v51, 6.0 }
 0x150   : > { %v2697_v58 = vmax.f32 %v1620_v56, 0.0  ;;  %1891 = vmatprep.mubr.bf16.mxu0 %v6720_v7  ;;  %v3147_v62 = vmin.f32 %v2695_v55, 6.0 }
 0x151   : > { %v3148_v61 = vmin.f32 %v2696_v57, 6.0 }
 0x152   : > { %v3149_v63 = vmin.f32 %v2697_v58, 6.0  ;;  %v1623_v0 = vpop.f32.mrb[36].mxu0 }
 0x153   : > { %v3590_v1 = vpack.c.bf16 %v3148_v61, %v3146_v59  ;;  %v1624_v2 = vadd.f32 %v1623_v0, %v5342_v4  ;;  %v1625_v3 = vpop.f32.mrb[37].mxu0 }
 0x154   : > { %v1626_v8 = vadd.f32 %v1625_v3, %v5344_v5  ;;  %v1627_v9 = vpop.f32.mrb[38].mxu0  ;;  %v3591_v10 = vpack.c.bf16 %v3149_v63, %v3147_v62 }
 0x155   : > { %v2698_v11 = vmax.f32 %v1624_v2, 0.0  ;;  %v1628_v12 = vadd.f32 %v1627_v9, %v5342_v4  ;;  %v1629_v13 = vpop.f32.mrb[39].mxu0  ;;  %v4871_v2 = vld [vmem:[%s6710_s0 + $0x138] sm:$0xff]  }
 0x156   : > { %v2699_v14 = vmax.f32 %v1626_v8, 0.0  ;;  %v1630_v15 = vadd.f32 %v1629_v13, %v5344_v5  ;;  %3872 = vmatprep.subr.bf16.mxu1 %v3591_v10 }
 0x157   : > { %v2700_v16 = vmax.f32 %v1628_v12, 0.0  ;;  %4608 = vmatmul.mubr.msk.bf16.gmra.mrb[144].mxu0 %vm1159_vm0, %v4865_v6  ;;  %3873 = vmatpush1.bf16.msra.mxu1 %v3590_v1  ;;  %v3150_v18 = vmin.f32 %v2698_v11, 6.0 }
 0x158   : > { %v2701_v17 = vmax.f32 %v1630_v15, 0.0  ;;  %1901 = vmatprep.mubr.bf16.mxu0 %v6720_v7  ;;  %v3151_v20 = vmin.f32 %v2699_v14, 6.0 }
 0x159   : > { %v3152_v19 = vmin.f32 %v2700_v16, 6.0 }
 0x15a   : > { %v3153_v21 = vmin.f32 %v2701_v17, 6.0  ;;  %v1633_v22 = vpop.f32.mrb[40].mxu0 }
 0x15b   : > { %v3592_v23 = vpack.c.bf16 %v3152_v19, %v3150_v18  ;;  %v1634_v24 = vadd.f32 %v1633_v22, %v5342_v4  ;;  %v1635_v25 = vpop.f32.mrb[41].mxu0 }
 0x15c   : > { %v1636_v27 = vadd.f32 %v1635_v25, %v5344_v5  ;;  %v1637_v28 = vpop.f32.mrb[42].mxu0  ;;  %v3593_v29 = vpack.c.bf16 %v3153_v21, %v3151_v20 }
 0x15d   : > { %v2702_v30 = vmax.f32 %v1634_v24, 0.0  ;;  %v1638_v31 = vadd.f32 %v1637_v28, %v5342_v4  ;;  %v1639_v32 = vpop.f32.mrb[43].mxu0  ;;  %v4873_v24 = vld [vmem:[%s6710_s0 + $0x140] sm:$0xff]  }
 0x15e   : > { %v2703_v33 = vmax.f32 %v1636_v27, 0.0  ;;  %v1640_v34 = vadd.f32 %v1639_v32, %v5344_v5  ;;  %3874 = vmatprep.subr.bf16.mxu1 %v3593_v29 }
 0x15f   : > { %v2704_v35 = vmax.f32 %v1638_v31, 0.0  ;;  %4609 = vmatmul.mubr.msk.bf16.gmra.mrb[148].mxu0 %vm1159_vm0, %v4867_v26  ;;  %3875 = vmatpush1.bf16.msra.mxu1 %v3592_v23  ;;  %v3154_v37 = vmin.f32 %v2702_v30, 6.0 }
 0x160   : > { %v2705_v36 = vmax.f32 %v1640_v34, 0.0  ;;  %1911 = vmatprep.mubr.bf16.mxu0 %v6720_v7  ;;  %v3155_v39 = vmin.f32 %v2703_v33, 6.0 }
 0x161   : > { %v3156_v38 = vmin.f32 %v2704_v35, 6.0 }
 0x162   : > { %v3157_v40 = vmin.f32 %v2705_v36, 6.0  ;;  %v1643_v41 = vpop.f32.mrb[44].mxu0 }
 0x163   : > { %v3594_v42 = vpack.c.bf16 %v3156_v38, %v3154_v37  ;;  %v1644_v43 = vadd.f32 %v1643_v41, %v5342_v4  ;;  %v1645_v44 = vpop.f32.mrb[45].mxu0 }
 0x164   : > { %v1646_v46 = vadd.f32 %v1645_v44, %v5344_v5  ;;  %v1647_v47 = vpop.f32.mrb[46].mxu0  ;;  %v3595_v48 = vpack.c.bf16 %v3157_v40, %v3155_v39 }
 0x165   : > { %v2706_v49 = vmax.f32 %v1644_v43, 0.0  ;;  %v1648_v50 = vadd.f32 %v1647_v47, %v5342_v4  ;;  %v1649_v51 = vpop.f32.mrb[47].mxu0  ;;  %v4875_v43 = vld [vmem:[%s6710_s0 + $0x148] sm:$0xff]  }
 0x166   : > { %v2707_v52 = vmax.f32 %v1646_v46, 0.0  ;;  %v1650_v54 = vadd.f32 %v1649_v51, %v5344_v5  ;;  %3876 = vmatprep.subr.bf16.mxu1 %v3595_v48 }
 0x167   : > { %v2708_v55 = vmax.f32 %v1648_v50, 0.0  ;;  %4610 = vmatmul.mubr.msk.bf16.gmra.mrb[152].mxu0 %vm1159_vm0, %v4869_v45  ;;  %3877 = vmatpush1.bf16.msra.mxu1 %v3594_v42  ;;  %v3158_v57 = vmin.f32 %v2706_v49, 6.0 }
 0x168   : > { %v2709_v56 = vmax.f32 %v1650_v54, 0.0  ;;  %1921 = vmatprep.mubr.bf16.mxu0 %v6720_v7  ;;  %v3159_v59 = vmin.f32 %v2707_v52, 6.0 }
 0x169   : > { %v3160_v58 = vmin.f32 %v2708_v55, 6.0 }
 0x16a   : > { %v3161_v61 = vmin.f32 %v2709_v56, 6.0  ;;  %v1653_v62 = vpop.f32.mrb[48].mxu0 }
 0x16b   : > { %v3596_v63 = vpack.c.bf16 %v3160_v58, %v3158_v57  ;;  %v1654_v0 = vadd.f32 %v1653_v62, %v5342_v4  ;;  %v1655_v1 = vpop.f32.mrb[49].mxu0 }
 0x16c   : > { %v1656_v3 = vadd.f32 %v1655_v1, %v5344_v5  ;;  %v1657_v6 = vpop.f32.mrb[50].mxu0  ;;  %v3597_v8 = vpack.c.bf16 %v3161_v61, %v3159_v59 }
 0x16d   : > { %v2710_v9 = vmax.f32 %v1654_v0, 0.0  ;;  %v1658_v10 = vadd.f32 %v1657_v6, %v5342_v4  ;;  %v1659_v11 = vpop.f32.mrb[51].mxu0  ;;  %v4877_v0 = vld [vmem:[%s6710_s0 + $0x150] sm:$0xff]  }
 0x16e   : > { %v2711_v12 = vmax.f32 %v1656_v3, 0.0  ;;  %v1660_v13 = vadd.f32 %v1659_v11, %v5344_v5  ;;  %3878 = vmatprep.subr.bf16.mxu1 %v3597_v8 }
 0x16f   : > { %v2712_v14 = vmax.f32 %v1658_v10, 0.0  ;;  %4611 = vmatmul.mubr.msk.bf16.gmra.mrb[156].mxu0 %vm1159_vm0, %v4871_v2  ;;  %3879 = vmatpush1.bf16.msra.mxu1 %v3596_v63  ;;  %v3162_v16 = vmin.f32 %v2710_v9, 6.0 }
 0x170   : > { %v2713_v15 = vmax.f32 %v1660_v13, 0.0  ;;  %1931 = vmatprep.mubr.bf16.mxu0 %v6720_v7  ;;  %v3163_v18 = vmin.f32 %v2711_v12, 6.0 }
 0x171   : > { %v3164_v17 = vmin.f32 %v2712_v14, 6.0 }
 0x172   : > { %v3165_v19 = vmin.f32 %v2713_v15, 6.0  ;;  %v1663_v20 = vpop.f32.mrb[52].mxu0 }
 0x173   : > { %v3598_v21 = vpack.c.bf16 %v3164_v17, %v3162_v16  ;;  %v1664_v22 = vadd.f32 %v1663_v20, %v5342_v4  ;;  %v1665_v23 = vpop.f32.mrb[53].mxu0 }
 0x174   : > { %v1666_v25 = vadd.f32 %v1665_v23, %v5344_v5  ;;  %v1667_v26 = vpop.f32.mrb[54].mxu0  ;;  %v3599_v27 = vpack.c.bf16 %v3165_v19, %v3163_v18 }
 0x175   : > { %v2714_v28 = vmax.f32 %v1664_v22, 0.0  ;;  %v1668_v29 = vadd.f32 %v1667_v26, %v5342_v4  ;;  %v1669_v30 = vpop.f32.mrb[55].mxu0  ;;  %v4879_v22 = vld [vmem:[%s6710_s0 + $0x158] sm:$0xff]  }
 0x176   : > { %v2715_v31 = vmax.f32 %v1666_v25, 0.0  ;;  %v1670_v32 = vadd.f32 %v1669_v30, %v5344_v5  ;;  %3880 = vmatprep.subr.bf16.mxu1 %v3599_v27 }
 0x177   : > { %v2716_v33 = vmax.f32 %v1668_v29, 0.0  ;;  %4612 = vmatmul.mubr.msk.bf16.gmra.mrb[160].mxu0 %vm1159_vm0, %v4873_v24  ;;  %3881 = vmatpush1.bf16.msra.mxu1 %v3598_v21  ;;  %v3166_v35 = vmin.f32 %v2714_v28, 6.0 }
 0x178   : > { %v2717_v34 = vmax.f32 %v1670_v32, 0.0  ;;  %1941 = vmatprep.mubr.bf16.mxu0 %v6720_v7  ;;  %v3167_v37 = vmin.f32 %v2715_v31, 6.0  ;;  %v4685_v31 = vcombine.low %v5385_v53, %v5385_v53  ;;  %v4883_v53 = vld [vmem:[%s6710_s0 + $0x160] sm:$0xff]  }
 0x179   : > { %v3168_v36 = vmin.f32 %v2716_v33, 6.0 }
 0x17a   : > { %v3169_v38 = vmin.f32 %v2717_v34, 6.0  ;;  %v1673_v39 = vpop.f32.mrb[56].mxu0 }
 0x17b   : > { %v3600_v40 = vpack.c.bf16 %v3168_v36, %v3166_v35  ;;  %v1674_v41 = vadd.f32 %v1673_v39, %v5342_v4  ;;  %v1675_v42 = vpop.f32.mrb[57].mxu0 }
 0x17c   : > { %v1676_v44 = vadd.f32 %v1675_v42, %v5344_v5  ;;  %v1677_v45 = vpop.f32.mrb[58].mxu0  ;;  %v3601_v46 = vpack.c.bf16 %v3169_v38, %v3167_v37  ;;  %v5532_v42 = vld [vmem:[%s6713_s3 + $0x8] sm:$0xff] }
 0x17d   : > { %v2718_v47 = vmax.f32 %v1674_v41, 0.0  ;;  %v1678_v48 = vadd.f32 %v1677_v45, %v5342_v4  ;;  %v1679_v49 = vpop.f32.mrb[59].mxu0 }
 0x17e   : > { %v2719_v50 = vmax.f32 %v1676_v44, 0.0  ;;  %v1680_v51 = vadd.f32 %v1679_v49, %v5344_v5  ;;  %3882 = vmatprep.subr.bf16.mxu1 %v3601_v46  ;;  %v4688_v46 = vcombine.high %v5532_v42, %v5532_v42 }
 0x17f   : > { %v2720_v52 = vmax.f32 %v1678_v48, 0.0  ;;  %4613 = vmatmul.mubr.msk.bf16.gmra.mrb[164].mxu0 %vm1159_vm0, %v4875_v43  ;;  %3883 = vmatpush1.bf16.msra.mxu1 %v3600_v40  ;;  %v3170_v55 = vmin.f32 %v2718_v47, 6.0 }
 0x180   : > { %v2721_v54 = vmax.f32 %v1680_v51, 0.0  ;;  %1951 = vmatprep.mubr.bf16.mxu0 %v6720_v7  ;;  %v3171_v57 = vmin.f32 %v2719_v50, 6.0 }
 0x181   : > { %v3172_v56 = vmin.f32 %v2720_v52, 6.0 }
 0x182   : > { %v3173_v58 = vmin.f32 %v2721_v54, 6.0  ;;  %v1683_v59 = vpop.f32.mrb[60].mxu0 }
 0x183   : > { %v3602_v61 = vpack.c.bf16 %v3172_v56, %v3170_v55  ;;  %v1684_v62 = vadd.f32 %v1683_v59, %v5342_v4  ;;  %v1685_v63 = vpop.f32.mrb[61].mxu0 }
 0x184   : > { %v1686_v1 = vadd.f32 %v1685_v63, %v5344_v5  ;;  %v1687_v2 = vpop.f32.mrb[62].mxu0  ;;  %v3603_v3 = vpack.c.bf16 %v3173_v58, %v3171_v57 }
 0x185   : > { %v2722_v6 = vmax.f32 %v1684_v62, 0.0  ;;  %v1688_v8 = vadd.f32 %v1687_v2, %v5342_v4  ;;  %v1689_v9 = vpop.f32.mrb[63].mxu0 }
 0x186   : > { %v2723_v10 = vmax.f32 %v1686_v1, 0.0  ;;  %v1690_v11 = vadd.f32 %v1689_v9, %v5344_v5  ;;  %3884 = vmatprep.subr.bf16.mxu1 %v3603_v3 }
 0x187   : > { %v2724_v12 = vmax.f32 %v1688_v8, 0.0  ;;  %4614 = vmatmul.mubr.msk.bf16.gmra.mrb[168].mxu0 %vm1159_vm0, %v4877_v0  ;;  %3885 = vmatpush1.bf16.msra.mxu1 %v3602_v61  ;;  %v3174_v14 = vmin.f32 %v2722_v6, 6.0  ;;  %v4884_v0 = vld [vmem:[%s6710_s0 + $0x168] sm:$0xff]  }
 0x188   : > { %v2725_v13 = vmax.f32 %v1690_v11, 0.0  ;;  %1961 = vmatprep.mubr.bf16.mxu0 %v6720_v7  ;;  %v3175_v16 = vmin.f32 %v2723_v10, 6.0 }
 0x189   : > { %v3176_v15 = vmin.f32 %v2724_v12, 6.0 }
 0x18a   : > { %v3177_v17 = vmin.f32 %v2725_v13, 6.0  ;;  %v1693_v18 = vpop.f32.mrb[64].mxu0 }
 0x18b   : > { %v3604_v19 = vpack.c.bf16 %v3176_v15, %v3174_v14  ;;  %v1694_v20 = vadd.f32 %v1693_v18, %v5342_v4  ;;  %v1695_v21 = vpop.f32.mrb[65].mxu0 }
 0x18c   : > { %v1696_v23 = vadd.f32 %v1695_v21, %v5344_v5  ;;  %v1697_v24 = vpop.f32.mrb[66].mxu0  ;;  %v3605_v25 = vpack.c.bf16 %v3177_v17, %v3175_v16 }
 0x18d   : > { %v2726_v26 = vmax.f32 %v1694_v20, 0.0  ;;  %v1698_v27 = vadd.f32 %v1697_v24, %v5342_v4  ;;  %v1699_v28 = vpop.f32.mrb[67].mxu0 }
 0x18e   : > { %v2727_v29 = vmax.f32 %v1696_v23, 0.0  ;;  %v1700_v30 = vadd.f32 %v1699_v28, %v5344_v5  ;;  %3886 = vmatprep.subr.bf16.mxu1 %v3605_v25 }
 0x18f   : > { %v2728_v32 = vmax.f32 %v1698_v27, 0.0  ;;  %4615 = vmatmul.mubr.msk.bf16.gmra.mrb[172].mxu0 %vm1159_vm0, %v4879_v22  ;;  %3887 = vmatpush1.bf16.msra.mxu1 %v3604_v19  ;;  %v3178_v34 = vmin.f32 %v2726_v26, 6.0  ;;  %v4885_v22 = vld [vmem:[%s6710_s0 + $0x170] sm:$0xff]  }
 0x190   : > { %v2729_v33 = vmax.f32 %v1700_v30, 0.0  ;;  %1971 = vmatprep.mubr.bf16.mxu0 %v6720_v7  ;;  %v3179_v36 = vmin.f32 %v2727_v29, 6.0 }
 0x191   : > { %v3180_v35 = vmin.f32 %v2728_v32, 6.0 }
 0x192   : > { %v3181_v37 = vmin.f32 %v2729_v33, 6.0  ;;  %v1703_v38 = vpop.f32.mrb[68].mxu0  ;;  %3889 = vmatmul.mubr.bf16.vlgmr.msra.gmra.mrb[116].mxu1 %v4685_v31 }
 0x193   : > { %v3606_v39 = vpack.c.bf16 %v3180_v35, %v3178_v34  ;;  %v1704_v40 = vadd.f32 %v1703_v38, %v5342_v4  ;;  %v1705_v41 = vpop.f32.mrb[69].mxu0  ;;  %3929 = vmatprep.mubr.bf16.mxu1 %v4688_v46 }
 0x194   : > { %v1706_v43 = vadd.f32 %v1705_v41, %v5344_v5  ;;  %v1707_v44 = vpop.f32.mrb[70].mxu0  ;;  %v3607_v45 = vpack.c.bf16 %v3181_v37, %v3179_v36  ;;  %v4886_v41 = vld [vmem:[%s6710_s0 + $0x178] sm:$0xff]  }
 0x195   : > { %v2730_v47 = vmax.f32 %v1704_v40, 0.0  ;;  %v1708_v48 = vadd.f32 %v1707_v44, %v5342_v4  ;;  %v1709_v49 = vpop.f32.mrb[71].mxu0 }
 0x196   : > { %v2731_v50 = vmax.f32 %v1706_v43, 0.0  ;;  %v1710_v51 = vadd.f32 %v1709_v49, %v5344_v5  ;;  %3897 = vmatprep.subr.bf16.mxu1 %v3607_v45 }
 0x197   : > { %v2732_v52 = vmax.f32 %v1708_v48, 0.0  ;;  %4616 = vmatmul.mubr.msk.bf16.gmra.mrb[176].mxu0 %vm1159_vm0, %v4883_v53  ;;  %3898 = vmatpush1.bf16.msra.mxu1 %v3606_v39  ;;  %v3182_v55 = vmin.f32 %v2730_v47, 6.0 }
 0x198   : > { %v2733_v54 = vmax.f32 %v1710_v51, 0.0  ;;  %1981 = vmatprep.mubr.bf16.mxu0 %v6720_v7  ;;  %v3183_v57 = vmin.f32 %v2731_v50, 6.0 }
 0x199   : > { %v3184_v56 = vmin.f32 %v2732_v52, 6.0 }
 0x19a   : > { %v3185_v58 = vmin.f32 %v2733_v54, 6.0  ;;  %v1713_v59 = vpop.f32.mrb[72].mxu0 }
 0x19b   : > { %v3608_v61 = vpack.c.bf16 %v3184_v56, %v3182_v55  ;;  %v1714_v62 = vadd.f32 %v1713_v59, %v5342_v4  ;;  %v1715_v63 = vpop.f32.mrb[73].mxu0 }
 0x19c   : > { %v1716_v1 = vadd.f32 %v1715_v63, %v5344_v5  ;;  %v1717_v2 = vpop.f32.mrb[74].mxu0  ;;  %v3609_v3 = vpack.c.bf16 %v3185_v58, %v3183_v57 }
 0x19d   : > { %v2734_v6 = vmax.f32 %v1714_v62, 0.0  ;;  %v1718_v8 = vadd.f32 %v1717_v2, %v5342_v4  ;;  %v1719_v9 = vpop.f32.mrb[75].mxu0  ;;  %v4887_v62 = vld [vmem:[%s6710_s0 + $0x180] sm:$0xff]  }
 0x19e   : > { %v2735_v10 = vmax.f32 %v1716_v1, 0.0  ;;  %v1720_v11 = vadd.f32 %v1719_v9, %v5344_v5  ;;  %3899 = vmatprep.subr.bf16.mxu1 %v3609_v3 }
 0x19f   : > { %v2736_v12 = vmax.f32 %v1718_v8, 0.0  ;;  %4617 = vmatmul.mubr.msk.bf16.gmra.mrb[180].mxu0 %vm1159_vm0, %v4884_v0  ;;  %3900 = vmatpush1.bf16.msra.mxu1 %v3608_v61  ;;  %v3186_v14 = vmin.f32 %v2734_v6, 6.0 }
 0x1a0   : > { %v2737_v13 = vmax.f32 %v1720_v11, 0.0  ;;  %1991 = vmatprep.mubr.bf16.mxu0 %v6720_v7  ;;  %v3187_v16 = vmin.f32 %v2735_v10, 6.0 }
 0x1a1   : > { %v3188_v15 = vmin.f32 %v2736_v12, 6.0 }
 0x1a2   : > { %v3189_v17 = vmin.f32 %v2737_v13, 6.0  ;;  %v1723_v18 = vpop.f32.mrb[76].mxu0 }
 0x1a3   : > { %v3610_v19 = vpack.c.bf16 %v3188_v15, %v3186_v14  ;;  %v1724_v20 = vadd.f32 %v1723_v18, %v5342_v4  ;;  %v1725_v21 = vpop.f32.mrb[77].mxu0 }
 0x1a4   : > { %v1726_v23 = vadd.f32 %v1725_v21, %v5344_v5  ;;  %v1727_v24 = vpop.f32.mrb[78].mxu0  ;;  %v3611_v25 = vpack.c.bf16 %v3189_v17, %v3187_v16 }
 0x1a5   : > { %v2738_v26 = vmax.f32 %v1724_v20, 0.0  ;;  %v1728_v27 = vadd.f32 %v1727_v24, %v5342_v4  ;;  %v1729_v28 = vpop.f32.mrb[79].mxu0  ;;  %v4888_v20 = vld [vmem:[%s6710_s0 + $0x188] sm:$0xff]  }
 0x1a6   : > { %v2739_v29 = vmax.f32 %v1726_v23, 0.0  ;;  %v1730_v30 = vadd.f32 %v1729_v28, %v5344_v5  ;;  %3901 = vmatprep.subr.bf16.mxu1 %v3611_v25 }
 0x1a7   : > { %v2740_v31 = vmax.f32 %v1728_v27, 0.0  ;;  %4618 = vmatmul.mubr.msk.bf16.gmra.mrb[184].mxu0 %vm1159_vm0, %v4885_v22  ;;  %3902 = vmatpush1.bf16.msra.mxu1 %v3610_v19  ;;  %v3190_v33 = vmin.f32 %v2738_v26, 6.0 }
 0x1a8   : > { %v2741_v32 = vmax.f32 %v1730_v30, 0.0  ;;  %2001 = vmatprep.mubr.bf16.mxu0 %v6720_v7  ;;  %v3191_v35 = vmin.f32 %v2739_v29, 6.0 }
 0x1a9   : > { %v3192_v34 = vmin.f32 %v2740_v31, 6.0 }
 0x1aa   : > { %v3193_v36 = vmin.f32 %v2741_v32, 6.0  ;;  %v1733_v37 = vpop.f32.mrb[80].mxu0 }
 0x1ab   : > { %v3612_v38 = vpack.c.bf16 %v3192_v34, %v3190_v33  ;;  %v1734_v39 = vadd.f32 %v1733_v37, %v5342_v4  ;;  %v1735_v40 = vpop.f32.mrb[81].mxu0 }
 0x1ac   : > { %v1736_v53 = vadd.f32 %v1735_v40, %v5344_v5  ;;  %v1737_v43 = vpop.f32.mrb[82].mxu0  ;;  %v3613_v44 = vpack.c.bf16 %v3193_v36, %v3191_v35 }
 0x1ad   : > { %v2742_v45 = vmax.f32 %v1734_v39, 0.0  ;;  %v1738_v46 = vadd.f32 %v1737_v43, %v5342_v4  ;;  %v1739_v47 = vpop.f32.mrb[83].mxu0  ;;  %v4889_v39 = vld [vmem:[%s6710_s0 + $0x190] sm:$0xff]  }
 0x1ae   : > { %v2743_v48 = vmax.f32 %v1736_v53, 0.0  ;;  %v1740_v49 = vadd.f32 %v1739_v47, %v5344_v5  ;;  %3903 = vmatprep.subr.bf16.mxu1 %v3613_v44 }
 0x1af   : > { %v2744_v50 = vmax.f32 %v1738_v46, 0.0  ;;  %4619 = vmatmul.mubr.msk.bf16.gmra.mrb[188].mxu0 %vm1159_vm0, %v4886_v41  ;;  %3904 = vmatpush1.bf16.msra.mxu1 %v3612_v38  ;;  %v3194_v52 = vmin.f32 %v2742_v45, 6.0 }
 0x1b0   : > { %v2745_v51 = vmax.f32 %v1740_v49, 0.0  ;;  %2011 = vmatprep.mubr.bf16.mxu0 %v6720_v7  ;;  %v3195_v55 = vmin.f32 %v2743_v48, 6.0 }
 0x1b1   : > { %v3196_v54 = vmin.f32 %v2744_v50, 6.0 }
 0x1b2   : > { %v3197_v56 = vmin.f32 %v2745_v51, 6.0  ;;  %v1743_v57 = vpop.f32.mrb[84].mxu0 }
 0x1b3   : > { %v3614_v58 = vpack.c.bf16 %v3196_v54, %v3194_v52  ;;  %v1744_v59 = vadd.f32 %v1743_v57, %v5342_v4  ;;  %v1745_v61 = vpop.f32.mrb[85].mxu0 }
 0x1b4   : > { %v3615_v63 = vpack.c.bf16 %v3197_v56, %v3195_v55  ;;  %v1746_v0 = vadd.f32 %v1745_v61, %v5344_v5  ;;  %v1747_v1 = vpop.f32.mrb[86].mxu0 }
 0x1b5   : > { %v2746_v2 = vmax.f32 %v1744_v59, 0.0  ;;  %v1748_v3 = vadd.f32 %v1747_v1, %v5342_v4  ;;  %v1749_v6 = vpop.f32.mrb[87].mxu0  ;;  %v4890_v59 = vld [vmem:[%s6710_s0 + $0x198] sm:$0xff]  }
 0x1b6   : > { %v2747_v8 = vmax.f32 %v1746_v0, 0.0  ;;  %v1750_v9 = vadd.f32 %v1749_v6, %v5344_v5  ;;  %3905 = vmatprep.subr.bf16.mxu1 %v3615_v63 }
 0x1b7   : > { %v2748_v10 = vmax.f32 %v1748_v3, 0.0  ;;  %4620 = vmatmul.mubr.msk.bf16.gmra.mrb[192].mxu0 %vm1159_vm0, %v4887_v62  ;;  %3906 = vmatpush1.bf16.msra.mxu1 %v3614_v58  ;;  %v3198_v12 = vmin.f32 %v2746_v2, 6.0 }
 0x1b8   : > { %v2749_v11 = vmax.f32 %v1750_v9, 0.0  ;;  %2021 = vmatprep.mubr.bf16.mxu0 %v6720_v7  ;;  %v3199_v14 = vmin.f32 %v2747_v8, 6.0 }
 0x1b9   : > { %v3200_v13 = vmin.f32 %v2748_v10, 6.0 }
 0x1ba   : > { %v3201_v15 = vmin.f32 %v2749_v11, 6.0  ;;  %v1753_v16 = vpop.f32.mrb[88].mxu0 }
 0x1bb   : > { %v3616_v17 = vpack.c.bf16 %v3200_v13, %v3198_v12  ;;  %v1754_v18 = vadd.f32 %v1753_v16, %v5342_v4  ;;  %v1755_v19 = vpop.f32.mrb[89].mxu0 }
 0x1bc   : > { %v3617_v21 = vpack.c.bf16 %v3201_v15, %v3199_v14  ;;  %v1756_v22 = vadd.f32 %v1755_v19, %v5344_v5  ;;  %v1757_v23 = vpop.f32.mrb[90].mxu0 }
 0x1bd   : > { %v2750_v24 = vmax.f32 %v1754_v18, 0.0  ;;  %v1758_v25 = vadd.f32 %v1757_v23, %v5342_v4  ;;  %v1759_v26 = vpop.f32.mrb[91].mxu0  ;;  %v4891_v18 = vld [vmem:[%s6710_s0 + $0x1a0] sm:$0xff]  }
 0x1be   : > { %v2751_v27 = vmax.f32 %v1756_v22, 0.0  ;;  %v1760_v28 = vadd.f32 %v1759_v26, %v5344_v5  ;;  %3907 = vmatprep.subr.bf16.mxu1 %v3617_v21 }
 0x1bf   : > { %v2752_v29 = vmax.f32 %v1758_v25, 0.0  ;;  %4621 = vmatmul.mubr.msk.bf16.gmra.mrb[196].mxu0 %vm1159_vm0, %v4888_v20  ;;  %3908 = vmatpush1.bf16.msra.mxu1 %v3616_v17  ;;  %v3202_v31 = vmin.f32 %v2750_v24, 6.0 }
 0x1c0   : > { %v2753_v30 = vmax.f32 %v1760_v28, 0.0  ;;  %2031 = vmatprep.mubr.bf16.mxu0 %v6720_v7  ;;  %v3203_v33 = vmin.f32 %v2751_v27, 6.0 }
 0x1c1   : > { %v3204_v32 = vmin.f32 %v2752_v29, 6.0 }
 0x1c2   : > { %v3205_v34 = vmin.f32 %v2753_v30, 6.0  ;;  %v1763_v35 = vpop.f32.mrb[92].mxu0 }
 0x1c3   : > { %v3618_v36 = vpack.c.bf16 %v3204_v32, %v3202_v31  ;;  %v1764_v37 = vadd.f32 %v1763_v35, %v5342_v4  ;;  %v1765_v38 = vpop.f32.mrb[93].mxu0 }
 0x1c4   : > { %v3619_v40 = vpack.c.bf16 %v3205_v34, %v3203_v33  ;;  %v1766_v41 = vadd.f32 %v1765_v38, %v5344_v5  ;;  %v1767_v53 = vpop.f32.mrb[94].mxu0 }
 0x1c5   : > { %v2754_v43 = vmax.f32 %v1764_v37, 0.0  ;;  %v1768_v44 = vadd.f32 %v1767_v53, %v5342_v4  ;;  %v1769_v45 = vpop.f32.mrb[95].mxu0  ;;  %v4892_v37 = vld [vmem:[%s6710_s0 + $0x1a8] sm:$0xff]  }
 0x1c6   : > { %v2755_v46 = vmax.f32 %v1766_v41, 0.0  ;;  %v1770_v47 = vadd.f32 %v1769_v45, %v5344_v5  ;;  %3909 = vmatprep.subr.bf16.mxu1 %v3619_v40 }
 0x1c7   : > { %v2756_v48 = vmax.f32 %v1768_v44, 0.0  ;;  %4622 = vmatmul.mubr.msk.bf16.gmra.mrb[200].mxu0 %vm1159_vm0, %v4889_v39  ;;  %3910 = vmatpush1.bf16.msra.mxu1 %v3618_v36  ;;  %v3206_v50 = vmin.f32 %v2754_v43, 6.0 }
 0x1c8   : > { %v2757_v49 = vmax.f32 %v1770_v47, 0.0  ;;  %2041 = vmatprep.mubr.bf16.mxu0 %v6720_v7  ;;  %v3207_v52 = vmin.f32 %v2755_v46, 6.0 }
 0x1c9   : > { %v3208_v51 = vmin.f32 %v2756_v48, 6.0 }
 0x1ca   : > { %v3209_v54 = vmin.f32 %v2757_v49, 6.0  ;;  %v1773_v55 = vpop.f32.mrb[96].mxu0 }
 0x1cb   : > { %v3620_v56 = vpack.c.bf16 %v3208_v51, %v3206_v50  ;;  %v1774_v57 = vadd.f32 %v1773_v55, %v5342_v4  ;;  %v1775_v58 = vpop.f32.mrb[97].mxu0 }
 0x1cc   : > { %v3621_v61 = vpack.c.bf16 %v3209_v54, %v3207_v52  ;;  %v1776_v62 = vadd.f32 %v1775_v58, %v5344_v5  ;;  %v1777_v63 = vpop.f32.mrb[98].mxu0 }
 0x1cd   : > { %v2758_v0 = vmax.f32 %v1774_v57, 0.0  ;;  %v1778_v1 = vadd.f32 %v1777_v63, %v5342_v4  ;;  %v1779_v2 = vpop.f32.mrb[99].mxu0  ;;  %v4893_v57 = vld [vmem:[%s6710_s0 + $0x1b0] sm:$0xff]  }
 0x1ce   : > { %v2759_v3 = vmax.f32 %v1776_v62, 0.0  ;;  %v1780_v6 = vadd.f32 %v1779_v2, %v5344_v5  ;;  %3911 = vmatprep.subr.bf16.mxu1 %v3621_v61 }
 0x1cf   : > { %v2760_v8 = vmax.f32 %v1778_v1, 0.0  ;;  %4623 = vmatmul.mubr.msk.bf16.gmra.mrb[204].mxu0 %vm1159_vm0, %v4890_v59  ;;  %3912 = vmatpush1.bf16.msra.mxu1 %v3620_v56  ;;  %v3210_v10 = vmin.f32 %v2758_v0, 6.0 }
 0x1d0   : > { %v2761_v9 = vmax.f32 %v1780_v6, 0.0  ;;  %2051 = vmatprep.mubr.bf16.mxu0 %v6720_v7  ;;  %v3211_v12 = vmin.f32 %v2759_v3, 6.0 }
 0x1d1   : > { %v3212_v11 = vmin.f32 %v2760_v8, 6.0 }
 0x1d2   : > { %v3213_v13 = vmin.f32 %v2761_v9, 6.0  ;;  %v1783_v14 = vpop.f32.mrb[100].mxu0 }
 0x1d3   : > { %v3622_v15 = vpack.c.bf16 %v3212_v11, %v3210_v10  ;;  %v1784_v16 = vadd.f32 %v1783_v14, %v5342_v4  ;;  %v1785_v17 = vpop.f32.mrb[101].mxu0 }
 0x1d4   : > { %v3623_v19 = vpack.c.bf16 %v3213_v13, %v3211_v12  ;;  %v1786_v20 = vadd.f32 %v1785_v17, %v5344_v5  ;;  %v1787_v21 = vpop.f32.mrb[102].mxu0 }
 0x1d5   : > { %v2762_v22 = vmax.f32 %v1784_v16, 0.0  ;;  %v1788_v23 = vadd.f32 %v1787_v21, %v5342_v4  ;;  %v1789_v24 = vpop.f32.mrb[103].mxu0  ;;  %v4894_v16 = vld [vmem:[%s6710_s0 + $0x1b8] sm:$0xff]  }
 0x1d6   : > { %v2763_v25 = vmax.f32 %v1786_v20, 0.0  ;;  %v1790_v26 = vadd.f32 %v1789_v24, %v5344_v5  ;;  %3913 = vmatprep.subr.bf16.mxu1 %v3623_v19 }
 0x1d7   : > { %v2764_v27 = vmax.f32 %v1788_v23, 0.0  ;;  %4624 = vmatmul.mubr.msk.bf16.gmra.mrb[208].mxu0 %vm1159_vm0, %v4891_v18  ;;  %3914 = vmatpush1.bf16.msra.mxu1 %v3622_v15  ;;  %v3214_v29 = vmin.f32 %v2762_v22, 6.0 }
 0x1d8   : > { %v2765_v28 = vmax.f32 %v1790_v26, 0.0  ;;  %2061 = vmatprep.mubr.bf16.mxu0 %v6720_v7  ;;  %v3215_v31 = vmin.f32 %v2763_v25, 6.0 }
 0x1d9   : > { %v3216_v30 = vmin.f32 %v2764_v27, 6.0 }
 0x1da   : > { %v3217_v32 = vmin.f32 %v2765_v28, 6.0  ;;  %v1793_v33 = vpop.f32.mrb[104].mxu0 }
 0x1db   : > { %v3624_v34 = vpack.c.bf16 %v3216_v30, %v3214_v29  ;;  %v1794_v35 = vadd.f32 %v1793_v33, %v5342_v4  ;;  %v1795_v36 = vpop.f32.mrb[105].mxu0 }
 0x1dc   : > { %v3625_v38 = vpack.c.bf16 %v3217_v32, %v3215_v31  ;;  %v1796_v39 = vadd.f32 %v1795_v36, %v5344_v5  ;;  %v1797_v40 = vpop.f32.mrb[106].mxu0 }
 0x1dd   : > { %v2766_v41 = vmax.f32 %v1794_v35, 0.0  ;;  %v1798_v53 = vadd.f32 %v1797_v40, %v5342_v4  ;;  %v1799_v43 = vpop.f32.mrb[107].mxu0  ;;  %v4895_v35 = vld [vmem:[%s6710_s0 + $0x1c0] sm:$0xff]  }
 0x1de   : > { %v2767_v44 = vmax.f32 %v1796_v39, 0.0  ;;  %v1800_v45 = vadd.f32 %v1799_v43, %v5344_v5  ;;  %3915 = vmatprep.subr.bf16.mxu1 %v3625_v38 }
 0x1df   : > { %v2768_v46 = vmax.f32 %v1798_v53, 0.0  ;;  %4625 = vmatmul.mubr.msk.bf16.gmra.mrb[212].mxu0 %vm1159_vm0, %v4892_v37  ;;  %3916 = vmatpush1.bf16.msra.mxu1 %v3624_v34  ;;  %v3218_v48 = vmin.f32 %v2766_v41, 6.0 }
 0x1e0   : > { %v2769_v47 = vmax.f32 %v1800_v45, 0.0  ;;  %2071 = vmatprep.mubr.bf16.mxu0 %v6720_v7  ;;  %v3219_v50 = vmin.f32 %v2767_v44, 6.0 }
 0x1e1   : > { %v3220_v49 = vmin.f32 %v2768_v46, 6.0 }
 0x1e2   : > { %v3221_v51 = vmin.f32 %v2769_v47, 6.0  ;;  %v1803_v52 = vpop.f32.mrb[108].mxu0 }
 0x1e3   : > { %v3626_v54 = vpack.c.bf16 %v3220_v49, %v3218_v48  ;;  %v1804_v55 = vadd.f32 %v1803_v52, %v5342_v4  ;;  %v1805_v56 = vpop.f32.mrb[109].mxu0 }
 0x1e4   : > { %v3627_v58 = vpack.c.bf16 %v3221_v51, %v3219_v50  ;;  %v1806_v59 = vadd.f32 %v1805_v56, %v5344_v5  ;;  %v1807_v61 = vpop.f32.mrb[110].mxu0 }
 0x1e5   : > { %v2770_v62 = vmax.f32 %v1804_v55, 0.0  ;;  %v1808_v63 = vadd.f32 %v1807_v61, %v5342_v4  ;;  %v1809_v0 = vpop.f32.mrb[111].mxu0  ;;  %v4896_v55 = vld [vmem:[%s6710_s0 + $0x1c8] sm:$0xff]  }
 0x1e6   : > { %v2771_v1 = vmax.f32 %v1806_v59, 0.0  ;;  %v1810_v2 = vadd.f32 %v1809_v0, %v5344_v5  ;;  %3917 = vmatprep.subr.bf16.mxu1 %v3627_v58 }
 0x1e7   : > { %v2772_v3 = vmax.f32 %v1808_v63, 0.0  ;;  %4626 = vmatmul.mubr.msk.bf16.gmra.mrb[216].mxu0 %vm1159_vm0, %v4893_v57  ;;  %3918 = vmatpush1.bf16.msra.mxu1 %v3626_v54  ;;  %v3222_v8 = vmin.f32 %v2770_v62, 6.0 }
 0x1e8   : > { %v2773_v6 = vmax.f32 %v1810_v2, 0.0  ;;  %2081 = vmatprep.mubr.bf16.mxu0 %v6720_v7  ;;  %v3223_v10 = vmin.f32 %v2771_v1, 6.0 }
 0x1e9   : > { %v3224_v9 = vmin.f32 %v2772_v3, 6.0 }
 0x1ea   : > { %v3225_v11 = vmin.f32 %v2773_v6, 6.0  ;;  %v1813_v12 = vpop.f32.mrb[112].mxu0 }
 0x1eb   : > { %v3628_v13 = vpack.c.bf16 %v3224_v9, %v3222_v8  ;;  %v1814_v14 = vadd.f32 %v1813_v12, %v5342_v4  ;;  %v1815_v15 = vpop.f32.mrb[113].mxu0 }
 0x1ec   : > { %v3629_v17 = vpack.c.bf16 %v3225_v11, %v3223_v10  ;;  %v1816_v18 = vadd.f32 %v1815_v15, %v5344_v5  ;;  %v1817_v19 = vpop.f32.mrb[114].mxu0 }
 0x1ed   : > { %v2774_v20 = vmax.f32 %v1814_v14, 0.0  ;;  %v1818_v21 = vadd.f32 %v1817_v19, %v5342_v4  ;;  %v1819_v22 = vpop.f32.mrb[115].mxu0  ;;  %v4897_v14 = vld [vmem:[%s6710_s0 + $0x1d0] sm:$0xff]  }
 0x1ee   : > { %v2775_v23 = vmax.f32 %v1816_v18, 0.0  ;;  %v1820_v24 = vadd.f32 %v1819_v22, %v5344_v5  ;;  %3919 = vmatprep.subr.bf16.mxu1 %v3629_v17 }
 0x1ef   : > { %v2776_v25 = vmax.f32 %v1818_v21, 0.0  ;;  %4627 = vmatmul.mubr.msk.bf16.gmra.mrb[220].mxu0 %vm1159_vm0, %v4894_v16  ;;  %3920 = vmatpush1.bf16.msra.mxu1 %v3628_v13  ;;  %v3226_v27 = vmin.f32 %v2774_v20, 6.0 }
 0x1f0   : > { %v2777_v26 = vmax.f32 %v1820_v24, 0.0  ;;  %2091 = vmatprep.mubr.bf16.mxu0 %v6720_v7  ;;  %v3227_v29 = vmin.f32 %v2775_v23, 6.0 }
 0x1f1   : > { %v3228_v28 = vmin.f32 %v2776_v25, 6.0 }
 0x1f2   : > { %v3229_v30 = vmin.f32 %v2777_v26, 6.0  ;;  %v1823_v31 = vpop.f32.mrb[116].mxu0 }
 0x1f3   : > { %v3630_v32 = vpack.c.bf16 %v3228_v28, %v3226_v27  ;;  %v1824_v33 = vadd.f32 %v1823_v31, %v5342_v4  ;;  %v1825_v34 = vpop.f32.mrb[117].mxu0 }
 0x1f4   : > { %v3631_v36 = vpack.c.bf16 %v3229_v30, %v3227_v29  ;;  %v1826_v37 = vadd.f32 %v1825_v34, %v5344_v5  ;;  %v1827_v38 = vpop.f32.mrb[118].mxu0  ;;  %v2373_v34 = vpop.f32.mrb[0].mxu1 }
 0x1f5   : > { %v2778_v39 = vmax.f32 %v1824_v33, 0.0  ;;  %v1828_v40 = vadd.f32 %v1827_v38, %v5342_v4  ;;  %v1829_v41 = vpop.f32.mrb[119].mxu0  ;;  %v4898_v33 = vld [vmem:[%s6710_s0 + $0x1d8] sm:$0xff]   ;;  %v2375_v38 = vpop.f32.mrb[1].mxu1 }
 0x1f6   : > { %v2779_v53 = vmax.f32 %v1826_v37, 0.0  ;;  %v1830_v43 = vadd.f32 %v1829_v41, %v5344_v5  ;;  %3921 = vmatprep.subr.bf16.mxu1 %v3631_v36 }
 0x1f7   : > { %v2780_v44 = vmax.f32 %v1828_v40, 0.0  ;;  %4628 = vmatmul.mubr.msk.bf16.gmra.mrb[224].mxu0 %vm1159_vm0, %v4895_v35  ;;  %3922 = vmatpush1.bf16.msra.mxu1 %v3630_v32  ;;  %v3230_v46 = vmin.f32 %v2778_v39, 6.0 }
 0x1f8   : > { %v2781_v45 = vmax.f32 %v1830_v43, 0.0  ;;  %2101 = vmatprep.mubr.bf16.mxu0 %v6720_v7  ;;  %v3231_v48 = vmin.f32 %v2779_v53, 6.0  ;;  %v2377_v53 = vpop.f32.mrb[2].mxu1 }
 0x1f9   : > { %v3232_v47 = vmin.f32 %v2780_v44, 6.0 }
 0x1fa   : > { %v3233_v49 = vmin.f32 %v2781_v45, 6.0  ;;  %v1833_v50 = vpop.f32.mrb[120].mxu0  ;;  %v4687_v45 = vcombine.low %v5532_v42, %v5532_v42 }
 0x1fb   : > { %v3632_v51 = vpack.c.bf16 %v3232_v47, %v3230_v46  ;;  %v1834_v52 = vadd.f32 %v1833_v50, %v5342_v4  ;;  %v1835_v54 = vpop.f32.mrb[121].mxu0  ;;  %v2379_v46 = vpop.f32.mrb[3].mxu1 }
 0x1fc   : > { %v3633_v56 = vpack.c.bf16 %v3233_v49, %v3231_v48  ;;  %v1836_v57 = vadd.f32 %v1835_v54, %v5344_v5  ;;  %v1837_v58 = vpop.f32.mrb[122].mxu0  ;;  %v2374_v48 = vadd.f32 %v2373_v34, %v5342_v4  ;;  %v2376_v49 = vadd.f32 %v2375_v38, %v5344_v5 }
 0x1fd   : > { %v2782_v59 = vmax.f32 %v1834_v52, 0.0  ;;  %v1838_v61 = vadd.f32 %v1837_v58, %v5342_v4  ;;  %v1839_v62 = vpop.f32.mrb[123].mxu0  ;;  %v2380_v52 = vadd.f32 %v2379_v46, %v5344_v5 }
 0x1fe   : > { %v2783_v63 = vmax.f32 %v1836_v57, 0.0  ;;  %v1840_v0 = vadd.f32 %v1839_v62, %v5344_v5  ;;  %3923 = vmatprep.subr.bf16.mxu1 %v3633_v56  ;;  %v2998_v56 = vmax.f32 %v2374_v48, 0.0  ;;  %v2999_v42 = vmax.f32 %v2376_v49, 0.0 }
 0x1ff   : > { %v2784_v1 = vmax.f32 %v1838_v61, 0.0  ;;  %4629 = vmatmul.mubr.msk.bf16.gmra.mrb[228].mxu0 %vm1159_vm0, %v4896_v55  ;;  %3924 = vmatpush1.bf16.msra.mxu1 %v3632_v51  ;;  %v3234_v3 = vmin.f32 %v2782_v59, 6.0  ;;  %v2378_v51 = vadd.f32 %v2377_v53, %v5342_v4  ;;  %v3001_v62 = vmax.f32 %v2380_v52, 0.0 }
 0x200   : > { %v2785_v2 = vmax.f32 %v1840_v0, 0.0  ;;  %2111 = vmatprep.mubr.bf16.mxu0 %v6720_v7  ;;  %v3235_v8 = vmin.f32 %v2783_v63, 6.0 }
 0x201   : > { %v3236_v6 = vmin.f32 %v2784_v1, 6.0  ;;  %v3000_v61 = vmax.f32 %v2378_v51, 0.0 }
 0x202   : > { %v3237_v9 = vmin.f32 %v2785_v2, 6.0  ;;  %v1843_v10 = vpop.f32.mrb[124].mxu0  ;;  %v4901_v2 = vld [vmem:[%s6710_s0 + $0x1e0] sm:$0xff]  }
 0x203   : > { %v3634_v11 = vpack.c.bf16 %v3236_v6, %v3234_v3  ;;  %v1844_v12 = vadd.f32 %v1843_v10, %v5342_v4  ;;  %v1845_v13 = vpop.f32.mrb[125].mxu0  ;;  %v5686_v3 = vmin.f32 %v2998_v56, 6.0  ;;  %v5688_v6 = vmin.f32 %v2999_v42, 6.0 }
 0x204   : > { %v3635_v15 = vpack.c.bf16 %v3237_v9, %v3235_v8  ;;  %v1846_v16 = vadd.f32 %v1845_v13, %v5344_v5  ;;  %v1847_v17 = vpop.f32.mrb[126].mxu0  ;;  %v2383_v8 = vpop.f32.mrb[4].mxu1  ;;  %v3568_v9 = vld [vmem:[%s6713_s3 + $0x10] sm:$0xff]  ;;  %v5694_v13 = vmin.f32 %v3000_v61, 6.0 }
 0x205   : > { %v2786_v18 = vmax.f32 %v1844_v12, 0.0  ;;  %v1848_v19 = vadd.f32 %v1847_v17, %v5342_v4  ;;  %v1849_v20 = vpop.f32.mrb[127].mxu0 }
 0x206   : > { %v2787_v21 = vmax.f32 %v1846_v16, 0.0  ;;  %v1850_v22 = vadd.f32 %v1849_v20, %v5344_v5  ;;  %3925 = vmatprep.subr.bf16.mxu1 %v3635_v15  ;;  %v2385_v15 = vpop.f32.mrb[5].mxu1  ;;  %v4690_v20 = vcombine.high %v3568_v9, %v3568_v9 }
 0x207   : > { %v2788_v23 = vmax.f32 %v1848_v19, 0.0  ;;  %4630 = vmatmul.mubr.msk.bf16.gmra.mrb[232].mxu0 %vm1159_vm0, %v4897_v14  ;;  %3926 = vmatpush1.bf16.msra.mxu1 %v3634_v11  ;;  %v3238_v25 = vmin.f32 %v2786_v18, 6.0  ;;  %v5696_v14 = vmin.f32 %v3001_v62, 6.0  ;;  %v2387_v19 = vpop.f32.mrb[6].mxu1 }
 0x208   : > { %v2789_v24 = vmax.f32 %v1850_v22, 0.0  ;;  %2121 = vmatprep.mubr.bf16.mxu0 %v6720_v7  ;;  %v3239_v27 = vmin.f32 %v2787_v21, 6.0 }
 0x209   : > { %v3240_v26 = vmin.f32 %v2788_v23, 6.0 }
 0x20a   : > { %v3241_v28 = vmin.f32 %v2789_v24, 6.0  ;;  %v1853_v29 = vpop.f32.mrb[128].mxu0 }
 0x20b   : > { %v3636_v30 = vpack.c.bf16 %v3240_v26, %v3238_v25  ;;  %v1854_v31 = vadd.f32 %v1853_v29, %v5342_v4  ;;  %v1855_v32 = vpop.f32.mrb[129].mxu0  ;;  %v2389_v25 = vpop.f32.mrb[7].mxu1 }
 0x20c   : > { %v3637_v35 = vpack.c.bf16 %v3241_v28, %v3239_v27  ;;  %v1856_v36 = vadd.f32 %v1855_v32, %v5344_v5  ;;  %v1857_v37 = vpop.f32.mrb[130].mxu0  ;;  %v2384_v27 = vadd.f32 %v2383_v8, %v5342_v4  ;;  %v2386_v28 = vadd.f32 %v2385_v15, %v5344_v5 }
 0x20d   : > { %v2790_v39 = vmax.f32 %v1854_v31, 0.0  ;;  %v1858_v40 = vadd.f32 %v1857_v37, %v5342_v4  ;;  %v1859_v41 = vpop.f32.mrb[131].mxu0  ;;  %v2390_v31 = vadd.f32 %v2389_v25, %v5344_v5 }
 0x20e   : > { %v2791_v43 = vmax.f32 %v1856_v36, 0.0  ;;  %v1860_v44 = vadd.f32 %v1859_v41, %v5344_v5  ;;  %3927 = vmatprep.subr.bf16.mxu1 %v3637_v35  ;;  %v3002_v34 = vmax.f32 %v2384_v27, 0.0  ;;  %v3003_v35 = vmax.f32 %v2386_v28, 0.0  ;;  %v4903_v27 = vld [vmem:[%s6710_s0 + $0x1f0] sm:$0xff]  }
 0x20f   : > { %v2792_v47 = vmax.f32 %v1858_v40, 0.0  ;;  %4631 = vmatmul.mubr.msk.bf16.gmra.mrb[236].mxu0 %vm1159_vm0, %v4898_v33  ;;  %3928 = vmatpush1.bf16.msra.mxu1 %v3636_v30  ;;  %v3242_v54 = vmin.f32 %v2790_v39, 6.0  ;;  %v2388_v30 = vadd.f32 %v2387_v19, %v5342_v4  ;;  %v3005_v40 = vmax.f32 %v2390_v31, 0.0 }
 0x210   : > { %v2793_v50 = vmax.f32 %v1860_v44, 0.0  ;;  %2131 = vmatprep.mubr.bf16.mxu0 %v6720_v7  ;;  %v3243_v57 = vmin.f32 %v2791_v43, 6.0  ;;  %v4902_v44 = vld [vmem:[%s6710_s0 + $0x1e8] sm:$0xff]   ;;  %v5716_v46 = vmin.f32 %v3003_v35, 6.0 }
 0x211   : > { %v3244_v55 = vmin.f32 %v2792_v47, 6.0  ;;  %v3004_v39 = vmax.f32 %v2388_v30, 0.0  ;;  %v2393_v47 = vpop.f32.mrb[8].mxu1  ;;  %v5721_v52 = vmin.f32 %v3005_v40, 6.0 }
 0x212   : > { %v3245_v58 = vmin.f32 %v2793_v50, 6.0  ;;  %v1863_v59 = vpop.f32.mrb[132].mxu0  ;;  %3930 = vmatmul.mubr.bf16.vlgmr.msra.gmra.mrb[116].mxu1 %v4687_v45  ;;  %v5714_v45 = vmin.f32 %v3002_v34, 6.0 }
 0x213   : > { %v3638_v63 = vpack.c.bf16 %v3244_v55, %v3242_v54  ;;  %v1864_v0 = vadd.f32 %v1863_v59, %v5342_v4  ;;  %v1865_v1 = vpop.f32.mrb[133].mxu0  ;;  %3970 = vmatprep.mubr.bf16.mxu1 %v4690_v20  ;;  %v5719_v51 = vmin.f32 %v3004_v39, 6.0  ;;  %v2395_v54 = vpop.f32.mrb[9].mxu1 }
 0x214   : > { %v3639_v10 = vpack.c.bf16 %v3245_v58, %v3243_v57  ;;  %v1866_v11 = vadd.f32 %v1865_v1, %v5344_v5  ;;  %v1867_v12 = vpop.f32.mrb[134].mxu0  ;;  %v2397_v57 = vpop.f32.mrb[10].mxu1  ;;  %v2394_v1 = vadd.f32 %v2393_v47, %v5342_v4 }
 0x215   : > { %v2794_v16 = vmax.f32 %v1864_v0, 0.0  ;;  %v1868_v17 = vadd.f32 %v1867_v12, %v5342_v4  ;;  %v1869_v18 = vpop.f32.mrb[135].mxu0  ;;  %v2398_v9 = vadd.f32 %v2397_v57, %v5342_v4 }
 0x216   : > { %v2795_v21 = vmax.f32 %v1866_v11, 0.0  ;;  %v1870_v22 = vadd.f32 %v1869_v18, %v5344_v5  ;;  %3938 = vmatprep.subr.bf16.mxu1 %v3639_v10  ;;  %v3006_v15 = vmax.f32 %v2394_v1, 0.0 }
 0x217   : > { %v2796_v26 = vmax.f32 %v1868_v17, 0.0  ;;  %4632 = vmatmul.mubr.msk.bf16.gmra.mrb[240].mxu0 %vm1159_vm0, %v4901_v2  ;;  %3939 = vmatpush1.bf16.msra.mxu1 %v3638_v63  ;;  %v3246_v32 = vmin.f32 %v2794_v16, 6.0  ;;  %v2399_v63 = vpop.f32.mrb[11].mxu1  ;;  %v2396_v2 = vadd.f32 %v2395_v54, %v5344_v5  ;;  %v3008_v20 = vmax.f32 %v2398_v9, 0.0 }
 0x218   : > { %v2797_v29 = vmax.f32 %v1870_v22, 0.0  ;;  %2141 = vmatprep.mubr.bf16.mxu0 %v6720_v7  ;;  %v3247_v36 = vmin.f32 %v2795_v21, 6.0  ;;  %v2400_v10 = vadd.f32 %v2399_v63, %v5344_v5  ;;  %v5739_v28 = vmin.f32 %v3006_v15, 6.0  ;;  %v2403_v30 = vpop.f32.mrb[12].mxu1 }
 0x219   : > { %v3248_v33 = vmin.f32 %v2796_v26, 6.0  ;;  %v3007_v16 = vmax.f32 %v2396_v2, 0.0  ;;  %v5744_v34 = vmin.f32 %v3008_v20, 6.0 }
 0x21a   : > { %v3249_v37 = vmin.f32 %v2797_v29, 6.0  ;;  %v1873_v38 = vpop.f32.mrb[136].mxu0  ;;  %v3009_v21 = vmax.f32 %v2400_v10, 0.0 }
 0x21b   : > { %v3640_v41 = vpack.c.bf16 %v3248_v33, %v3246_v32  ;;  %v1874_v53 = vadd.f32 %v1873_v38, %v5342_v4  ;;  %v1875_v43 = vpop.f32.mrb[137].mxu0  ;;  %v5741_v29 = vmin.f32 %v3007_v16, 6.0 }
 0x21c   : > { %v3641_v48 = vpack.c.bf16 %v3249_v37, %v3247_v36  ;;  %v1876_v49 = vadd.f32 %v1875_v43, %v5344_v5  ;;  %v1877_v50 = vpop.f32.mrb[138].mxu0  ;;  %v5746_v35 = vmin.f32 %v3009_v21, 6.0  ;;  %v2405_v36 = vpop.f32.mrb[13].mxu1 }
 0x21d   : > { %v2798_v55 = vmax.f32 %v1874_v53, 0.0  ;;  %v1878_v56 = vadd.f32 %v1877_v50, %v5342_v4  ;;  %v1879_v42 = vpop.f32.mrb[139].mxu0  ;;  %v2407_v40 = vpop.f32.mrb[14].mxu1  ;;  %v2406_v50 = vadd.f32 %v2405_v36, %v5344_v5 }
 0x21e   : > { %v2799_v58 = vmax.f32 %v1876_v49, 0.0  ;;  %v1880_v59 = vadd.f32 %v1879_v42, %v5344_v5  ;;  %3940 = vmatprep.subr.bf16.mxu1 %v3641_v48  ;;  %v2409_v47 = vpop.f32.mrb[15].mxu1  ;;  %v2404_v49 = vadd.f32 %v2403_v30, %v5342_v4 }
 0x21f   : > { %v2800_v0 = vmax.f32 %v1878_v56, 0.0  ;;  %4633 = vmatmul.mubr.msk.bf16.gmra.mrb[244].mxu0 %vm1159_vm0, %v4902_v44  ;;  %3941 = vmatpush1.bf16.msra.mxu1 %v3640_v41  ;;  %v3250_v11 = vmin.f32 %v2798_v55, 6.0  ;;  %v2408_v55 = vadd.f32 %v2407_v40, %v5342_v4  ;;  %v2410_v56 = vadd.f32 %v2409_v47, %v5344_v5 }
 0x220   : > { %v2801_v8 = vmax.f32 %v1880_v59, 0.0  ;;  %2151 = vmatprep.mubr.bf16.mxu0 %v6720_v7  ;;  %v3251_v17 = vmin.f32 %v2799_v58, 6.0  ;;  %v3010_v58 = vmax.f32 %v2404_v49, 0.0  ;;  %v3011_v59 = vmax.f32 %v2406_v50, 0.0 }
 0x221   : > { %v3252_v12 = vmin.f32 %v2800_v0, 6.0  ;;  %v3012_v2 = vmax.f32 %v2408_v55, 0.0 }
 0x222   : > { %v3253_v18 = vmin.f32 %v2801_v8, 6.0  ;;  %v1883_v19 = vpop.f32.mrb[140].mxu0  ;;  %v3013_v8 = vmax.f32 %v2410_v56, 0.0  ;;  %v5764_v15 = vmin.f32 %v3010_v58, 6.0  ;;  %v5766_v16 = vmin.f32 %v3011_v59, 6.0 }
 0x223   : > { %v3642_v22 = vpack.c.bf16 %v3252_v12, %v3250_v11  ;;  %v1884_v25 = vadd.f32 %v1883_v19, %v5342_v4  ;;  %v1885_v26 = vpop.f32.mrb[141].mxu0  ;;  %v4904_v12 = vld [vmem:[%s6710_s0 + $0x1f8] sm:$0xff]   ;;  %v5769_v21 = vmin.f32 %v3012_v2, 6.0  ;;  %v4905_v2 = vld [vmem:[%s6710_s0 + $0x200] sm:$0xff]  }
 0x224   : > { %v3643_v31 = vpack.c.bf16 %v3253_v18, %v3251_v17  ;;  %v1886_v32 = vadd.f32 %v1885_v26, %v5344_v5  ;;  %v1887_v33 = vpop.f32.mrb[142].mxu0  ;;  %v2413_v17 = vpop.f32.mrb[16].mxu1 }
 0x225   : > { %v2802_v37 = vmax.f32 %v1884_v25, 0.0  ;;  %v1888_v38 = vadd.f32 %v1887_v33, %v5342_v4  ;;  %v1889_v39 = vpop.f32.mrb[143].mxu0  ;;  %v2415_v25 = vpop.f32.mrb[17].mxu1  ;;  %v2414_v40 = vadd.f32 %v2413_v17, %v5342_v4 }
 0x226   : > { %v2803_v41 = vmax.f32 %v1886_v32, 0.0  ;;  %v1890_v53 = vadd.f32 %v1889_v39, %v5344_v5  ;;  %3942 = vmatprep.subr.bf16.mxu1 %v3643_v31  ;;  %v2417_v31 = vpop.f32.mrb[18].mxu1 }
 0x227   : > { %v2804_v48 = vmax.f32 %v1888_v38, 0.0  ;;  %4634 = vmatmul.mubr.msk.bf16.gmra.mrb[248].mxu0 %vm1159_vm0, %v4903_v27  ;;  %3943 = vmatpush1.bf16.msra.mxu1 %v3642_v22  ;;  %v3254_v42 = vmin.f32 %v2802_v37, 6.0  ;;  %v5771_v22 = vmin.f32 %v3013_v8, 6.0  ;;  %v2419_v38 = vpop.f32.mrb[19].mxu1  ;;  %v2418_v47 = vadd.f32 %v2417_v31, %v5342_v4 }
 0x228   : > { %v2805_v54 = vmax.f32 %v1890_v53, 0.0  ;;  %2161 = vmatprep.mubr.bf16.mxu0 %v6720_v7  ;;  %v3255_v63 = vmin.f32 %v2803_v41, 6.0  ;;  %v2416_v41 = vadd.f32 %v2415_v25, %v5344_v5 }
 0x229   : > { %v3256_v57 = vmin.f32 %v2804_v48, 6.0  ;;  %v2420_v48 = vadd.f32 %v2419_v38, %v5344_v5  ;;  %v3016_v58 = vmax.f32 %v2418_v47, 0.0 }
 0x22a   : > { %v3257_v0 = vmin.f32 %v2805_v54, 6.0  ;;  %v1893_v1 = vpop.f32.mrb[144].mxu0  ;;  %v3014_v54 = vmax.f32 %v2414_v40, 0.0  ;;  %v3015_v55 = vmax.f32 %v2416_v41, 0.0 }
 0x22b   : > { %v3644_v9 = vpack.c.bf16 %v3256_v57, %v3254_v42  ;;  %v1894_v10 = vadd.f32 %v1893_v1, %v5342_v4  ;;  %v1895_v11 = vpop.f32.mrb[145].mxu0  ;;  %v3017_v59 = vmax.f32 %v2420_v48, 0.0 }
 0x22c   : > { %v3645_v18 = vpack.c.bf16 %v3257_v0, %v3255_v63  ;;  %v1896_v19 = vadd.f32 %v1895_v11, %v5344_v5  ;;  %v1897_v20 = vpop.f32.mrb[146].mxu0  ;;  %v5789_v8 = vmin.f32 %v3014_v54, 6.0 }
 0x22d   : > { %v2806_v26 = vmax.f32 %v1894_v10, 0.0  ;;  %v1898_v27 = vadd.f32 %v1897_v20, %v5342_v4  ;;  %v1899_v30 = vpop.f32.mrb[147].mxu0  ;;  %v2423_v10 = vpop.f32.mrb[20].mxu1 }
 0x22e   : > { %v2807_v32 = vmax.f32 %v1896_v19, 0.0  ;;  %v1900_v33 = vadd.f32 %v1899_v30, %v5344_v5  ;;  %3944 = vmatprep.subr.bf16.mxu1 %v3645_v18  ;;  %v5794_v18 = vmin.f32 %v3016_v58, 6.0  ;;  %v5796_v19 = vmin.f32 %v3017_v59, 6.0  ;;  %v2425_v20 = vpop.f32.mrb[21].mxu1 }
 0x22f   : > { %v2808_v39 = vmax.f32 %v1898_v27, 0.0  ;;  %4635 = vmatmul.mubr.msk.bf16.gmra.mrb[252].mxu0 %vm1159_vm0, %v4904_v12  ;;  %3945 = vmatpush1.bf16.msra.mxu1 %v3644_v9  ;;  %v3258_v49 = vmin.f32 %v2806_v26, 6.0  ;;  %v5791_v9 = vmin.f32 %v3015_v55, 6.0  ;;  %v2427_v30 = vpop.f32.mrb[22].mxu1  ;;  %v2424_v41 = vadd.f32 %v2423_v10, %v5342_v4  ;;  %v4906_v10 = vld [vmem:[%s6710_s0 + $0x208] sm:$0xff]  }
 0x230   : > { %v2809_v53 = vmax.f32 %v1900_v33, 0.0  ;;  %2171 = vmatprep.mubr.bf16.mxu0 %v6720_v7  ;;  %v3259_v56 = vmin.f32 %v2807_v32, 6.0  ;;  %v2428_v48 = vadd.f32 %v2427_v30, %v5342_v4 }
 0x231   : > { %v3260_v50 = vmin.f32 %v2808_v39, 6.0  ;;  %v2429_v39 = vpop.f32.mrb[23].mxu1  ;;  %v3018_v55 = vmax.f32 %v2424_v41, 0.0 }
 0x232   : > { %v3261_v42 = vmin.f32 %v2809_v53, 6.0  ;;  %v1903_v57 = vpop.f32.mrb[148].mxu0  ;;  %v2426_v53 = vadd.f32 %v2425_v20, %v5344_v5  ;;  %v3020_v59 = vmax.f32 %v2428_v48, 0.0 }
 0x233   : > { %v3646_v63 = vpack.c.bf16 %v3260_v50, %v3258_v49  ;;  %v1904_v0 = vadd.f32 %v1903_v57, %v5342_v4  ;;  %v1905_v1 = vpop.f32.mrb[149].mxu0  ;;  %v2430_v49 = vadd.f32 %v2429_v39, %v5344_v5 }
 0x234   : > { %v3647_v11 = vpack.c.bf16 %v3261_v42, %v3259_v56  ;;  %v1906_v12 = vadd.f32 %v1905_v1, %v5344_v5  ;;  %v1907_v17 = vpop.f32.mrb[150].mxu0  ;;  %v3019_v56 = vmax.f32 %v2426_v53, 0.0 }
 0x235   : > { %v2810_v25 = vmax.f32 %v1904_v0, 0.0  ;;  %v1908_v26 = vadd.f32 %v1907_v17, %v5342_v4  ;;  %v1909_v27 = vpop.f32.mrb[151].mxu0  ;;  %v2433_v17 = vpop.f32.mrb[24].mxu1 }
 0x236   : > { %v2811_v31 = vmax.f32 %v1906_v12, 0.0  ;;  %v1910_v32 = vadd.f32 %v1909_v27, %v5344_v5  ;;  %3946 = vmatprep.subr.bf16.mxu1 %v3647_v11  ;;  %v5814_v11 = vmin.f32 %v3018_v55, 6.0  ;;  %v5816_v12 = vmin.f32 %v3019_v56, 6.0 }
 0x237   : > { %v2812_v40 = vmax.f32 %v1908_v26, 0.0  ;;  %4636 = vmatmul.mubr.msk.bf16.gmra.mrb[0].mxu0 %vm1159_vm0, %v4905_v2  ;;  %3947 = vmatpush1.bf16.msra.mxu1 %v3646_v63  ;;  %v3262_v50 = vmin.f32 %v2810_v25, 6.0  ;;  %v3021_v63 = vmax.f32 %v2430_v49, 0.0  ;;  %v5819_v27 = vmin.f32 %v3020_v59, 6.0 }
 0x238   : > { %v2813_v47 = vmax.f32 %v1910_v32, 0.0  ;;  %2181 = vmatprep.mubr.bf16.mxu0 %v6720_v7  ;;  %v3263_v42 = vmin.f32 %v2811_v31, 6.0  ;;  %v2435_v31 = vpop.f32.mrb[25].mxu1  ;;  %v2434_v55 = vadd.f32 %v2433_v17, %v5342_v4 }
 0x239   : > { %v3264_v54 = vmin.f32 %v2812_v40, 6.0  ;;  %v5821_v30 = vmin.f32 %v3021_v63, 6.0  ;;  %v2437_v41 = vpop.f32.mrb[26].mxu1  ;;  %v2436_v56 = vadd.f32 %v2435_v31, %v5344_v5 }
 0x23a   : > { %v3265_v57 = vmin.f32 %v2813_v47, 6.0  ;;  %v1913_v58 = vpop.f32.mrb[152].mxu0 }
 0x23b   : > { %v3648_v0 = vpack.c.bf16 %v3264_v54, %v3262_v50  ;;  %v1914_v1 = vadd.f32 %v1913_v58, %v5342_v4  ;;  %v1915_v2 = vpop.f32.mrb[153].mxu0  ;;  %v2439_v50 = vpop.f32.mrb[27].mxu1 }
 0x23c   : > { %v3649_v20 = vpack.c.bf16 %v3265_v57, %v3263_v42  ;;  %v1916_v25 = vadd.f32 %v1915_v2, %v5344_v5  ;;  %v1917_v26 = vpop.f32.mrb[154].mxu0  ;;  %v2438_v57 = vadd.f32 %v2437_v41, %v5342_v4  ;;  %v2440_v58 = vadd.f32 %v2439_v50, %v5344_v5 }
 0x23d   : > { %v2814_v32 = vmax.f32 %v1914_v1, 0.0  ;;  %v1918_v39 = vadd.f32 %v1917_v26, %v5342_v4  ;;  %v1919_v40 = vpop.f32.mrb[155].mxu0  ;;  %v3022_v1 = vmax.f32 %v2434_v55, 0.0  ;;  %v3023_v2 = vmax.f32 %v2436_v56, 0.0 }
 0x23e   : > { %v2815_v53 = vmax.f32 %v1916_v25, 0.0  ;;  %v1920_v47 = vadd.f32 %v1919_v40, %v5344_v5  ;;  %3948 = vmatprep.subr.bf16.mxu1 %v3649_v20  ;;  %v4907_v40 = vld [vmem:[%s6710_s0 + $0x210] sm:$0xff]  }
 0x23f   : > { %v2816_v54 = vmax.f32 %v1918_v39, 0.0  ;;  %4637 = vmatmul.mubr.msk.bf16.gmra.mrb[4].mxu0 %vm1159_vm0, %v4906_v10  ;;  %3949 = vmatpush1.bf16.msra.mxu1 %v3648_v0  ;;  %v3266_v59 = vmin.f32 %v2814_v32, 6.0  ;;  %v3024_v10 = vmax.f32 %v2438_v57, 0.0  ;;  %v3025_v0 = vmax.f32 %v2440_v58, 0.0  ;;  %v2443_v32 = vpop.f32.mrb[28].mxu1 }
 0x240   : > { %v2817_v42 = vmax.f32 %v1920_v47, 0.0  ;;  %2191 = vmatprep.mubr.bf16.mxu0 %v6720_v7  ;;  %v3267_v20 = vmin.f32 %v2815_v53, 6.0  ;;  %v5839_v41 = vmin.f32 %v3022_v1, 6.0  ;;  %v5841_v47 = vmin.f32 %v3023_v2, 6.0 }
 0x241   : > { %v3268_v63 = vmin.f32 %v2816_v54, 6.0  ;;  %v5844_v55 = vmin.f32 %v3024_v10, 6.0  ;;  %v5846_v56 = vmin.f32 %v3025_v0, 6.0  ;;  %v2444_v0 = vadd.f32 %v2443_v32, %v5342_v4 }
 0x242   : > { %v3269_v25 = vmin.f32 %v2817_v42, 6.0  ;;  %v1923_v26 = vpop.f32.mrb[156].mxu0  ;;  %v2445_v42 = vpop.f32.mrb[29].mxu1 }
 0x243   : > { %v3650_v39 = vpack.c.bf16 %v3268_v63, %v3266_v59  ;;  %v1924_v17 = vadd.f32 %v1923_v26, %v5342_v4  ;;  %v1925_v31 = vpop.f32.mrb[157].mxu0  ;;  %v2447_v63 = vpop.f32.mrb[30].mxu1  ;;  %v3026_v60 = vmax.f32 %v2444_v0, 0.0 }
 0x244   : > { %v3651_v50 = vpack.c.bf16 %v3269_v25, %v3267_v20  ;;  %v1926_v53 = vadd.f32 %v1925_v31, %v5344_v5  ;;  %v1927_v54 = vpop.f32.mrb[158].mxu0  ;;  %v2449_v25 = vpop.f32.mrb[31].mxu1 }
 0x245   : > { %v2818_v57 = vmax.f32 %v1924_v17, 0.0  ;;  %v1928_v58 = vadd.f32 %v1927_v54, %v5342_v4  ;;  %v1929_v59 = vpop.f32.mrb[159].mxu0  ;;  %v2446_v17 = vadd.f32 %v2445_v42, %v5344_v5 }
 0x246   : > { %v2819_v26 = vmax.f32 %v1926_v53, 0.0  ;;  %v1930_v1 = vadd.f32 %v1929_v59, %v5344_v5  ;;  %3950 = vmatprep.subr.bf16.mxu1 %v3651_v50  ;;  %v2448_v50 = vadd.f32 %v2447_v63, %v5342_v4  ;;  %v2450_v53 = vadd.f32 %v2449_v25, %v5344_v5 }
 0x247   : > { %v2820_v10 = vmax.f32 %v1928_v58, 0.0  ;;  %4638 = vmatmul.mubr.msk.bf16.gmra.mrb[8].mxu0 %vm1159_vm0, %v4907_v40  ;;  %3951 = vmatpush1.bf16.msra.mxu1 %v3650_v39  ;;  %v3270_v54 = vmin.f32 %v2818_v57, 6.0  ;;  %v3027_v2 = vmax.f32 %v2446_v17, 0.0  ;;  %v5864_v63 = vmin.f32 %v3026_v60, 6.0  ;;  %v2453_v57 = vpop.f32.mrb[32].mxu1 }
 0x248   : > { %v2821_v31 = vmax.f32 %v1930_v1, 0.0  ;;  %2201 = vmatprep.mubr.bf16.mxu0 %v6720_v7  ;;  %v3271_v20 = vmin.f32 %v2819_v26, 6.0  ;;  %v3028_v40 = vmax.f32 %v2448_v50, 0.0  ;;  %v3029_v39 = vmax.f32 %v2450_v53, 0.0  ;;  %v4908_v1 = vld [vmem:[%s6710_s0 + $0x218] sm:$0xff]   ;;  %v2455_v50 = vpop.f32.mrb[33].mxu1 }
 0x249   : > { %v3272_v59 = vmin.f32 %v2820_v10, 6.0  ;;  %v5866_v25 = vmin.f32 %v3027_v2, 6.0 }
 0x24a   : > { %v3273_v58 = vmin.f32 %v2821_v31, 6.0  ;;  %v1933_v48 = vpop.f32.mrb[160].mxu0  ;;  %v5869_v17 = vmin.f32 %v3028_v40, 6.0  ;;  %v5871_v31 = vmin.f32 %v3029_v39, 6.0  ;;  %v2454_v39 = vadd.f32 %v2453_v57, %v5342_v4 }
 0x24b   : > { %v3652_v49 = vpack.c.bf16 %v3272_v59, %v3270_v54  ;;  %v1934_v32 = vadd.f32 %v1933_v48, %v5342_v4  ;;  %v1935_v42 = vpop.f32.mrb[161].mxu0  ;;  %v2457_v59 = vpop.f32.mrb[34].mxu1 }
 0x24c   : > { %v3653_v10 = vpack.c.bf16 %v3273_v58, %v3271_v20  ;;  %v1936_v26 = vadd.f32 %v1935_v42, %v5344_v5  ;;  %v1937_v0 = vpop.f32.mrb[162].mxu0  ;;  %v2459_v58 = vpop.f32.mrb[35].mxu1  ;;  %v3030_v2 = vmax.f32 %v2454_v39, 0.0 }
 0x24d   : > { %v2822_v48 = vmax.f32 %v1934_v32, 0.0  ;;  %v1938_v53 = vadd.f32 %v1937_v0, %v5342_v4  ;;  %v1939_v54 = vpop.f32.mrb[163].mxu0  ;;  %v2456_v32 = vadd.f32 %v2455_v50, %v5344_v5 }
 0x24e   : > { %v2823_v33 = vmax.f32 %v1936_v26, 0.0  ;;  %v1940_v60 = vadd.f32 %v1939_v54, %v5344_v5  ;;  %3952 = vmatprep.subr.bf16.mxu1 %v3653_v10  ;;  %v2458_v10 = vadd.f32 %v2457_v59, %v5342_v4  ;;  %v2460_v26 = vadd.f32 %v2459_v58, %v5344_v5 }
 0x24f   : > { %v2824_v40 = vmax.f32 %v1938_v53, 0.0  ;;  %4639 = vmatmul.mubr.msk.bf16.gmra.mrb[12].mxu0 %vm1159_vm0, %v4908_v1  ;;  %3953 = vmatpush1.bf16.msra.mxu1 %v3652_v49  ;;  %v3274_v0 = vmin.f32 %v2822_v48, 6.0  ;;  %v3031_v20 = vmax.f32 %v2456_v32, 0.0  ;;  %v5889_v59 = vmin.f32 %v3030_v2, 6.0  ;;  %v2463_v48 = vpop.f32.mrb[36].mxu1 }
 0x250   : > { %v2825_v42 = vmax.f32 %v1940_v60, 0.0  ;;  %2211 = vmatprep.mubr.bf16.mxu0 %v6720_v7  ;;  %v3275_v38 = vmin.f32 %v2823_v33, 6.0  ;;  %v3032_v1 = vmax.f32 %v2458_v10, 0.0  ;;  %v3033_v49 = vmax.f32 %v2460_v26, 0.0  ;;  %v4909_v60 = vld [vmem:[%s6710_s0 + $0x220] sm:$0xff]   ;;  %v2465_v10 = vpop.f32.mrb[37].mxu1 }
 0x251   : > { %v3276_v54 = vmin.f32 %v2824_v40, 6.0  ;;  %v5891_v58 = vmin.f32 %v3031_v20, 6.0 }
 0x252   : > { %v3277_v53 = vmin.f32 %v2825_v42, 6.0  ;;  %v1943_v36 = vpop.f32.mrb[164].mxu0  ;;  %v5894_v32 = vmin.f32 %v3032_v1, 6.0  ;;  %v5896_v42 = vmin.f32 %v3033_v49, 6.0  ;;  %v2464_v49 = vadd.f32 %v2463_v48, %v5342_v4 }
 0x253   : > { %v3654_v37 = vpack.c.bf16 %v3276_v54, %v3274_v0  ;;  %v1944_v57 = vadd.f32 %v1943_v36, %v5342_v4  ;;  %v1945_v50 = vpop.f32.mrb[165].mxu0  ;;  %v2467_v54 = vpop.f32.mrb[38].mxu1 }
 0x254   : > { %v3655_v40 = vpack.c.bf16 %v3277_v53, %v3275_v38  ;;  %v1946_v33 = vadd.f32 %v1945_v50, %v5344_v5  ;;  %v1947_v39 = vpop.f32.mrb[166].mxu0  ;;  %v2469_v53 = vpop.f32.mrb[39].mxu1  ;;  %v3034_v38 = vmax.f32 %v2464_v49, 0.0 }
 0x255   : > { %v2826_v36 = vmax.f32 %v1944_v57, 0.0  ;;  %v1948_v26 = vadd.f32 %v1947_v39, %v5342_v4  ;;  %v1949_v0 = vpop.f32.mrb[167].mxu0  ;;  %v2466_v57 = vadd.f32 %v2465_v10, %v5344_v5 }
 0x256   : > { %v2827_v43 = vmax.f32 %v1946_v33, 0.0  ;;  %v1950_v2 = vadd.f32 %v1949_v0, %v5344_v5  ;;  %3954 = vmatprep.subr.bf16.mxu1 %v3655_v40  ;;  %v2468_v40 = vadd.f32 %v2467_v54, %v5342_v4  ;;  %v2470_v33 = vadd.f32 %v2469_v53, %v5344_v5 }
 0x257   : > { %v2828_v1 = vmax.f32 %v1948_v26, 0.0  ;;  %4640 = vmatmul.mubr.msk.bf16.gmra.mrb[16].mxu0 %vm1159_vm0, %v4909_v60  ;;  %3955 = vmatpush1.bf16.msra.mxu1 %v3654_v37  ;;  %v3278_v39 = vmin.f32 %v2826_v36, 6.0  ;;  %v3035_v20 = vmax.f32 %v2466_v57, 0.0  ;;  %v5914_v54 = vmin.f32 %v3034_v38, 6.0  ;;  %v2473_v36 = vpop.f32.mrb[40].mxu1 }
 0x258   : > { %v2829_v50 = vmax.f32 %v1950_v2, 0.0  ;;  %2221 = vmatprep.mubr.bf16.mxu0 %v6720_v7  ;;  %v3279_v44 = vmin.f32 %v2827_v43, 6.0  ;;  %v3036_v60 = vmax.f32 %v2468_v40, 0.0  ;;  %v3037_v37 = vmax.f32 %v2470_v33, 0.0  ;;  %v4910_v2 = vld [vmem:[%s6710_s0 + $0x228] sm:$0xff]   ;;  %v2475_v40 = vpop.f32.mrb[41].mxu1 }
 0x259   : > { %v3280_v0 = vmin.f32 %v2828_v1, 6.0  ;;  %6798 = vst [vmem:[#allocation4_spill] sm:$0xff] %v5914_v54  ;;  %v5916_v53 = vmin.f32 %v3035_v20, 6.0 }
 0x25a   : > { %v3281_v26 = vmin.f32 %v2829_v50, 6.0  ;;  %v1953_v61 = vpop.f32.mrb[168].mxu0  ;;  %v5919_v57 = vmin.f32 %v3036_v60, 6.0  ;;  %v5921_v50 = vmin.f32 %v3037_v37, 6.0  ;;  %v2474_v37 = vadd.f32 %v2473_v36, %v5342_v4 }
 0x25b   : > { %v3656_v62 = vpack.c.bf16 %v3280_v0, %v3278_v39  ;;  %v1954_v48 = vadd.f32 %v1953_v61, %v5342_v4  ;;  %v1955_v10 = vpop.f32.mrb[169].mxu0  ;;  %6799 = vst [vmem:[#allocation5_spill] sm:$0xff] %v5916_v53  ;;  %v2477_v0 = vpop.f32.mrb[42].mxu1 }
 0x25c   : > { %v3657_v1 = vpack.c.bf16 %v3281_v26, %v3279_v44  ;;  %v1956_v43 = vadd.f32 %v1955_v10, %v5344_v5  ;;  %v1957_v49 = vpop.f32.mrb[170].mxu0  ;;  %6800 = vst [vmem:[#allocation6_spill] sm:$0xff] %v5919_v57  ;;  %6801 = vst [vmem:[#allocation7_spill] sm:$0xff] %v5921_v50  ;;  %v2479_v26 = vpop.f32.mrb[43].mxu1  ;;  %v3038_v44 = vmax.f32 %v2474_v37, 0.0 }
 0x25d   : > { %v2830_v61 = vmax.f32 %v1954_v48, 0.0  ;;  %v1958_v33 = vadd.f32 %v1957_v49, %v5342_v4  ;;  %v1959_v39 = vpop.f32.mrb[171].mxu0  ;;  %v2476_v48 = vadd.f32 %v2475_v40, %v5344_v5 }
 0x25e   : > { %v2831_v23 = vmax.f32 %v1956_v43, 0.0  ;;  %v1960_v38 = vadd.f32 %v1959_v39, %v5344_v5  ;;  %3956 = vmatprep.subr.bf16.mxu1 %v3657_v1  ;;  %v2478_v1 = vadd.f32 %v2477_v0, %v5342_v4  ;;  %v2480_v43 = vadd.f32 %v2479_v26, %v5344_v5 }
 0x25f   : > { %v2832_v60 = vmax.f32 %v1958_v33, 0.0  ;;  %4641 = vmatmul.mubr.msk.bf16.gmra.mrb[20].mxu0 %vm1159_vm0, %v4910_v2  ;;  %3957 = vmatpush1.bf16.msra.mxu1 %v3656_v62  ;;  %v3282_v49 = vmin.f32 %v2830_v61, 6.0  ;;  %v3039_v20 = vmax.f32 %v2476_v48, 0.0  ;;  %v5939_v0 = vmin.f32 %v3038_v44, 6.0  ;;  %v2483_v61 = vpop.f32.mrb[44].mxu1 }
 0x260   : > { %v2833_v10 = vmax.f32 %v1960_v38, 0.0  ;;  %2231 = vmatprep.mubr.bf16.mxu0 %v6720_v7  ;;  %v3283_v24 = vmin.f32 %v2831_v23, 6.0  ;;  %v3040_v2 = vmax.f32 %v2478_v1, 0.0  ;;  %v3041_v62 = vmax.f32 %v2480_v43, 0.0  ;;  %v4911_v38 = vld [vmem:[%s6710_s0 + $0x230] sm:$0xff]   ;;  %v2485_v1 = vpop.f32.mrb[45].mxu1 }
 0x261   : > { %v3284_v39 = vmin.f32 %v2832_v60, 6.0  ;;  %6802 = vst [vmem:[#allocation8_spill] sm:$0xff] %v5939_v0  ;;  %v5941_v26 = vmin.f32 %v3039_v20, 6.0 }
 0x262   : > { %v3285_v33 = vmin.f32 %v2833_v10, 6.0  ;;  %v1963_v54 = vpop.f32.mrb[172].mxu0  ;;  %v5944_v48 = vmin.f32 %v3040_v2, 6.0  ;;  %v5946_v10 = vmin.f32 %v3041_v62, 6.0  ;;  %v2484_v62 = vadd.f32 %v2483_v61, %v5342_v4 }
 0x263   : > { %v3658_v57 = vpack.c.bf16 %v3284_v39, %v3282_v49  ;;  %v1964_v36 = vadd.f32 %v1963_v54, %v5342_v4  ;;  %v1965_v40 = vpop.f32.mrb[173].mxu0  ;;  %6803 = vst [vmem:[#allocation9_spill] sm:$0xff] %v5941_v26  ;;  %v2487_v39 = vpop.f32.mrb[46].mxu1 }
 0x264   : > { %v3659_v60 = vpack.c.bf16 %v3285_v33, %v3283_v24  ;;  %v1966_v23 = vadd.f32 %v1965_v40, %v5344_v5  ;;  %v1967_v37 = vpop.f32.mrb[174].mxu0  ;;  %6804 = vst [vmem:[#allocation10_spill] sm:$0xff] %v5944_v48  ;;  %6805 = vst [vmem:[#allocation11_spill] sm:$0xff] %v5946_v10  ;;  %v2489_v33 = vpop.f32.mrb[47].mxu1  ;;  %v3042_v0 = vmax.f32 %v2484_v62, 0.0 }
 0x265   : > { %v2834_v54 = vmax.f32 %v1964_v36, 0.0  ;;  %v1968_v43 = vadd.f32 %v1967_v37, %v5342_v4  ;;  %v1969_v49 = vpop.f32.mrb[175].mxu0  ;;  %v2486_v36 = vadd.f32 %v2485_v1, %v5344_v5  ;;  %v2490_v37 = vadd.f32 %v2489_v33, %v5344_v5 }
 0x266   : > { %v2835_v7 = vmax.f32 %v1966_v23, 0.0  ;;  %v1970_v44 = vadd.f32 %v1969_v49, %v5344_v5  ;;  %3958 = vmatprep.subr.bf16.mxu1 %v3659_v60  ;;  %v6806_v23 = vmov 0   ;;  %v2488_v60 = vadd.f32 %v2487_v39, %v5342_v4 }
 0x267   : > { %v2836_v2 = vmax.f32 %v1968_v43, 0.0  ;;  %4642 = vmatmul.mubr.msk.bf16.gmra.mrb[24].mxu0 %vm1159_vm0, %v4911_v38  ;;  %3959 = vmatpush1.bf16.msra.mxu1 %v3658_v57  ;;  %v3286_v49 = vmin.f32 %v2834_v54, 6.0  ;;  %v3043_v20 = vmax.f32 %v2486_v36, 0.0  ;;  %v3045_v57 = vmax.f32 %v2490_v37, 0.0  ;;  %v2493_v54 = vpop.f32.mrb[48].mxu1 }
 0x268   : > { %v2837_v40 = vmax.f32 %v1970_v44, 0.0  ;;  %2241 = vmatprep.mubr.bf16.mxu0 %v6806_v23  ;;  %v3287_v48 = vmin.f32 %v2835_v7, 6.0  ;;  %v3044_v38 = vmax.f32 %v2488_v60, 0.0  ;;  %v4912_v44 = vld [vmem:[%s6710_s0 + $0x238] sm:$0xff]   ;;  %v5964_v39 = vmin.f32 %v3042_v0, 6.0 }
 0x269   : > { %v3288_v24 = vmin.f32 %v2836_v2, 6.0  ;;  %v5966_v33 = vmin.f32 %v3043_v20, 6.0 }
 0x26a   : > { %v3289_v43 = vmin.f32 %v2837_v40, 6.0  ;;  %v1973_v26 = vpop.f32.mrb[176].mxu0  ;;  %6807 = vst [vmem:[#allocation12_spill] sm:$0xff] %v5964_v39  ;;  %v5969_v36 = vmin.f32 %v3044_v38, 6.0  ;;  %v5971_v40 = vmin.f32 %v3045_v57, 6.0  ;;  %v2494_v57 = vadd.f32 %v2493_v54, %v5342_v4 }
 0x26b   : > { %v3660_v10 = vpack.c.bf16 %v3288_v24, %v3286_v49  ;;  %v1974_v61 = vadd.f32 %v1973_v26, %v5342_v4  ;;  %v1975_v1 = vpop.f32.mrb[177].mxu0  ;;  %6808 = vst [vmem:[#allocation13_spill] sm:$0xff] %v5966_v33  ;;  %v2495_v24 = vpop.f32.mrb[49].mxu1 }
 0x26c   : > { %v3661_v2 = vpack.c.bf16 %v3289_v43, %v3287_v48  ;;  %v1976_v7 = vadd.f32 %v1975_v1, %v5344_v5  ;;  %v1977_v62 = vpop.f32.mrb[178].mxu0  ;;  %6809 = vst [vmem:[#allocation14_spill] sm:$0xff] %v5969_v36  ;;  %6810 = vst [vmem:[#allocation15_spill] sm:$0xff] %v5971_v40  ;;  %v2497_v49 = vpop.f32.mrb[50].mxu1  ;;  %v3046_v48 = vmax.f32 %v2494_v57, 0.0 }
 0x26d   : > { %v2838_v26 = vmax.f32 %v1974_v61, 0.0  ;;  %v1978_v60 = vadd.f32 %v1977_v62, %v5342_v4  ;;  %v1979_v37 = vpop.f32.mrb[179].mxu0  ;;  %v2499_v43 = vpop.f32.mrb[51].mxu1  ;;  %v2496_v61 = vadd.f32 %v2495_v24, %v5344_v5 }
 0x26e   : > { %v2839_v53 = vmax.f32 %v1976_v7, 0.0  ;;  %v1980_v0 = vadd.f32 %v1979_v37, %v5344_v5  ;;  %3960 = vmatprep.subr.bf16.mxu1 %v3661_v2  ;;  %v2498_v2 = vadd.f32 %v2497_v49, %v5342_v4  ;;  %v2500_v7 = vadd.f32 %v2499_v43, %v5344_v5 }
 0x26f   : > { %v2840_v38 = vmax.f32 %v1978_v60, 0.0  ;;  %4643 = vmatmul.mubr.msk.bf16.gmra.mrb[28].mxu0 %vm1159_vm0, %v4912_v44  ;;  %3961 = vmatpush1.bf16.msra.mxu1 %v3660_v10  ;;  %v3290_v62 = vmin.f32 %v2838_v26, 6.0  ;;  %v3047_v20 = vmax.f32 %v2496_v61, 0.0  ;;  %v5989_v49 = vmin.f32 %v3046_v48, 6.0  ;;  %v2503_v26 = vpop.f32.mrb[52].mxu1 }
 0x270   : > { %v2841_v1 = vmax.f32 %v1980_v0, 0.0  ;;  %2251 = vmatprep.mubr.bf16.mxu0 %v6806_v23  ;;  %v3291_v39 = vmin.f32 %v2839_v53, 6.0  ;;  %v3048_v44 = vmax.f32 %v2498_v2, 0.0  ;;  %v3049_v10 = vmax.f32 %v2500_v7, 0.0  ;;  %v4913_v0 = vld [vmem:[%s6710_s0 + $0x240] sm:$0xff]   ;;  %v2505_v2 = vpop.f32.mrb[53].mxu1 }
 0x271   : > { %v3292_v37 = vmin.f32 %v2840_v38, 6.0  ;;  %6811 = vst [vmem:[#allocation16_spill] sm:$0xff] %v5989_v49  ;;  %v5991_v43 = vmin.f32 %v3047_v20, 6.0 }
 0x272   : > { %v3293_v60 = vmin.f32 %v2841_v1, 6.0  ;;  %v1983_v36 = vpop.f32.mrb[180].mxu0  ;;  %v5994_v61 = vmin.f32 %v3048_v44, 6.0  ;;  %v5996_v1 = vmin.f32 %v3049_v10, 6.0  ;;  %v2504_v10 = vadd.f32 %v2503_v26, %v5342_v4 }
 0x273   : > { %v3662_v33 = vpack.c.bf16 %v3292_v37, %v3290_v62  ;;  %v1984_v54 = vadd.f32 %v1983_v36, %v5342_v4  ;;  %v1985_v24 = vpop.f32.mrb[181].mxu0  ;;  %6812 = vst [vmem:[#allocation17_spill] sm:$0xff] %v5991_v43  ;;  %v2507_v37 = vpop.f32.mrb[54].mxu1 }
 0x274   : > { %v3663_v38 = vpack.c.bf16 %v3293_v60, %v3291_v39  ;;  %v1986_v53 = vadd.f32 %v1985_v24, %v5344_v5  ;;  %v1987_v57 = vpop.f32.mrb[182].mxu0  ;;  %6813 = vst [vmem:[#allocation18_spill] sm:$0xff] %v5994_v61  ;;  %6814 = vst [vmem:[#allocation19_spill] sm:$0xff] %v5996_v1  ;;  %v2509_v60 = vpop.f32.mrb[55].mxu1  ;;  %v3050_v39 = vmax.f32 %v2504_v10, 0.0 }
 0x275   : > { %v2842_v36 = vmax.f32 %v1984_v54, 0.0  ;;  %v1988_v7 = vadd.f32 %v1987_v57, %v5342_v4  ;;  %v1989_v62 = vpop.f32.mrb[183].mxu0  ;;  %v2506_v54 = vadd.f32 %v2505_v2, %v5344_v5 }
 0x276   : > { %v2843_v40 = vmax.f32 %v1986_v53, 0.0  ;;  %v1990_v48 = vadd.f32 %v1989_v62, %v5344_v5  ;;  %3962 = vmatprep.subr.bf16.mxu1 %v3663_v38  ;;  %v2508_v38 = vadd.f32 %v2507_v37, %v5342_v4  ;;  %v2510_v53 = vadd.f32 %v2509_v60, %v5344_v5 }
 0x277   : > { %v2844_v44 = vmax.f32 %v1988_v7, 0.0  ;;  %4644 = vmatmul.mubr.msk.bf16.gmra.mrb[32].mxu0 %vm1159_vm0, %v4913_v0  ;;  %3963 = vmatpush1.bf16.msra.mxu1 %v3662_v33  ;;  %v3294_v57 = vmin.f32 %v2842_v36, 6.0  ;;  %v3051_v20 = vmax.f32 %v2506_v54, 0.0  ;;  %v6014_v37 = vmin.f32 %v3050_v39, 6.0  ;;  %v2513_v36 = vpop.f32.mrb[56].mxu1 }
 0x278   : > { %v2845_v24 = vmax.f32 %v1990_v48, 0.0  ;;  %2261 = vmatprep.mubr.bf16.mxu0 %v6806_v23  ;;  %v3295_v49 = vmin.f32 %v2843_v40, 6.0  ;;  %v3052_v0 = vmax.f32 %v2508_v38, 0.0  ;;  %v3053_v33 = vmax.f32 %v2510_v53, 0.0  ;;  %v4914_v48 = vld [vmem:[%s6710_s0 + $0x248] sm:$0xff]   ;;  %v2515_v38 = vpop.f32.mrb[57].mxu1 }
 0x279   : > { %v3296_v62 = vmin.f32 %v2844_v44, 6.0  ;;  %6815 = vst [vmem:[#allocation20_spill] sm:$0xff] %v6014_v37  ;;  %v6016_v60 = vmin.f32 %v3051_v20, 6.0 }
 0x27a   : > { %v3297_v7 = vmin.f32 %v2845_v24, 6.0  ;;  %v1993_v61 = vpop.f32.mrb[184].mxu0  ;;  %v6019_v54 = vmin.f32 %v3052_v0, 6.0  ;;  %v6021_v24 = vmin.f32 %v3053_v33, 6.0  ;;  %v2514_v33 = vadd.f32 %v2513_v36, %v5342_v4 }
 0x27b   : > { %v3664_v43 = vpack.c.bf16 %v3296_v62, %v3294_v57  ;;  %v1994_v26 = vadd.f32 %v1993_v61, %v5342_v4  ;;  %v1995_v2 = vpop.f32.mrb[185].mxu0  ;;  %6816 = vst [vmem:[#allocation21_spill] sm:$0xff] %v6016_v60  ;;  %v2517_v62 = vpop.f32.mrb[58].mxu1 }
 0x27c   : > { %v3665_v44 = vpack.c.bf16 %v3297_v7, %v3295_v49  ;;  %v1996_v40 = vadd.f32 %v1995_v2, %v5344_v5  ;;  %v1997_v10 = vpop.f32.mrb[186].mxu0  ;;  %6817 = vst [vmem:[#allocation22_spill] sm:$0xff] %v6019_v54  ;;  %6818 = vst [vmem:[#allocation23_spill] sm:$0xff] %v6021_v24  ;;  %v2519_v7 = vpop.f32.mrb[59].mxu1  ;;  %v3054_v49 = vmax.f32 %v2514_v33, 0.0 }
 0x27d   : > { %v2846_v61 = vmax.f32 %v1994_v26, 0.0  ;;  %v1998_v53 = vadd.f32 %v1997_v10, %v5342_v4  ;;  %v1999_v57 = vpop.f32.mrb[187].mxu0  ;;  %v2516_v26 = vadd.f32 %v2515_v38, %v5344_v5 }
 0x27e   : > { %v2847_v1 = vmax.f32 %v1996_v40, 0.0  ;;  %v2000_v39 = vadd.f32 %v1999_v57, %v5344_v5  ;;  %3964 = vmatprep.subr.bf16.mxu1 %v3665_v44  ;;  %v2518_v44 = vadd.f32 %v2517_v62, %v5342_v4  ;;  %v2520_v40 = vadd.f32 %v2519_v7, %v5344_v5 }
 0x27f   : > { %v2848_v0 = vmax.f32 %v1998_v53, 0.0  ;;  %4645 = vmatmul.mubr.msk.bf16.gmra.mrb[36].mxu0 %vm1159_vm0, %v4914_v48  ;;  %3965 = vmatpush1.bf16.msra.mxu1 %v3664_v43  ;;  %v3298_v10 = vmin.f32 %v2846_v61, 6.0  ;;  %v3055_v20 = vmax.f32 %v2516_v26, 0.0  ;;  %v6039_v62 = vmin.f32 %v3054_v49, 6.0  ;;  %v2523_v61 = vpop.f32.mrb[60].mxu1 }
 0x280   : > { %v2849_v2 = vmax.f32 %v2000_v39, 0.0  ;;  %2271 = vmatprep.mubr.bf16.mxu0 %v6806_v23  ;;  %v3299_v37 = vmin.f32 %v2847_v1, 6.0  ;;  %v3056_v48 = vmax.f32 %v2518_v44, 0.0  ;;  %v3057_v43 = vmax.f32 %v2520_v40, 0.0  ;;  %v4915_v39 = vld [vmem:[%s6710_s0 + $0x250] sm:$0xff]   ;;  %v2525_v44 = vpop.f32.mrb[61].mxu1 }
 0x281   : > { %v3300_v57 = vmin.f32 %v2848_v0, 6.0  ;;  %6819 = vst [vmem:[#allocation24_spill] sm:$0xff] %v6039_v62  ;;  %v6041_v7 = vmin.f32 %v3055_v20, 6.0 }
 0x282   : > { %v3301_v53 = vmin.f32 %v2849_v2, 6.0  ;;  %v2003_v54 = vpop.f32.mrb[188].mxu0  ;;  %v6044_v26 = vmin.f32 %v3056_v48, 6.0  ;;  %v6046_v2 = vmin.f32 %v3057_v43, 6.0  ;;  %v2524_v43 = vadd.f32 %v2523_v61, %v5342_v4 }
 0x283   : > { %v3666_v60 = vpack.c.bf16 %v3300_v57, %v3298_v10  ;;  %v2004_v36 = vadd.f32 %v2003_v54, %v5342_v4  ;;  %v2005_v38 = vpop.f32.mrb[189].mxu0  ;;  %6820 = vst [vmem:[#allocation25_spill] sm:$0xff] %v6041_v7  ;;  %v2527_v57 = vpop.f32.mrb[62].mxu1 }
 0x284   : > { %v3667_v0 = vpack.c.bf16 %v3301_v53, %v3299_v37  ;;  %v2006_v1 = vadd.f32 %v2005_v38, %v5344_v5  ;;  %v2007_v33 = vpop.f32.mrb[190].mxu0  ;;  %6821 = vst [vmem:[#allocation26_spill] sm:$0xff] %v6044_v26  ;;  %6822 = vst [vmem:[#allocation27_spill] sm:$0xff] %v6046_v2  ;;  %v2529_v53 = vpop.f32.mrb[63].mxu1  ;;  %v3058_v37 = vmax.f32 %v2524_v43, 0.0 }
 0x285   : > { %v2850_v54 = vmax.f32 %v2004_v36, 0.0  ;;  %v2008_v40 = vadd.f32 %v2007_v33, %v5342_v4  ;;  %v2009_v10 = vpop.f32.mrb[191].mxu0  ;;  %v2526_v36 = vadd.f32 %v2525_v44, %v5344_v5 }
 0x286   : > { %v2851_v24 = vmax.f32 %v2006_v1, 0.0  ;;  %v2010_v49 = vadd.f32 %v2009_v10, %v5344_v5  ;;  %3966 = vmatprep.subr.bf16.mxu1 %v3667_v0  ;;  %v2528_v0 = vadd.f32 %v2527_v57, %v5342_v4  ;;  %v2530_v1 = vadd.f32 %v2529_v53, %v5344_v5 }
 0x287   : > { %v2852_v48 = vmax.f32 %v2008_v40, 0.0  ;;  %4646 = vmatmul.mubr.msk.bf16.gmra.mrb[40].mxu0 %vm1159_vm0, %v4915_v39  ;;  %3967 = vmatpush1.bf16.msra.mxu1 %v3666_v60  ;;  %v3302_v33 = vmin.f32 %v2850_v54, 6.0  ;;  %v3059_v20 = vmax.f32 %v2526_v36, 0.0  ;;  %v6064_v57 = vmin.f32 %v3058_v37, 6.0  ;;  %v2533_v54 = vpop.f32.mrb[64].mxu1  ;;  %v4952_v37 = vld [vmem:[%s6713_s3 + $0x10] sm:$0xff] }
 0x288   : > { %v2853_v38 = vmax.f32 %v2010_v49, 0.0  ;;  %2281 = vmatprep.mubr.bf16.mxu0 %v6806_v23  ;;  %v3303_v62 = vmin.f32 %v2851_v24, 6.0  ;;  %v3060_v39 = vmax.f32 %v2528_v0, 0.0  ;;  %v3061_v60 = vmax.f32 %v2530_v1, 0.0  ;;  %v4916_v49 = vld [vmem:[%s6710_s0 + $0x258] sm:$0xff]   ;;  %v2535_v0 = vpop.f32.mrb[65].mxu1 }
 0x289   : > { %v3304_v10 = vmin.f32 %v2852_v48, 6.0  ;;  %6823 = vst [vmem:[#allocation28_spill] sm:$0xff] %v6064_v57  ;;  %v6066_v53 = vmin.f32 %v3059_v20, 6.0  ;;  %v4689_v20 = vcombine.low %v4952_v37, %v4952_v37 }
 0x28a   : > { %v3305_v40 = vmin.f32 %v2853_v38, 6.0  ;;  %v2013_v26 = vpop.f32.mrb[192].mxu0  ;;  %v6069_v36 = vmin.f32 %v3060_v39, 6.0  ;;  %v6071_v38 = vmin.f32 %v3061_v60, 6.0 }
 0x28b   : > { %v3668_v7 = vpack.c.bf16 %v3304_v10, %v3302_v33  ;;  %v2014_v61 = vadd.f32 %v2013_v26, %v5342_v4  ;;  %v2015_v44 = vpop.f32.mrb[193].mxu0  ;;  %6824 = vst [vmem:[#allocation29_spill] sm:$0xff] %v6066_v53  ;;  %v2537_v10 = vpop.f32.mrb[66].mxu1 }
 0x28c   : > { %v3669_v48 = vpack.c.bf16 %v3305_v40, %v3303_v62  ;;  %v2016_v24 = vadd.f32 %v2015_v44, %v5344_v5  ;;  %v2017_v43 = vpop.f32.mrb[194].mxu0  ;;  %6825 = vst [vmem:[#allocation30_spill] sm:$0xff] %v6069_v36  ;;  %6826 = vst [vmem:[#allocation31_spill] sm:$0xff] %v6071_v38  ;;  %v2539_v60 = vpop.f32.mrb[67].mxu1  ;;  %v2534_v44 = vadd.f32 %v2533_v54, %v5342_v4 }
 0x28d   : > { %v2854_v26 = vmax.f32 %v2014_v61, 0.0  ;;  %v2018_v1 = vadd.f32 %v2017_v43, %v5342_v4  ;;  %v2019_v33 = vpop.f32.mrb[195].mxu0  ;;  %v2536_v43 = vadd.f32 %v2535_v0, %v5344_v5 }
 0x28e   : > { %v2855_v2 = vmax.f32 %v2016_v24, 0.0  ;;  %v2020_v62 = vadd.f32 %v2019_v33, %v5344_v5  ;;  %3968 = vmatprep.subr.bf16.mxu1 %v3669_v48  ;;  %v2538_v48 = vadd.f32 %v2537_v10, %v5342_v4  ;;  %v2540_v24 = vadd.f32 %v2539_v60, %v5344_v5  ;;  %v4919_v10 = vld [vmem:[%s6710_s0 + $0x260] sm:$0xff]   ;;  %v2543_v60 = vpop.f32.mrb[68].mxu1 }
 0x28f   : > { %v2856_v61 = vmax.f32 %v2018_v1, 0.0  ;;  %4647 = vmatmul.mubr.msk.bf16.gmra.mrb[44].mxu0 %vm1159_vm0, %v4916_v49  ;;  %3969 = vmatpush1.bf16.msra.mxu1 %v3668_v7  ;;  %v3306_v33 = vmin.f32 %v2854_v26, 6.0  ;;  %v3062_v57 = vmax.f32 %v2534_v44, 0.0  ;;  %v3063_v39 = vmax.f32 %v2536_v43, 0.0  ;;  %v2545_v43 = vpop.f32.mrb[69].mxu1 }
 0x290   : > { %v2857_v37 = vmax.f32 %v2020_v62, 0.0  ;;  %2291 = vmatprep.mubr.bf16.mxu0 %v6806_v23  ;;  %v3307_v36 = vmin.f32 %v2855_v2, 6.0  ;;  %v3064_v7 = vmax.f32 %v2538_v48, 0.0  ;;  %v3065_v49 = vmax.f32 %v2540_v24, 0.0  ;;  %v3569_v2 = vld [vmem:[%s6713_s3 + $0x18] sm:$0xff] }
 0x291   : > { %v3308_v40 = vmin.f32 %v2856_v61, 6.0  ;;  %v6092_v38 = vmin.f32 %v3062_v57, 6.0  ;;  %v6094_v26 = vmin.f32 %v3063_v39, 6.0  ;;  %v2547_v39 = vpop.f32.mrb[70].mxu1  ;;  %v4692_v24 = vcombine.high %v3569_v2, %v3569_v2 }
 0x292   : > { %v3309_v1 = vmin.f32 %v2857_v37, 6.0  ;;  %v2023_v53 = vpop.f32.mrb[196].mxu0  ;;  %3971 = vmatmul.mubr.bf16.vlgmr.msra.gmra.mrb[116].mxu1 %v4689_v20  ;;  %v6100_v44 = vmin.f32 %v3064_v7, 6.0  ;;  %v2549_v7 = vpop.f32.mrb[71].mxu1 }
 0x293   : > { %v3670_v54 = vpack.c.bf16 %v3308_v40, %v3306_v33  ;;  %v2024_v0 = vadd.f32 %v2023_v53, %v5342_v4  ;;  %v2025_v62 = vpop.f32.mrb[197].mxu0  ;;  %6827 = vst [vmem:[#allocation32_spill] sm:$0xff] %v6092_v38  ;;  %6828 = vst [vmem:[#allocation33_spill] sm:$0xff] %v6094_v26  ;;  %v6102_v53 = vmin.f32 %v3065_v49, 6.0  ;;  %4011 = vmatprep.mubr.bf16.mxu1 %v4692_v24 }
 0x294   : > { %v3671_v20 = vpack.c.bf16 %v3309_v1, %v3307_v36  ;;  %v2026_v61 = vadd.f32 %v2025_v62, %v5344_v5  ;;  %v2027_v40 = vpop.f32.mrb[198].mxu0  ;;  %6829 = vst [vmem:[#allocation34_spill] sm:$0xff] %v6100_v44  ;;  %v2546_v62 = vadd.f32 %v2545_v43, %v5344_v5 }
 0x295   : > { %v2858_v37 = vmax.f32 %v2024_v0, 0.0  ;;  %v2028_v57 = vadd.f32 %v2027_v40, %v5342_v4  ;;  %v2029_v48 = vpop.f32.mrb[199].mxu0  ;;  %v2544_v0 = vadd.f32 %v2543_v60, %v5342_v4 }
 0x296   : > { %v2859_v33 = vmax.f32 %v2026_v61, 0.0  ;;  %v2030_v50 = vadd.f32 %v2029_v48, %v5344_v5  ;;  %3979 = vmatprep.subr.bf16.mxu1 %v3671_v20  ;;  %v2548_v20 = vadd.f32 %v2547_v39, %v5342_v4  ;;  %v2550_v61 = vadd.f32 %v2549_v7, %v5344_v5  ;;  %v4920_v39 = vld [vmem:[%s6710_s0 + $0x268] sm:$0xff]  }
 0x297   : > { %v2860_v49 = vmax.f32 %v2028_v57, 0.0  ;;  %4648 = vmatmul.mubr.msk.bf16.gmra.mrb[48].mxu0 %vm1159_vm0, %v4919_v10  ;;  %3980 = vmatpush1.bf16.msra.mxu1 %v3670_v54  ;;  %v3310_v40 = vmin.f32 %v2858_v37, 6.0  ;;  %v3066_v36 = vmax.f32 %v2544_v0, 0.0  ;;  %v3067_v1 = vmax.f32 %v2546_v62, 0.0  ;;  %v2553_v37 = vpop.f32.mrb[72].mxu1 }
 0x298   : > { %v2861_v2 = vmax.f32 %v2030_v50, 0.0  ;;  %2301 = vmatprep.mubr.bf16.mxu0 %v6806_v23  ;;  %v3311_v57 = vmin.f32 %v2859_v33, 6.0  ;;  %v3068_v54 = vmax.f32 %v2548_v20, 0.0  ;;  %v3069_v44 = vmax.f32 %v2550_v61, 0.0 }
 0x299   : > { %v3312_v48 = vmin.f32 %v2860_v49, 6.0  ;;  %v6120_v26 = vmin.f32 %v3066_v36, 6.0  ;;  %v6122_v24 = vmin.f32 %v3067_v1, 6.0 }
 0x29a   : > { %v3313_v38 = vmin.f32 %v2861_v2, 6.0  ;;  %v2033_v10 = vpop.f32.mrb[200].mxu0  ;;  %v6125_v0 = vmin.f32 %v3068_v54, 6.0  ;;  %v6127_v62 = vmin.f32 %v3069_v44, 6.0  ;;  %v2555_v2 = vpop.f32.mrb[73].mxu1  ;;  %v2554_v44 = vadd.f32 %v2553_v37, %v5342_v4 }
 0x29b   : > { %v3672_v60 = vpack.c.bf16 %v3312_v48, %v3310_v40  ;;  %v2034_v43 = vadd.f32 %v2033_v10, %v5342_v4  ;;  %v2035_v50 = vpop.f32.mrb[201].mxu0  ;;  %6830 = vst [vmem:[#allocation35_spill] sm:$0xff] %v6120_v26  ;;  %6831 = vst [vmem:[#allocation36_spill] sm:$0xff] %v6122_v24  ;;  %v2557_v48 = vpop.f32.mrb[74].mxu1 }
 0x29c   : > { %v3673_v7 = vpack.c.bf16 %v3313_v38, %v3311_v57  ;;  %v2036_v33 = vadd.f32 %v2035_v50, %v5344_v5  ;;  %v2037_v49 = vpop.f32.mrb[202].mxu0  ;;  %6832 = vst [vmem:[#allocation37_spill] sm:$0xff] %v6125_v0  ;;  %6833 = vst [vmem:[#allocation38_spill] sm:$0xff] %v6127_v62  ;;  %v2559_v57 = vpop.f32.mrb[75].mxu1  ;;  %v3070_v38 = vmax.f32 %v2554_v44, 0.0 }
 0x29d   : > { %v2862_v20 = vmax.f32 %v2034_v43, 0.0  ;;  %v2038_v61 = vadd.f32 %v2037_v49, %v5342_v4  ;;  %v2039_v40 = vpop.f32.mrb[203].mxu0  ;;  %v2556_v43 = vadd.f32 %v2555_v2, %v5344_v5 }
 0x29e   : > { %v2863_v10 = vmax.f32 %v2036_v33, 0.0  ;;  %v2040_v36 = vadd.f32 %v2039_v40, %v5344_v5  ;;  %3981 = vmatprep.subr.bf16.mxu1 %v3673_v7  ;;  %v2558_v7 = vadd.f32 %v2557_v48, %v5342_v4  ;;  %v2560_v33 = vadd.f32 %v2559_v57, %v5344_v5 }
 0x29f   : > { %v2864_v54 = vmax.f32 %v2038_v61, 0.0  ;;  %4649 = vmatmul.mubr.msk.bf16.gmra.mrb[52].mxu0 %vm1159_vm0, %v4920_v39  ;;  %3982 = vmatpush1.bf16.msra.mxu1 %v3672_v60  ;;  %v3314_v49 = vmin.f32 %v2862_v20, 6.0  ;;  %v3071_v1 = vmax.f32 %v2556_v43, 0.0  ;;  %v6145_v48 = vmin.f32 %v3070_v38, 6.0  ;;  %v2563_v20 = vpop.f32.mrb[76].mxu1 }
 0x2a0   : > { %v2865_v50 = vmax.f32 %v2040_v36, 0.0  ;;  %2311 = vmatprep.mubr.bf16.mxu0 %v6806_v23  ;;  %v3315_v26 = vmin.f32 %v2863_v10, 6.0  ;;  %v3072_v39 = vmax.f32 %v2558_v7, 0.0  ;;  %v3073_v60 = vmax.f32 %v2560_v33, 0.0  ;;  %v4921_v36 = vld [vmem:[%s6710_s0 + $0x270] sm:$0xff]   ;;  %v2565_v7 = vpop.f32.mrb[77].mxu1 }
 0x2a1   : > { %v3316_v40 = vmin.f32 %v2864_v54, 6.0  ;;  %6834 = vst [vmem:[#allocation39_spill] sm:$0xff] %v6145_v48  ;;  %v6147_v57 = vmin.f32 %v3071_v1, 6.0 }
 0x2a2   : > { %v3317_v61 = vmin.f32 %v2865_v50, 6.0  ;;  %v2043_v0 = vpop.f32.mrb[204].mxu0  ;;  %v6150_v43 = vmin.f32 %v3072_v39, 6.0  ;;  %v6152_v50 = vmin.f32 %v3073_v60, 6.0  ;;  %v2564_v60 = vadd.f32 %v2563_v20, %v5342_v4 }
 0x2a3   : > { %v3674_v24 = vpack.c.bf16 %v3316_v40, %v3314_v49  ;;  %v2044_v37 = vadd.f32 %v2043_v0, %v5342_v4  ;;  %v2045_v2 = vpop.f32.mrb[205].mxu0  ;;  %6835 = vst [vmem:[#allocation40_spill] sm:$0xff] %v6147_v57  ;;  %v2567_v40 = vpop.f32.mrb[78].mxu1 }
 0x2a4   : > { %v3675_v54 = vpack.c.bf16 %v3317_v61, %v3315_v26  ;;  %v2046_v10 = vadd.f32 %v2045_v2, %v5344_v5  ;;  %v2047_v44 = vpop.f32.mrb[206].mxu0  ;;  %6836 = vst [vmem:[#allocation41_spill] sm:$0xff] %v6150_v43  ;;  %6837 = vst [vmem:[#allocation42_spill] sm:$0xff] %v6152_v50  ;;  %v2569_v61 = vpop.f32.mrb[79].mxu1  ;;  %v3074_v26 = vmax.f32 %v2564_v60, 0.0 }
 0x2a5   : > { %v2866_v0 = vmax.f32 %v2044_v37, 0.0  ;;  %v2048_v33 = vadd.f32 %v2047_v44, %v5342_v4  ;;  %v2049_v49 = vpop.f32.mrb[207].mxu0  ;;  %v2566_v37 = vadd.f32 %v2565_v7, %v5344_v5 }
 0x2a6   : > { %v2867_v62 = vmax.f32 %v2046_v10, 0.0  ;;  %v2050_v38 = vadd.f32 %v2049_v49, %v5344_v5  ;;  %3983 = vmatprep.subr.bf16.mxu1 %v3675_v54  ;;  %v2568_v54 = vadd.f32 %v2567_v40, %v5342_v4  ;;  %v2570_v10 = vadd.f32 %v2569_v61, %v5344_v5 }
 0x2a7   : > { %v2868_v39 = vmax.f32 %v2048_v33, 0.0  ;;  %4650 = vmatmul.mubr.msk.bf16.gmra.mrb[56].mxu0 %vm1159_vm0, %v4921_v36  ;;  %3984 = vmatpush1.bf16.msra.mxu1 %v3674_v24  ;;  %v3318_v44 = vmin.f32 %v2866_v0, 6.0  ;;  %v3075_v1 = vmax.f32 %v2566_v37, 0.0  ;;  %v6170_v40 = vmin.f32 %v3074_v26, 6.0  ;;  %v2573_v0 = vpop.f32.mrb[80].mxu1 }
 0x2a8   : > { %v2869_v2 = vmax.f32 %v2050_v38, 0.0  ;;  %2321 = vmatprep.mubr.bf16.mxu0 %v6806_v23  ;;  %v3319_v48 = vmin.f32 %v2867_v62, 6.0  ;;  %v3076_v36 = vmax.f32 %v2568_v54, 0.0  ;;  %v3077_v24 = vmax.f32 %v2570_v10, 0.0  ;;  %v4922_v38 = vld [vmem:[%s6710_s0 + $0x278] sm:$0xff]   ;;  %v2575_v54 = vpop.f32.mrb[81].mxu1 }
 0x2a9   : > { %v3320_v49 = vmin.f32 %v2868_v39, 6.0  ;;  %6838 = vst [vmem:[#allocation43_spill] sm:$0xff] %v6170_v40  ;;  %v6172_v61 = vmin.f32 %v3075_v1, 6.0 }
 0x2aa   : > { %v3321_v33 = vmin.f32 %v2869_v2, 6.0  ;;  %v2053_v43 = vpop.f32.mrb[208].mxu0  ;;  %v6175_v37 = vmin.f32 %v3076_v36, 6.0  ;;  %v6177_v2 = vmin.f32 %v3077_v24, 6.0  ;;  %v2574_v24 = vadd.f32 %v2573_v0, %v5342_v4 }
 0x2ab   : > { %v3676_v57 = vpack.c.bf16 %v3320_v49, %v3318_v44  ;;  %v2054_v20 = vadd.f32 %v2053_v43, %v5342_v4  ;;  %v2055_v7 = vpop.f32.mrb[209].mxu0  ;;  %6839 = vst [vmem:[#allocation44_spill] sm:$0xff] %v6172_v61  ;;  %v2577_v49 = vpop.f32.mrb[82].mxu1 }
 0x2ac   : > { %v3677_v39 = vpack.c.bf16 %v3321_v33, %v3319_v48  ;;  %v2056_v62 = vadd.f32 %v2055_v7, %v5344_v5  ;;  %v2057_v60 = vpop.f32.mrb[210].mxu0  ;;  %6840 = vst [vmem:[#allocation45_spill] sm:$0xff] %v6175_v37  ;;  %6841 = vst [vmem:[#allocation46_spill] sm:$0xff] %v6177_v2  ;;  %v2579_v33 = vpop.f32.mrb[83].mxu1  ;;  %v3078_v48 = vmax.f32 %v2574_v24, 0.0 }
 0x2ad   : > { %v2870_v43 = vmax.f32 %v2054_v20, 0.0  ;;  %v2058_v10 = vadd.f32 %v2057_v60, %v5342_v4  ;;  %v2059_v44 = vpop.f32.mrb[211].mxu0  ;;  %v2576_v20 = vadd.f32 %v2575_v54, %v5344_v5 }
 0x2ae   : > { %v2871_v50 = vmax.f32 %v2056_v62, 0.0  ;;  %v2060_v26 = vadd.f32 %v2059_v44, %v5344_v5  ;;  %3985 = vmatprep.subr.bf16.mxu1 %v3677_v39  ;;  %v2578_v39 = vadd.f32 %v2577_v49, %v5342_v4  ;;  %v2580_v62 = vadd.f32 %v2579_v33, %v5344_v5 }
 0x2af   : > { %v2872_v36 = vmax.f32 %v2058_v10, 0.0  ;;  %4651 = vmatmul.mubr.msk.bf16.gmra.mrb[60].mxu0 %vm1159_vm0, %v4922_v38  ;;  %3986 = vmatpush1.bf16.msra.mxu1 %v3676_v57  ;;  %v3322_v60 = vmin.f32 %v2870_v43, 6.0  ;;  %v3079_v1 = vmax.f32 %v2576_v20, 0.0  ;;  %v6195_v49 = vmin.f32 %v3078_v48, 6.0  ;;  %v2583_v43 = vpop.f32.mrb[84].mxu1 }
 0x2b0   : > { %v2873_v7 = vmax.f32 %v2060_v26, 0.0  ;;  %2331 = vmatprep.mubr.bf16.mxu0 %v6806_v23  ;;  %v3323_v40 = vmin.f32 %v2871_v50, 6.0  ;;  %v3080_v38 = vmax.f32 %v2578_v39, 0.0  ;;  %v3081_v57 = vmax.f32 %v2580_v62, 0.0  ;;  %v4923_v26 = vld [vmem:[%s6710_s0 + $0x280] sm:$0xff]   ;;  %v2585_v39 = vpop.f32.mrb[85].mxu1 }
 0x2b1   : > { %v3324_v44 = vmin.f32 %v2872_v36, 6.0  ;;  %6842 = vst [vmem:[#allocation47_spill] sm:$0xff] %v6195_v49  ;;  %v6197_v33 = vmin.f32 %v3079_v1, 6.0 }
 0x2b2   : > { %v3325_v10 = vmin.f32 %v2873_v7, 6.0  ;;  %v2063_v37 = vpop.f32.mrb[212].mxu0  ;;  %v6200_v20 = vmin.f32 %v3080_v38, 6.0  ;;  %v6202_v7 = vmin.f32 %v3081_v57, 6.0  ;;  %v2584_v57 = vadd.f32 %v2583_v43, %v5342_v4 }
 0x2b3   : > { %v3678_v61 = vpack.c.bf16 %v3324_v44, %v3322_v60  ;;  %v2064_v0 = vadd.f32 %v2063_v37, %v5342_v4  ;;  %v2065_v54 = vpop.f32.mrb[213].mxu0  ;;  %6843 = vst [vmem:[#allocation48_spill] sm:$0xff] %v6197_v33  ;;  %v2587_v44 = vpop.f32.mrb[86].mxu1 }
 0x2b4   : > { %v3679_v36 = vpack.c.bf16 %v3325_v10, %v3323_v40  ;;  %v2066_v50 = vadd.f32 %v2065_v54, %v5344_v5  ;;  %v2067_v24 = vpop.f32.mrb[214].mxu0  ;;  %6844 = vst [vmem:[#allocation49_spill] sm:$0xff] %v6200_v20  ;;  %6845 = vst [vmem:[#allocation50_spill] sm:$0xff] %v6202_v7  ;;  %v2589_v10 = vpop.f32.mrb[87].mxu1  ;;  %v3082_v40 = vmax.f32 %v2584_v57, 0.0 }
 0x2b5   : > { %v2874_v37 = vmax.f32 %v2064_v0, 0.0  ;;  %v2068_v62 = vadd.f32 %v2067_v24, %v5342_v4  ;;  %v2069_v60 = vpop.f32.mrb[215].mxu0  ;;  %v2586_v0 = vadd.f32 %v2585_v39, %v5344_v5 }
 0x2b6   : > { %v2875_v2 = vmax.f32 %v2066_v50, 0.0  ;;  %v2070_v48 = vadd.f32 %v2069_v60, %v5344_v5  ;;  %3987 = vmatprep.subr.bf16.mxu1 %v3679_v36  ;;  %v2588_v36 = vadd.f32 %v2587_v44, %v5342_v4  ;;  %v2590_v50 = vadd.f32 %v2589_v10, %v5344_v5 }
 0x2b7   : > { %v2876_v38 = vmax.f32 %v2068_v62, 0.0  ;;  %4652 = vmatmul.mubr.msk.bf16.gmra.mrb[64].mxu0 %vm1159_vm0, %v4923_v26  ;;  %3988 = vmatpush1.bf16.msra.mxu1 %v3678_v61  ;;  %v3326_v24 = vmin.f32 %v2874_v37, 6.0  ;;  %v3083_v1 = vmax.f32 %v2586_v0, 0.0  ;;  %v6220_v44 = vmin.f32 %v3082_v40, 6.0  ;;  %v2593_v37 = vpop.f32.mrb[88].mxu1 }
 0x2b8   : > { %v2877_v54 = vmax.f32 %v2070_v48, 0.0  ;;  %2341 = vmatprep.mubr.bf16.mxu0 %v6806_v23  ;;  %v3327_v49 = vmin.f32 %v2875_v2, 6.0  ;;  %v3084_v26 = vmax.f32 %v2588_v36, 0.0  ;;  %v3085_v61 = vmax.f32 %v2590_v50, 0.0  ;;  %v4924_v48 = vld [vmem:[%s6710_s0 + $0x288] sm:$0xff]   ;;  %v2595_v36 = vpop.f32.mrb[89].mxu1 }
 0x2b9   : > { %v3328_v60 = vmin.f32 %v2876_v38, 6.0  ;;  %6846 = vst [vmem:[#allocation51_spill] sm:$0xff] %v6220_v44  ;;  %v6222_v10 = vmin.f32 %v3083_v1, 6.0 }
 0x2ba   : > { %v3329_v62 = vmin.f32 %v2877_v54, 6.0  ;;  %v2073_v20 = vpop.f32.mrb[216].mxu0  ;;  %v6225_v0 = vmin.f32 %v3084_v26, 6.0  ;;  %v6227_v54 = vmin.f32 %v3085_v61, 6.0  ;;  %v2594_v61 = vadd.f32 %v2593_v37, %v5342_v4 }
 0x2bb   : > { %v3680_v33 = vpack.c.bf16 %v3328_v60, %v3326_v24  ;;  %v2074_v43 = vadd.f32 %v2073_v20, %v5342_v4  ;;  %v2075_v39 = vpop.f32.mrb[217].mxu0  ;;  %6847 = vst [vmem:[#allocation52_spill] sm:$0xff] %v6222_v10  ;;  %v2597_v60 = vpop.f32.mrb[90].mxu1 }
 0x2bc   : > { %v3681_v38 = vpack.c.bf16 %v3329_v62, %v3327_v49  ;;  %v2076_v2 = vadd.f32 %v2075_v39, %v5344_v5  ;;  %v2077_v57 = vpop.f32.mrb[218].mxu0  ;;  %6848 = vst [vmem:[#allocation53_spill] sm:$0xff] %v6225_v0  ;;  %6849 = vst [vmem:[#allocation54_spill] sm:$0xff] %v6227_v54  ;;  %v2599_v62 = vpop.f32.mrb[91].mxu1  ;;  %v3086_v49 = vmax.f32 %v2594_v61, 0.0 }
 0x2bd   : > { %v2878_v20 = vmax.f32 %v2074_v43, 0.0  ;;  %v2078_v50 = vadd.f32 %v2077_v57, %v5342_v4  ;;  %v2079_v24 = vpop.f32.mrb[219].mxu0  ;;  %v2596_v43 = vadd.f32 %v2595_v36, %v5344_v5 }
 0x2be   : > { %v2879_v7 = vmax.f32 %v2076_v2, 0.0  ;;  %v2080_v40 = vadd.f32 %v2079_v24, %v5344_v5  ;;  %3989 = vmatprep.subr.bf16.mxu1 %v3681_v38  ;;  %v2598_v38 = vadd.f32 %v2597_v60, %v5342_v4  ;;  %v2600_v2 = vadd.f32 %v2599_v62, %v5344_v5 }
 0x2bf   : > { %v2880_v26 = vmax.f32 %v2078_v50, 0.0  ;;  %4653 = vmatmul.mubr.msk.bf16.gmra.mrb[68].mxu0 %vm1159_vm0, %v4924_v48  ;;  %3990 = vmatpush1.bf16.msra.mxu1 %v3680_v33  ;;  %v3330_v57 = vmin.f32 %v2878_v20, 6.0  ;;  %v3087_v1 = vmax.f32 %v2596_v43, 0.0  ;;  %v6245_v60 = vmin.f32 %v3086_v49, 6.0  ;;  %v2603_v20 = vpop.f32.mrb[92].mxu1 }
 0x2c0   : > { %v2881_v39 = vmax.f32 %v2080_v40, 0.0  ;;  %2351 = vmatprep.mubr.bf16.mxu0 %v6806_v23  ;;  %v3331_v44 = vmin.f32 %v2879_v7, 6.0  ;;  %v3088_v48 = vmax.f32 %v2598_v38, 0.0  ;;  %v3089_v33 = vmax.f32 %v2600_v2, 0.0  ;;  %v4925_v40 = vld [vmem:[%s6710_s0 + $0x290] sm:$0xff]   ;;  %v2605_v38 = vpop.f32.mrb[93].mxu1 }
 0x2c1   : > { %v3332_v24 = vmin.f32 %v2880_v26, 6.0  ;;  %6850 = vst [vmem:[#allocation55_spill] sm:$0xff] %v6245_v60  ;;  %v6247_v62 = vmin.f32 %v3087_v1, 6.0 }
 0x2c2   : > { %v3333_v50 = vmin.f32 %v2881_v39, 6.0  ;;  %v2083_v0 = vpop.f32.mrb[220].mxu0  ;;  %v6250_v43 = vmin.f32 %v3088_v48, 6.0  ;;  %v6252_v39 = vmin.f32 %v3089_v33, 6.0  ;;  %v2604_v33 = vadd.f32 %v2603_v20, %v5342_v4 }
 0x2c3   : > { %v3682_v10 = vpack.c.bf16 %v3332_v24, %v3330_v57  ;;  %v2084_v37 = vadd.f32 %v2083_v0, %v5342_v4  ;;  %v2085_v36 = vpop.f32.mrb[221].mxu0  ;;  %6851 = vst [vmem:[#allocation56_spill] sm:$0xff] %v6247_v62  ;;  %v2607_v24 = vpop.f32.mrb[94].mxu1 }
 0x2c4   : > { %v3683_v26 = vpack.c.bf16 %v3333_v50, %v3331_v44  ;;  %v2086_v7 = vadd.f32 %v2085_v36, %v5344_v5  ;;  %v2087_v61 = vpop.f32.mrb[222].mxu0  ;;  %6852 = vst [vmem:[#allocation57_spill] sm:$0xff] %v6250_v43  ;;  %6853 = vst [vmem:[#allocation58_spill] sm:$0xff] %v6252_v39  ;;  %v2609_v50 = vpop.f32.mrb[95].mxu1  ;;  %v3090_v44 = vmax.f32 %v2604_v33, 0.0 }
 0x2c5   : > { %v2882_v0 = vmax.f32 %v2084_v37, 0.0  ;;  %v2088_v2 = vadd.f32 %v2087_v61, %v5342_v4  ;;  %v2089_v57 = vpop.f32.mrb[223].mxu0  ;;  %v2606_v37 = vadd.f32 %v2605_v38, %v5344_v5 }
 0x2c6   : > { %v2883_v54 = vmax.f32 %v2086_v7, 0.0  ;;  %v2090_v49 = vadd.f32 %v2089_v57, %v5344_v5  ;;  %3991 = vmatprep.subr.bf16.mxu1 %v3683_v26  ;;  %v2608_v26 = vadd.f32 %v2607_v24, %v5342_v4  ;;  %v2610_v7 = vadd.f32 %v2609_v50, %v5344_v5 }
 0x2c7   : > { %v2884_v48 = vmax.f32 %v2088_v2, 0.0  ;;  %4654 = vmatmul.mubr.msk.bf16.gmra.mrb[72].mxu0 %vm1159_vm0, %v4925_v40  ;;  %3992 = vmatpush1.bf16.msra.mxu1 %v3682_v10  ;;  %v3334_v61 = vmin.f32 %v2882_v0, 6.0  ;;  %v3091_v1 = vmax.f32 %v2606_v37, 0.0  ;;  %v6270_v24 = vmin.f32 %v3090_v44, 6.0  ;;  %v2613_v0 = vpop.f32.mrb[96].mxu1 }
 0x2c8   : > { %v2885_v36 = vmax.f32 %v2090_v49, 0.0  ;;  %2361 = vmatprep.mubr.bf16.mxu0 %v6806_v23  ;;  %v3335_v60 = vmin.f32 %v2883_v54, 6.0  ;;  %v3092_v40 = vmax.f32 %v2608_v26, 0.0  ;;  %v3093_v10 = vmax.f32 %v2610_v7, 0.0  ;;  %v4926_v49 = vld [vmem:[%s6710_s0 + $0x298] sm:$0xff]   ;;  %v2615_v26 = vpop.f32.mrb[97].mxu1 }
 0x2c9   : > { %v3336_v57 = vmin.f32 %v2884_v48, 6.0  ;;  %6854 = vst [vmem:[#allocation59_spill] sm:$0xff] %v6270_v24  ;;  %v6272_v50 = vmin.f32 %v3091_v1, 6.0 }
 0x2ca   : > { %v3337_v2 = vmin.f32 %v2885_v36, 6.0  ;;  %v2093_v43 = vpop.f32.mrb[224].mxu0  ;;  %v6275_v37 = vmin.f32 %v3092_v40, 6.0  ;;  %v6277_v36 = vmin.f32 %v3093_v10, 6.0  ;;  %v2614_v10 = vadd.f32 %v2613_v0, %v5342_v4 }
 0x2cb   : > { %v3684_v62 = vpack.c.bf16 %v3336_v57, %v3334_v61  ;;  %v2094_v20 = vadd.f32 %v2093_v43, %v5342_v4  ;;  %v2095_v38 = vpop.f32.mrb[225].mxu0  ;;  %6855 = vst [vmem:[#allocation60_spill] sm:$0xff] %v6272_v50  ;;  %v2617_v57 = vpop.f32.mrb[98].mxu1 }
 0x2cc   : > { %v3685_v48 = vpack.c.bf16 %v3337_v2, %v3335_v60  ;;  %v2096_v54 = vadd.f32 %v2095_v38, %v5344_v5  ;;  %v2097_v33 = vpop.f32.mrb[226].mxu0  ;;  %6856 = vst [vmem:[#allocation61_spill] sm:$0xff] %v6275_v37  ;;  %6857 = vst [vmem:[#allocation62_spill] sm:$0xff] %v6277_v36  ;;  %v2619_v2 = vpop.f32.mrb[99].mxu1  ;;  %v3094_v60 = vmax.f32 %v2614_v10, 0.0 }
 0x2cd   : > { %v2886_v43 = vmax.f32 %v2094_v20, 0.0  ;;  %v2098_v7 = vadd.f32 %v2097_v33, %v5342_v4  ;;  %v2099_v61 = vpop.f32.mrb[227].mxu0  ;;  %v2616_v20 = vadd.f32 %v2615_v26, %v5344_v5 }
 0x2ce   : > { %v2887_v23 = vmax.f32 %v2096_v54, 0.0  ;;  %v2100_v44 = vadd.f32 %v2099_v61, %v5344_v5  ;;  %3993 = vmatprep.subr.bf16.mxu1 %v3685_v48  ;;  %v2618_v54 = vadd.f32 %v2617_v57, %v5342_v4  ;;  %v2620_v48 = vadd.f32 %v2619_v2, %v5344_v5  ;;  %v2623_v57 = vpop.f32.mrb[100].mxu1 }
 0x2cf   : > { %v2888_v40 = vmax.f32 %v2098_v7, 0.0  ;;  %4655 = vmatmul.mubr.msk.bf16.gmra.mrb[76].mxu0 %vm1159_vm0, %v4926_v49  ;;  %3994 = vmatpush1.bf16.msra.mxu1 %v3684_v62  ;;  %v3338_v33 = vmin.f32 %v2886_v43, 6.0  ;;  %v3095_v24 = vmax.f32 %v2616_v20, 0.0  ;;  %v6291_v39 = vmin.f32 %v3094_v60, 6.0  ;;  %v2625_v10 = vpop.f32.mrb[101].mxu1 }
 0x2d0   : > { %v2889_v38 = vmax.f32 %v2100_v44, 0.0  ;;  %v3339_v37 = vmin.f32 %v2887_v23, 6.0  ;;  %v3096_v7 = vmax.f32 %v2618_v54, 0.0  ;;  %v3097_v36 = vmax.f32 %v2620_v48, 0.0 }
 0x2d1   : > { %v3340_v61 = vmin.f32 %v2888_v40, 6.0  ;;  %6858 = vst [vmem:[#allocation63_spill] sm:$0xff] %v6291_v39  ;;  %v6293_v26 = vmin.f32 %v3095_v24, 6.0 }
 0x2d2   : > { %v3341_v1 = vmin.f32 %v2889_v38, 6.0  ;;  %v2103_v50 = vpop.f32.mrb[228].mxu0  ;;  %v6296_v40 = vmin.f32 %v3096_v7, 6.0  ;;  %v6298_v23 = vmin.f32 %v3097_v36, 6.0  ;;  %v2624_v36 = vadd.f32 %v2623_v57, %v5342_v4 }
 0x2d3   : > { %v3686_v49 = vpack.c.bf16 %v3340_v61, %v3338_v33  ;;  %v2104_v62 = vadd.f32 %v2103_v50, %v5342_v4  ;;  %v2105_v0 = vpop.f32.mrb[229].mxu0  ;;  %6859 = vst [vmem:[#allocation64_spill] sm:$0xff] %v6293_v26  ;;  %v2627_v50 = vpop.f32.mrb[102].mxu1  ;;  %v2626_v61 = vadd.f32 %v2625_v10, %v5344_v5 }
 0x2d4   : > { %v3687_v44 = vpack.c.bf16 %v3341_v1, %v3339_v37  ;;  %v2106_v43 = vadd.f32 %v2105_v0, %v5344_v5  ;;  %v2107_v2 = vpop.f32.mrb[230].mxu0  ;;  %6860 = vst [vmem:[#allocation65_spill] sm:$0xff] %v6296_v40  ;;  %6861 = vst [vmem:[#allocation66_spill] sm:$0xff] %v6298_v23  ;;  %v2629_v1 = vpop.f32.mrb[103].mxu1 }
 0x2d5   : > { %v2890_v20 = vmax.f32 %v2104_v62, 0.0  ;;  %v2108_v38 = vadd.f32 %v2107_v2, %v5342_v4  ;;  %v2109_v54 = vpop.f32.mrb[231].mxu0  ;;  %v2628_v62 = vadd.f32 %v2627_v50, %v5342_v4  ;;  %v2630_v0 = vadd.f32 %v2629_v1, %v5344_v5  ;;  %v2633_v50 = vpop.f32.mrb[104].mxu1 }
 0x2d6   : > { %v2891_v48 = vmax.f32 %v2106_v43, 0.0  ;;  %v2110_v60 = vadd.f32 %v2109_v54, %v5344_v5  ;;  %3995 = vmatprep.subr.bf16.mxu1 %v3687_v44  ;;  %v3098_v2 = vmax.f32 %v2624_v36, 0.0  ;;  %v3099_v54 = vmax.f32 %v2626_v61, 0.0  ;;  %v2635_v36 = vpop.f32.mrb[105].mxu1 }
 0x2d7   : > { %v2892_v33 = vmax.f32 %v2108_v38, 0.0  ;;  %3996 = vmatpush1.bf16.msra.mxu1 %v3686_v49  ;;  %v3342_v43 = vmin.f32 %v2890_v20, 6.0  ;;  %v3100_v37 = vmax.f32 %v2628_v62, 0.0  ;;  %v3101_v26 = vmax.f32 %v2630_v0, 0.0 }
 0x2d8   : > { %v2893_v7 = vmax.f32 %v2110_v60, 0.0  ;;  %v3343_v24 = vmin.f32 %v2891_v48, 6.0  ;;  %v6311_v23 = vmin.f32 %v3098_v2, 6.0  ;;  %v6313_v10 = vmin.f32 %v3099_v54, 6.0 }
 0x2d9   : > { %v3344_v44 = vmin.f32 %v2892_v33, 6.0  ;;  %v6316_v33 = vmin.f32 %v3100_v37, 6.0  ;;  %v6318_v48 = vmin.f32 %v3101_v26, 6.0  ;;  %v2634_v26 = vadd.f32 %v2633_v50, %v5342_v4 }
 0x2da   : > { %v3345_v39 = vmin.f32 %v2893_v7, 6.0  ;;  %v2113_v40 = vpop.f32.mrb[232].mxu0  ;;  %6862 = vst [vmem:[#allocation67_spill] sm:$0xff] %v6311_v23  ;;  %6863 = vst [vmem:[#allocation68_spill] sm:$0xff] %v6313_v10  ;;  %v2636_v2 = vadd.f32 %v2635_v36, %v5344_v5 }
 0x2db   : > { %v3688_v38 = vpack.c.bf16 %v3344_v44, %v3342_v43  ;;  %v2114_v49 = vadd.f32 %v2113_v40, %v5342_v4  ;;  %v2115_v57 = vpop.f32.mrb[233].mxu0  ;;  %6864 = vst [vmem:[#allocation69_spill] sm:$0xff] %v6316_v33  ;;  %6865 = vst [vmem:[#allocation70_spill] sm:$0xff] %v6318_v48  ;;  %v2637_v40 = vpop.f32.mrb[106].mxu1 }
 0x2dc   : > { %v3689_v60 = vpack.c.bf16 %v3345_v39, %v3343_v24  ;;  %v2116_v20 = vadd.f32 %v2115_v57, %v5344_v5  ;;  %v2117_v1 = vpop.f32.mrb[234].mxu0  ;;  %v2639_v37 = vpop.f32.mrb[107].mxu1 }
 0x2dd   : > { %v2894_v61 = vmax.f32 %v2114_v49, 0.0  ;;  %v2118_v7 = vadd.f32 %v2117_v1, %v5342_v4  ;;  %v2119_v62 = vpop.f32.mrb[235].mxu0  ;;  %v2638_v49 = vadd.f32 %v2637_v40, %v5342_v4  ;;  %v2640_v57 = vadd.f32 %v2639_v37, %v5344_v5  ;;  %v2643_v40 = vpop.f32.mrb[108].mxu1 }
 0x2de   : > { %v2895_v0 = vmax.f32 %v2116_v20, 0.0  ;;  %v2120_v43 = vadd.f32 %v2119_v62, %v5344_v5  ;;  %3997 = vmatprep.subr.bf16.mxu1 %v3689_v60  ;;  %v3102_v1 = vmax.f32 %v2634_v26, 0.0  ;;  %v3103_v62 = vmax.f32 %v2636_v2, 0.0  ;;  %v2645_v26 = vpop.f32.mrb[109].mxu1 }
 0x2df   : > { %v2896_v44 = vmax.f32 %v2118_v7, 0.0  ;;  %3998 = vmatpush1.bf16.msra.mxu1 %v3688_v38  ;;  %v3346_v20 = vmin.f32 %v2894_v61, 6.0  ;;  %v3104_v24 = vmax.f32 %v2638_v49, 0.0  ;;  %v3105_v10 = vmax.f32 %v2640_v57, 0.0 }
 0x2e0   : > { %v2897_v54 = vmax.f32 %v2120_v43, 0.0  ;;  %v3347_v39 = vmin.f32 %v2895_v0, 6.0  ;;  %v6331_v48 = vmin.f32 %v3102_v1, 6.0  ;;  %v6333_v36 = vmin.f32 %v3103_v62, 6.0 }
 0x2e1   : > { %v3348_v60 = vmin.f32 %v2896_v44, 6.0  ;;  %v6336_v44 = vmin.f32 %v3104_v24, 6.0  ;;  %v6338_v0 = vmin.f32 %v3105_v10, 6.0  ;;  %v2644_v10 = vadd.f32 %v2643_v40, %v5342_v4 }
 0x2e2   : > { %v3349_v23 = vmin.f32 %v2897_v54, 6.0  ;;  %v2123_v33 = vpop.f32.mrb[236].mxu0  ;;  %6866 = vst [vmem:[#allocation71_spill] sm:$0xff] %v6331_v48  ;;  %6867 = vst [vmem:[#allocation72_spill] sm:$0xff] %v6333_v36  ;;  %v2646_v1 = vadd.f32 %v2645_v26, %v5344_v5 }
 0x2e3   : > { %v3690_v7 = vpack.c.bf16 %v3348_v60, %v3346_v20  ;;  %v2124_v38 = vadd.f32 %v2123_v33, %v5342_v4  ;;  %v2125_v50 = vpop.f32.mrb[237].mxu0  ;;  %6868 = vst [vmem:[#allocation73_spill] sm:$0xff] %v6336_v44  ;;  %6869 = vst [vmem:[#allocation74_spill] sm:$0xff] %v6338_v0  ;;  %v2647_v33 = vpop.f32.mrb[110].mxu1 }
 0x2e4   : > { %v3691_v43 = vpack.c.bf16 %v3349_v23, %v3347_v39  ;;  %v2126_v61 = vadd.f32 %v2125_v50, %v5344_v5  ;;  %v2127_v37 = vpop.f32.mrb[238].mxu0  ;;  %v2649_v24 = vpop.f32.mrb[111].mxu1 }
 0x2e5   : > { %v2898_v2 = vmax.f32 %v2124_v38, 0.0  ;;  %v2128_v54 = vadd.f32 %v2127_v37, %v5342_v4  ;;  %v2129_v49 = vpop.f32.mrb[239].mxu0  ;;  %v2648_v38 = vadd.f32 %v2647_v33, %v5342_v4  ;;  %v2650_v50 = vadd.f32 %v2649_v24, %v5344_v5  ;;  %v2653_v33 = vpop.f32.mrb[112].mxu1 }
 0x2e6   : > { %v2899_v57 = vmax.f32 %v2126_v61, 0.0  ;;  %v2130_v20 = vadd.f32 %v2129_v49, %v5344_v5  ;;  %3999 = vmatprep.subr.bf16.mxu1 %v3691_v43  ;;  %v3106_v37 = vmax.f32 %v2644_v10, 0.0  ;;  %v3107_v49 = vmax.f32 %v2646_v1, 0.0  ;;  %v2655_v10 = vpop.f32.mrb[113].mxu1 }
 0x2e7   : > { %v2900_v60 = vmax.f32 %v2128_v54, 0.0  ;;  %4000 = vmatpush1.bf16.msra.mxu1 %v3690_v7  ;;  %v3350_v61 = vmin.f32 %v2898_v2, 6.0  ;;  %v3108_v39 = vmax.f32 %v2648_v38, 0.0  ;;  %v3109_v36 = vmax.f32 %v2650_v50, 0.0 }
 0x2e8   : > { %v2901_v62 = vmax.f32 %v2130_v20, 0.0  ;;  %v3351_v23 = vmin.f32 %v2899_v57, 6.0  ;;  %v6351_v0 = vmin.f32 %v3106_v37, 6.0  ;;  %v6353_v26 = vmin.f32 %v3107_v49, 6.0 }
 0x2e9   : > { %v3352_v43 = vmin.f32 %v2900_v60, 6.0  ;;  %v6356_v60 = vmin.f32 %v3108_v39, 6.0  ;;  %v6358_v57 = vmin.f32 %v3109_v36, 6.0  ;;  %v2654_v36 = vadd.f32 %v2653_v33, %v5342_v4 }
 0x2ea   : > { %v3353_v48 = vmin.f32 %v2901_v62, 6.0  ;;  %v2133_v44 = vpop.f32.mrb[240].mxu0  ;;  %6870 = vst [vmem:[#allocation75_spill] sm:$0xff] %v6351_v0  ;;  %6871 = vst [vmem:[#allocation76_spill] sm:$0xff] %v6353_v26  ;;  %v2656_v37 = vadd.f32 %v2655_v10, %v5344_v5 }
 0x2eb   : > { %v3692_v54 = vpack.c.bf16 %v3352_v43, %v3350_v61  ;;  %v2134_v7 = vadd.f32 %v2133_v44, %v5342_v4  ;;  %v2135_v40 = vpop.f32.mrb[241].mxu0  ;;  %6872 = vst [vmem:[#allocation77_spill] sm:$0xff] %v6356_v60  ;;  %6873 = vst [vmem:[#allocation78_spill] sm:$0xff] %v6358_v57  ;;  %v2657_v44 = vpop.f32.mrb[114].mxu1 }
 0x2ec   : > { %v3693_v20 = vpack.c.bf16 %v3353_v48, %v3351_v23  ;;  %v2136_v2 = vadd.f32 %v2135_v40, %v5344_v5  ;;  %v2137_v24 = vpop.f32.mrb[242].mxu0  ;;  %v2659_v39 = vpop.f32.mrb[115].mxu1 }
 0x2ed   : > { %v2902_v1 = vmax.f32 %v2134_v7, 0.0  ;;  %v2138_v62 = vadd.f32 %v2137_v24, %v5342_v4  ;;  %v2139_v38 = vpop.f32.mrb[243].mxu0  ;;  %v2658_v7 = vadd.f32 %v2657_v44, %v5342_v4  ;;  %v2660_v40 = vadd.f32 %v2659_v39, %v5344_v5 }
 0x2ee   : > { %v2903_v50 = vmax.f32 %v2136_v2, 0.0  ;;  %v2140_v61 = vadd.f32 %v2139_v38, %v5344_v5  ;;  %4001 = vmatprep.subr.bf16.mxu1 %v3693_v20  ;;  %v3110_v24 = vmax.f32 %v2654_v36, 0.0  ;;  %v3111_v38 = vmax.f32 %v2656_v37, 0.0 }
 0x2ef   : > { %v2904_v43 = vmax.f32 %v2138_v62, 0.0  ;;  %4002 = vmatpush1.bf16.msra.mxu1 %v3692_v54  ;;  %v3354_v2 = vmin.f32 %v2902_v1, 6.0  ;;  %v3112_v23 = vmax.f32 %v2658_v7, 0.0  ;;  %v3113_v26 = vmax.f32 %v2660_v40, 0.0 }
 0x2f0   : > { %v2905_v49 = vmax.f32 %v2140_v61, 0.0  ;;  %v3355_v48 = vmin.f32 %v2903_v50, 6.0  ;;  %v6371_v57 = vmin.f32 %v3110_v24, 6.0  ;;  %v6373_v10 = vmin.f32 %v3111_v38, 6.0 }
 0x2f1   : > { %v3356_v20 = vmin.f32 %v2904_v43, 6.0  ;;  %v6376_v39 = vmin.f32 %v3112_v23, 6.0  ;;  %v6378_v43 = vmin.f32 %v3113_v26, 6.0 }
 0x2f2   : > { %v3357_v0 = vmin.f32 %v2905_v49, 6.0  ;;  %v2143_v60 = vpop.f32.mrb[244].mxu0  ;;  %6874 = vst [vmem:[#allocation79_spill] sm:$0xff] %v6371_v57 }
 0x2f3   : > { %v3694_v62 = vpack.c.bf16 %v3356_v20, %v3354_v2  ;;  %v2144_v54 = vadd.f32 %v2143_v60, %v5342_v4  ;;  %v2145_v33 = vpop.f32.mrb[245].mxu0  ;;  %6875 = vst [vmem:[#allocation80_spill] sm:$0xff] %v6376_v39 }
 0x2f4   : > { %v3695_v44 = vpack.c.bf16 %v3357_v0, %v3355_v48  ;;  %v2146_v61 = vadd.f32 %v2145_v33, %v5344_v5  ;;  %v2147_v1 = vpop.f32.mrb[246].mxu0 }
 0x2f5   : > { %v2906_v50 = vmax.f32 %v2144_v54, 0.0  ;;  %v2148_v36 = vadd.f32 %v2147_v1, %v5342_v4  ;;  %v2149_v37 = vpop.f32.mrb[247].mxu0 }
 0x2f6   : > { %v2907_v49 = vmax.f32 %v2146_v61, 0.0  ;;  %v2150_v60 = vadd.f32 %v2149_v37, %v5344_v5  ;;  %4003 = vmatprep.subr.bf16.mxu1 %v3695_v44 }
 0x2f7   : > { %v2908_v48 = vmax.f32 %v2148_v36, 0.0  ;;  %4004 = vmatpush1.bf16.msra.mxu1 %v3694_v62  ;;  %v3358_v40 = vmin.f32 %v2906_v50, 6.0 }
 0x2f8   : > { %v2909_v23 = vmax.f32 %v2150_v60, 0.0  ;;  %v3359_v2 = vmin.f32 %v2907_v49, 6.0 }
 0x2f9   : > { %v3360_v26 = vmin.f32 %v2908_v48, 6.0 }
 0x2fa   : > { %v3361_v20 = vmin.f32 %v2909_v23, 6.0  ;;  %v2153_v24 = vpop.f32.mrb[248].mxu0 }
 0x2fb   : > { %v3696_v38 = vpack.c.bf16 %v3360_v26, %v3358_v40  ;;  %v2154_v54 = vadd.f32 %v2153_v24, %v5342_v4  ;;  %v2155_v33 = vpop.f32.mrb[249].mxu0 }
 0x2fc   : > { %v3697_v61 = vpack.c.bf16 %v3361_v20, %v3359_v2  ;;  %v2156_v44 = vadd.f32 %v2155_v33, %v5344_v5  ;;  %v2157_v1 = vpop.f32.mrb[250].mxu0 }
 0x2fd   : > { %v2910_v37 = vmax.f32 %v2154_v54, 0.0  ;;  %v2158_v7 = vadd.f32 %v2157_v1, %v5342_v4  ;;  %v2159_v0 = vpop.f32.mrb[251].mxu0 }
 0x2fe   : > { %v2911_v36 = vmax.f32 %v2156_v44, 0.0  ;;  %v2160_v62 = vadd.f32 %v2159_v0, %v5344_v5  ;;  %4005 = vmatprep.subr.bf16.mxu1 %v3697_v61 }
 0x2ff   : > { %v2912_v50 = vmax.f32 %v2158_v7, 0.0  ;;  %4006 = vmatpush1.bf16.msra.mxu1 %v3696_v38  ;;  %v3362_v60 = vmin.f32 %v2910_v37, 6.0 }
 0x300   : > { %v2913_v49 = vmax.f32 %v2160_v62, 0.0  ;;  %v3363_v23 = vmin.f32 %v2911_v36, 6.0 }
 0x301   : > { %v3364_v48 = vmin.f32 %v2912_v50, 6.0 }
 0x302   : > { %v3365_v40 = vmin.f32 %v2913_v49, 6.0  ;;  %v2163_v26 = vpop.f32.mrb[252].mxu0 }
 0x303   : > { %v3698_v2 = vpack.c.bf16 %v3364_v48, %v3362_v60  ;;  %v2164_v20 = vadd.f32 %v2163_v26, %v5342_v4  ;;  %v2165_v24 = vpop.f32.mrb[253].mxu0 }
 0x304   : > { %v3699_v54 = vpack.c.bf16 %v3365_v40, %v3363_v23  ;;  %v2166_v33 = vadd.f32 %v2165_v24, %v5344_v5  ;;  %v2167_v1 = vpop.f32.mrb[254].mxu0 }
 0x305   : > { %v2914_v44 = vmax.f32 %v2164_v20, 0.0  ;;  %v2168_v0 = vadd.f32 %v2167_v1, %v5342_v4  ;;  %v2169_v61 = vpop.f32.mrb[255].mxu0 }
 0x306   : > { %v2915_v7 = vmax.f32 %v2166_v33, 0.0  ;;  %v2170_v38 = vadd.f32 %v2169_v61, %v5344_v5  ;;  %4007 = vmatprep.subr.bf16.mxu1 %v3699_v54 }
 0x307   : > { %v2916_v37 = vmax.f32 %v2168_v0, 0.0  ;;  %4008 = vmatpush1.bf16.msra.mxu1 %v3698_v2  ;;  %v3366_v62 = vmin.f32 %v2914_v44, 6.0  ;;  %v4953_v44 = vld [vmem:[%s6713_s3 + $0x18] sm:$0xff] }
 0x308   : > { %v2917_v36 = vmax.f32 %v2170_v38, 0.0  ;;  %v3367_v49 = vmin.f32 %v2915_v7, 6.0  ;;  %v4691_v7 = vcombine.low %v4953_v44, %v4953_v44 }
 0x309   : > { %v3368_v50 = vmin.f32 %v2916_v37, 6.0 }
 0x30a   : > { %v3369_v60 = vmin.f32 %v2917_v36, 6.0  ;;  %v2173_v48 = vpop.f32.mrb[0].mxu0 }
 0x30b   : > { %v3700_v23 = vpack.c.bf16 %v3368_v50, %v3366_v62  ;;  %v2174_v40 = vadd.f32 %v2173_v48, %v5342_v4  ;;  %v2175_v26 = vpop.f32.mrb[1].mxu0 }
 0x30c   : > { %v3701_v20 = vpack.c.bf16 %v3369_v60, %v3367_v49  ;;  %v2176_v24 = vadd.f32 %v2175_v26, %v5344_v5  ;;  %v2177_v1 = vpop.f32.mrb[2].mxu0 }
 0x30d   : > { %v2918_v33 = vmax.f32 %v2174_v40, 0.0  ;;  %v2178_v61 = vadd.f32 %v2177_v1, %v5342_v4  ;;  %v2179_v54 = vpop.f32.mrb[3].mxu0 }
 0x30e   : > { %v2919_v0 = vmax.f32 %v2176_v24, 0.0  ;;  %v2180_v2 = vadd.f32 %v2179_v54, %v5344_v5  ;;  %4009 = vmatprep.subr.bf16.mxu1 %v3701_v20  ;;  %v6405_v20 = vld [vmem:[%s6713_s3 + $0x20] sm:$0xff] }
 0x30f   : > { %v2920_v38 = vmax.f32 %v2178_v61, 0.0  ;;  %4010 = vmatpush1.bf16.msra.mxu1 %v3700_v23  ;;  %v3370_v36 = vmin.f32 %v2918_v33, 6.0  ;;  %v4694_v33 = vcombine.high %v6405_v20, %v6405_v20 }
 0x310   : > { %v2921_v37 = vmax.f32 %v2180_v2, 0.0  ;;  %v3371_v50 = vmin.f32 %v2919_v0, 6.0 }
 0x311   : > { %v3372_v62 = vmin.f32 %v2920_v38, 6.0 }
 0x312   : > { %v3373_v49 = vmin.f32 %v2921_v37, 6.0  ;;  %v2183_v60 = vpop.f32.mrb[4].mxu0  ;;  %4012 = vmatmul.mubr.bf16.vlgmr.msra.gmra.mrb[116].mxu1 %v4691_v7 }
 0x313   : > { %v3702_v48 = vpack.c.bf16 %v3372_v62, %v3370_v36  ;;  %v2184_v40 = vadd.f32 %v2183_v60, %v5342_v4  ;;  %v2185_v26 = vpop.f32.mrb[5].mxu0  ;;  %4052 = vmatprep.mubr.bf16.mxu1 %v4694_v33 }
 0x314   : > { %v3703_v24 = vpack.c.bf16 %v3373_v49, %v3371_v50  ;;  %v2186_v1 = vadd.f32 %v2185_v26, %v5344_v5  ;;  %v2187_v23 = vpop.f32.mrb[6].mxu0 }
 0x315   : > { %v2922_v61 = vmax.f32 %v2184_v40, 0.0  ;;  %v2188_v54 = vadd.f32 %v2187_v23, %v5342_v4  ;;  %v2189_v0 = vpop.f32.mrb[7].mxu0 }
 0x316   : > { %v2923_v2 = vmax.f32 %v2186_v1, 0.0  ;;  %v2190_v44 = vadd.f32 %v2189_v0, %v5344_v5  ;;  %4020 = vmatprep.subr.bf16.mxu1 %v3703_v24 }
 0x317   : > { %v2924_v7 = vmax.f32 %v2188_v54, 0.0  ;;  %4021 = vmatpush1.bf16.msra.mxu1 %v3702_v48  ;;  %v3374_v37 = vmin.f32 %v2922_v61, 6.0 }
 0x318   : > { %v2925_v38 = vmax.f32 %v2190_v44, 0.0  ;;  %v3375_v62 = vmin.f32 %v2923_v2, 6.0 }
 0x319   : > { %v3376_v36 = vmin.f32 %v2924_v7, 6.0 }
 0x31a   : > { %v3377_v50 = vmin.f32 %v2925_v38, 6.0  ;;  %v2193_v49 = vpop.f32.mrb[8].mxu0 }
 0x31b   : > { %v3704_v60 = vpack.c.bf16 %v3376_v36, %v3374_v37  ;;  %v2194_v26 = vadd.f32 %v2193_v49, %v5342_v4  ;;  %v2195_v40 = vpop.f32.mrb[9].mxu0 }
 0x31c   : > { %v3705_v57 = vpack.c.bf16 %v3377_v50, %v3375_v62  ;;  %v2196_v23 = vadd.f32 %v2195_v40, %v5344_v5  ;;  %v2197_v1 = vpop.f32.mrb[10].mxu0 }
 0x31d   : > { %v2926_v39 = vmax.f32 %v2194_v26, 0.0  ;;  %v2198_v24 = vadd.f32 %v2197_v1, %v5342_v4  ;;  %v2199_v33 = vpop.f32.mrb[11].mxu0 }
 0x31e   : > { %v2927_v54 = vmax.f32 %v2196_v23, 0.0  ;;  %v2200_v48 = vadd.f32 %v2199_v33, %v5344_v5  ;;  %4022 = vmatprep.subr.bf16.mxu1 %v3705_v57 }
 0x31f   : > { %v2928_v61 = vmax.f32 %v2198_v24, 0.0  ;;  %4023 = vmatpush1.bf16.msra.mxu1 %v3704_v60  ;;  %v3378_v2 = vmin.f32 %v2926_v39, 6.0 }
 0x320   : > { %v2929_v0 = vmax.f32 %v2200_v48, 0.0  ;;  %v3379_v7 = vmin.f32 %v2927_v54, 6.0 }
 0x321   : > { %v3380_v44 = vmin.f32 %v2928_v61, 6.0 }
 0x322   : > { %v3381_v38 = vmin.f32 %v2929_v0, 6.0  ;;  %v2203_v37 = vpop.f32.mrb[12].mxu0 }
 0x323   : > { %v3706_v36 = vpack.c.bf16 %v3380_v44, %v3378_v2  ;;  %v2204_v62 = vadd.f32 %v2203_v37, %v5342_v4  ;;  %v2205_v50 = vpop.f32.mrb[13].mxu0 }
 0x324   : > { %v3707_v49 = vpack.c.bf16 %v3381_v38, %v3379_v7  ;;  %v2206_v26 = vadd.f32 %v2205_v50, %v5344_v5  ;;  %v2207_v40 = vpop.f32.mrb[14].mxu0 }
 0x325   : > { %v2930_v23 = vmax.f32 %v2204_v62, 0.0  ;;  %v2208_v1 = vadd.f32 %v2207_v40, %v5342_v4  ;;  %v2209_v57 = vpop.f32.mrb[15].mxu0 }
 0x326   : > { %v2931_v24 = vmax.f32 %v2206_v26, 0.0  ;;  %v2210_v60 = vadd.f32 %v2209_v57, %v5344_v5  ;;  %4024 = vmatprep.subr.bf16.mxu1 %v3707_v49 }
 0x327   : > { %v2932_v39 = vmax.f32 %v2208_v1, 0.0  ;;  %4025 = vmatpush1.bf16.msra.mxu1 %v3706_v36  ;;  %v3382_v54 = vmin.f32 %v2930_v23, 6.0 }
 0x328   : > { %v2933_v33 = vmax.f32 %v2210_v60, 0.0  ;;  %v3383_v61 = vmin.f32 %v2931_v24, 6.0 }
 0x329   : > { %v3384_v48 = vmin.f32 %v2932_v39, 6.0 }
 0x32a   : > { %v3385_v0 = vmin.f32 %v2933_v33, 6.0  ;;  %v2213_v2 = vpop.f32.mrb[16].mxu0 }
 0x32b   : > { %v3708_v44 = vpack.c.bf16 %v3384_v48, %v3382_v54  ;;  %v2214_v7 = vadd.f32 %v2213_v2, %v5342_v4  ;;  %v2215_v38 = vpop.f32.mrb[17].mxu0 }
 0x32c   : > { %v3709_v37 = vpack.c.bf16 %v3385_v0, %v3383_v61  ;;  %v2216_v62 = vadd.f32 %v2215_v38, %v5344_v5  ;;  %v2217_v50 = vpop.f32.mrb[18].mxu0 }
 0x32d   : > { %v2934_v26 = vmax.f32 %v2214_v7, 0.0  ;;  %v2218_v40 = vadd.f32 %v2217_v50, %v5342_v4  ;;  %v2219_v49 = vpop.f32.mrb[19].mxu0 }
 0x32e   : > { %v2935_v1 = vmax.f32 %v2216_v62, 0.0  ;;  %v2220_v36 = vadd.f32 %v2219_v49, %v5344_v5  ;;  %4026 = vmatprep.subr.bf16.mxu1 %v3709_v37 }
 0x32f   : > { %v2936_v23 = vmax.f32 %v2218_v40, 0.0  ;;  %4027 = vmatpush1.bf16.msra.mxu1 %v3708_v44  ;;  %v3386_v24 = vmin.f32 %v2934_v26, 6.0 }
 0x330   : > { %v2937_v57 = vmax.f32 %v2220_v36, 0.0  ;;  %v3387_v39 = vmin.f32 %v2935_v1, 6.0 }
 0x331   : > { %v3388_v60 = vmin.f32 %v2936_v23, 6.0 }
 0x332   : > { %v3389_v33 = vmin.f32 %v2937_v57, 6.0  ;;  %v2223_v54 = vpop.f32.mrb[20].mxu0 }
 0x333   : > { %v3710_v48 = vpack.c.bf16 %v3388_v60, %v3386_v24  ;;  %v2224_v61 = vadd.f32 %v2223_v54, %v5342_v4  ;;  %v2225_v0 = vpop.f32.mrb[21].mxu0 }
 0x334   : > { %v3711_v2 = vpack.c.bf16 %v3389_v33, %v3387_v39  ;;  %v2226_v7 = vadd.f32 %v2225_v0, %v5344_v5  ;;  %v2227_v38 = vpop.f32.mrb[22].mxu0 }
 0x335   : > { %v2938_v62 = vmax.f32 %v2224_v61, 0.0  ;;  %v2228_v50 = vadd.f32 %v2227_v38, %v5342_v4  ;;  %v2229_v37 = vpop.f32.mrb[23].mxu0 }
 0x336   : > { %v2939_v40 = vmax.f32 %v2226_v7, 0.0  ;;  %v2230_v44 = vadd.f32 %v2229_v37, %v5344_v5  ;;  %4028 = vmatprep.subr.bf16.mxu1 %v3711_v2 }
 0x337   : > { %v2940_v26 = vmax.f32 %v2228_v50, 0.0  ;;  %4029 = vmatpush1.bf16.msra.mxu1 %v3710_v48  ;;  %v3390_v1 = vmin.f32 %v2938_v62, 6.0 }
 0x338   : > { %v2941_v49 = vmax.f32 %v2230_v44, 0.0  ;;  %v3391_v23 = vmin.f32 %v2939_v40, 6.0 }
 0x339   : > { %v3392_v36 = vmin.f32 %v2940_v26, 6.0 }
 0x33a   : > { %v3393_v57 = vmin.f32 %v2941_v49, 6.0  ;;  %v2233_v24 = vpop.f32.mrb[24].mxu0 }
 0x33b   : > { %v3712_v60 = vpack.c.bf16 %v3392_v36, %v3390_v1  ;;  %v2234_v39 = vadd.f32 %v2233_v24, %v5342_v4  ;;  %v2235_v33 = vpop.f32.mrb[25].mxu0 }
 0x33c   : > { %v3713_v54 = vpack.c.bf16 %v3393_v57, %v3391_v23  ;;  %v2236_v61 = vadd.f32 %v2235_v33, %v5344_v5  ;;  %v2237_v0 = vpop.f32.mrb[26].mxu0 }
 0x33d   : > { %v2942_v7 = vmax.f32 %v2234_v39, 0.0  ;;  %v2238_v38 = vadd.f32 %v2237_v0, %v5342_v4  ;;  %v2239_v2 = vpop.f32.mrb[27].mxu0 }
 0x33e   : > { %v2943_v50 = vmax.f32 %v2236_v61, 0.0  ;;  %v2240_v48 = vadd.f32 %v2239_v2, %v5344_v5  ;;  %4030 = vmatprep.subr.bf16.mxu1 %v3713_v54 }
 0x33f   : > { %v2944_v62 = vmax.f32 %v2238_v38, 0.0  ;;  %4031 = vmatpush1.bf16.msra.mxu1 %v3712_v60  ;;  %v3394_v40 = vmin.f32 %v2942_v7, 6.0 }
 0x340   : > { %v2945_v37 = vmax.f32 %v2240_v48, 0.0  ;;  %v3395_v26 = vmin.f32 %v2943_v50, 6.0 }
 0x341   : > { %v3396_v44 = vmin.f32 %v2944_v62, 6.0 }
 0x342   : > { %v3397_v49 = vmin.f32 %v2945_v37, 6.0  ;;  %v2243_v1 = vpop.f32.mrb[28].mxu0 }
 0x343   : > { %v3714_v36 = vpack.c.bf16 %v3396_v44, %v3394_v40  ;;  %v2244_v23 = vadd.f32 %v2243_v1, %v5342_v4  ;;  %v2245_v57 = vpop.f32.mrb[29].mxu0 }
 0x344   : > { %v3715_v24 = vpack.c.bf16 %v3397_v49, %v3395_v26  ;;  %v2246_v39 = vadd.f32 %v2245_v57, %v5344_v5  ;;  %v2247_v33 = vpop.f32.mrb[30].mxu0 }
 0x345   : > { %v2946_v61 = vmax.f32 %v2244_v23, 0.0  ;;  %v2248_v0 = vadd.f32 %v2247_v33, %v5342_v4  ;;  %v2249_v54 = vpop.f32.mrb[31].mxu0 }
 0x346   : > { %v2947_v38 = vmax.f32 %v2246_v39, 0.0  ;;  %v2250_v60 = vadd.f32 %v2249_v54, %v5344_v5  ;;  %4032 = vmatprep.subr.bf16.mxu1 %v3715_v24 }
 0x347   : > { %v2948_v7 = vmax.f32 %v2248_v0, 0.0  ;;  %4033 = vmatpush1.bf16.msra.mxu1 %v3714_v36  ;;  %v3398_v50 = vmin.f32 %v2946_v61, 6.0 }
 0x348   : > { %v2949_v2 = vmax.f32 %v2250_v60, 0.0  ;;  %v3399_v62 = vmin.f32 %v2947_v38, 6.0 }
 0x349   : > { %v3400_v48 = vmin.f32 %v2948_v7, 6.0 }
 0x34a   : > { %v3401_v37 = vmin.f32 %v2949_v2, 6.0  ;;  %v2253_v40 = vpop.f32.mrb[32].mxu0 }
 0x34b   : > { %v3716_v44 = vpack.c.bf16 %v3400_v48, %v3398_v50  ;;  %v2254_v26 = vadd.f32 %v2253_v40, %v5342_v4  ;;  %v2255_v49 = vpop.f32.mrb[33].mxu0 }
 0x34c   : > { %v3717_v1 = vpack.c.bf16 %v3401_v37, %v3399_v62  ;;  %v2256_v23 = vadd.f32 %v2255_v49, %v5344_v5  ;;  %v2257_v57 = vpop.f32.mrb[34].mxu0 }
 0x34d   : > { %v2950_v39 = vmax.f32 %v2254_v26, 0.0  ;;  %v2258_v33 = vadd.f32 %v2257_v57, %v5342_v4  ;;  %v2259_v24 = vpop.f32.mrb[35].mxu0 }
 0x34e   : > { %v2951_v0 = vmax.f32 %v2256_v23, 0.0  ;;  %v2260_v36 = vadd.f32 %v2259_v24, %v5344_v5  ;;  %4034 = vmatprep.subr.bf16.mxu1 %v3717_v1 }
 0x34f   : > { %v2952_v61 = vmax.f32 %v2258_v33, 0.0  ;;  %4035 = vmatpush1.bf16.msra.mxu1 %v3716_v44  ;;  %v3402_v38 = vmin.f32 %v2950_v39, 6.0 }
 0x350   : > { %v2953_v54 = vmax.f32 %v2260_v36, 0.0  ;;  %v3403_v7 = vmin.f32 %v2951_v0, 6.0 }
 0x351   : > { %v3404_v60 = vmin.f32 %v2952_v61, 6.0 }
 0x352   : > { %v3405_v2 = vmin.f32 %v2953_v54, 6.0  ;;  %v2263_v50 = vpop.f32.mrb[36].mxu0 }
 0x353   : > { %v3718_v48 = vpack.c.bf16 %v3404_v60, %v3402_v38  ;;  %v2264_v62 = vadd.f32 %v2263_v50, %v5342_v4  ;;  %v2265_v37 = vpop.f32.mrb[37].mxu0 }
 0x354   : > { %v3719_v40 = vpack.c.bf16 %v3405_v2, %v3403_v7  ;;  %v2266_v26 = vadd.f32 %v2265_v37, %v5344_v5  ;;  %v2267_v49 = vpop.f32.mrb[38].mxu0 }
 0x355   : > { %v2954_v23 = vmax.f32 %v2264_v62, 0.0  ;;  %v2268_v57 = vadd.f32 %v2267_v49, %v5342_v4  ;;  %v2269_v1 = vpop.f32.mrb[39].mxu0 }
 0x356   : > { %v2955_v33 = vmax.f32 %v2266_v26, 0.0  ;;  %v2270_v44 = vadd.f32 %v2269_v1, %v5344_v5  ;;  %4036 = vmatprep.subr.bf16.mxu1 %v3719_v40 }
 0x357   : > { %v2956_v39 = vmax.f32 %v2268_v57, 0.0  ;;  %4037 = vmatpush1.bf16.msra.mxu1 %v3718_v48  ;;  %v3406_v0 = vmin.f32 %v2954_v23, 6.0 }
 0x358   : > { %v2957_v24 = vmax.f32 %v2270_v44, 0.0  ;;  %v3407_v61 = vmin.f32 %v2955_v33, 6.0 }
 0x359   : > { %v3408_v36 = vmin.f32 %v2956_v39, 6.0 }
 0x35a   : > { %v3409_v54 = vmin.f32 %v2957_v24, 6.0  ;;  %v2273_v38 = vpop.f32.mrb[40].mxu0 }
 0x35b   : > { %v3720_v60 = vpack.c.bf16 %v3408_v36, %v3406_v0  ;;  %v2274_v7 = vadd.f32 %v2273_v38, %v5342_v4  ;;  %v2275_v2 = vpop.f32.mrb[41].mxu0 }
 0x35c   : > { %v3721_v50 = vpack.c.bf16 %v3409_v54, %v3407_v61  ;;  %v2276_v62 = vadd.f32 %v2275_v2, %v5344_v5  ;;  %v2277_v37 = vpop.f32.mrb[42].mxu0 }
 0x35d   : > { %v2958_v26 = vmax.f32 %v2274_v7, 0.0  ;;  %v2278_v49 = vadd.f32 %v2277_v37, %v5342_v4  ;;  %v2279_v40 = vpop.f32.mrb[43].mxu0 }
 0x35e   : > { %v2959_v57 = vmax.f32 %v2276_v62, 0.0  ;;  %v2280_v48 = vadd.f32 %v2279_v40, %v5344_v5  ;;  %4038 = vmatprep.subr.bf16.mxu1 %v3721_v50 }
 0x35f   : > { %v2960_v23 = vmax.f32 %v2278_v49, 0.0  ;;  %4039 = vmatpush1.bf16.msra.mxu1 %v3720_v60  ;;  %v3410_v33 = vmin.f32 %v2958_v26, 6.0 }
 0x360   : > { %v2961_v1 = vmax.f32 %v2280_v48, 0.0  ;;  %v3411_v39 = vmin.f32 %v2959_v57, 6.0 }
 0x361   : > { %v3412_v44 = vmin.f32 %v2960_v23, 6.0 }
 0x362   : > { %v3413_v24 = vmin.f32 %v2961_v1, 6.0  ;;  %v2283_v0 = vpop.f32.mrb[44].mxu0 }
 0x363   : > { %v3722_v36 = vpack.c.bf16 %v3412_v44, %v3410_v33  ;;  %v2284_v61 = vadd.f32 %v2283_v0, %v5342_v4  ;;  %v2285_v54 = vpop.f32.mrb[45].mxu0 }
 0x364   : > { %v3723_v38 = vpack.c.bf16 %v3413_v24, %v3411_v39  ;;  %v2286_v7 = vadd.f32 %v2285_v54, %v5344_v5  ;;  %v2287_v2 = vpop.f32.mrb[46].mxu0 }
 0x365   : > { %v2962_v62 = vmax.f32 %v2284_v61, 0.0  ;;  %v2288_v37 = vadd.f32 %v2287_v2, %v5342_v4  ;;  %v2289_v50 = vpop.f32.mrb[47].mxu0 }
 0x366   : > { %v2963_v49 = vmax.f32 %v2286_v7, 0.0  ;;  %v2290_v60 = vadd.f32 %v2289_v50, %v5344_v5  ;;  %4040 = vmatprep.subr.bf16.mxu1 %v3723_v38 }
 0x367   : > { %v2964_v26 = vmax.f32 %v2288_v37, 0.0  ;;  %4041 = vmatpush1.bf16.msra.mxu1 %v3722_v36  ;;  %v3414_v57 = vmin.f32 %v2962_v62, 6.0 }
 0x368   : > { %v2965_v40 = vmax.f32 %v2290_v60, 0.0  ;;  %v3415_v23 = vmin.f32 %v2963_v49, 6.0 }
 0x369   : > { %v3416_v48 = vmin.f32 %v2964_v26, 6.0 }
 0x36a   : > { %v3417_v1 = vmin.f32 %v2965_v40, 6.0  ;;  %v2293_v33 = vpop.f32.mrb[48].mxu0 }
 0x36b   : > { %v3724_v44 = vpack.c.bf16 %v3416_v48, %v3414_v57  ;;  %v2294_v39 = vadd.f32 %v2293_v33, %v5342_v4  ;;  %v2295_v24 = vpop.f32.mrb[49].mxu0 }
 0x36c   : > { %v3725_v0 = vpack.c.bf16 %v3417_v1, %v3415_v23  ;;  %v2296_v61 = vadd.f32 %v2295_v24, %v5344_v5  ;;  %v2297_v54 = vpop.f32.mrb[50].mxu0 }
 0x36d   : > { %v2966_v7 = vmax.f32 %v2294_v39, 0.0  ;;  %v2298_v2 = vadd.f32 %v2297_v54, %v5342_v4  ;;  %v2299_v38 = vpop.f32.mrb[51].mxu0 }
 0x36e   : > { %v2967_v37 = vmax.f32 %v2296_v61, 0.0  ;;  %v2300_v36 = vadd.f32 %v2299_v38, %v5344_v5  ;;  %4042 = vmatprep.subr.bf16.mxu1 %v3725_v0 }
 0x36f   : > { %v2968_v62 = vmax.f32 %v2298_v2, 0.0  ;;  %4043 = vmatpush1.bf16.msra.mxu1 %v3724_v44  ;;  %v3418_v49 = vmin.f32 %v2966_v7, 6.0 }
 0x370   : > { %v2969_v50 = vmax.f32 %v2300_v36, 0.0  ;;  %v3419_v26 = vmin.f32 %v2967_v37, 6.0 }
 0x371   : > { %v3420_v60 = vmin.f32 %v2968_v62, 6.0 }
 0x372   : > { %v3421_v40 = vmin.f32 %v2969_v50, 6.0  ;;  %v2303_v57 = vpop.f32.mrb[52].mxu0 }
 0x373   : > { %v3726_v48 = vpack.c.bf16 %v3420_v60, %v3418_v49  ;;  %v2304_v23 = vadd.f32 %v2303_v57, %v5342_v4  ;;  %v2305_v1 = vpop.f32.mrb[53].mxu0 }
 0x374   : > { %v3727_v33 = vpack.c.bf16 %v3421_v40, %v3419_v26  ;;  %v2306_v39 = vadd.f32 %v2305_v1, %v5344_v5  ;;  %v2307_v24 = vpop.f32.mrb[54].mxu0 }
 0x375   : > { %v2970_v61 = vmax.f32 %v2304_v23, 0.0  ;;  %v2308_v54 = vadd.f32 %v2307_v24, %v5342_v4  ;;  %v2309_v0 = vpop.f32.mrb[55].mxu0 }
 0x376   : > { %v2971_v2 = vmax.f32 %v2306_v39, 0.0  ;;  %v2310_v44 = vadd.f32 %v2309_v0, %v5344_v5  ;;  %4044 = vmatprep.subr.bf16.mxu1 %v3727_v33 }
 0x377   : > { %v2972_v7 = vmax.f32 %v2308_v54, 0.0  ;;  %4045 = vmatpush1.bf16.msra.mxu1 %v3726_v48  ;;  %v3422_v37 = vmin.f32 %v2970_v61, 6.0 }
 0x378   : > { %v2973_v38 = vmax.f32 %v2310_v44, 0.0  ;;  %v3423_v62 = vmin.f32 %v2971_v2, 6.0 }
 0x379   : > { %v3424_v36 = vmin.f32 %v2972_v7, 6.0 }
 0x37a   : > { %v3425_v50 = vmin.f32 %v2973_v38, 6.0  ;;  %v2313_v49 = vpop.f32.mrb[56].mxu0 }
 0x37b   : > { %v3728_v60 = vpack.c.bf16 %v3424_v36, %v3422_v37  ;;  %v2314_v26 = vadd.f32 %v2313_v49, %v5342_v4  ;;  %v2315_v40 = vpop.f32.mrb[57].mxu0 }
 0x37c   : > { %v3729_v57 = vpack.c.bf16 %v3425_v50, %v3423_v62  ;;  %v2316_v23 = vadd.f32 %v2315_v40, %v5344_v5  ;;  %v2317_v1 = vpop.f32.mrb[58].mxu0 }
 0x37d   : > { %v2974_v39 = vmax.f32 %v2314_v26, 0.0  ;;  %v2318_v24 = vadd.f32 %v2317_v1, %v5342_v4  ;;  %v2319_v33 = vpop.f32.mrb[59].mxu0 }
 0x37e   : > { %v2975_v54 = vmax.f32 %v2316_v23, 0.0  ;;  %v2320_v48 = vadd.f32 %v2319_v33, %v5344_v5  ;;  %4046 = vmatprep.subr.bf16.mxu1 %v3729_v57 }
 0x37f   : > { %v2976_v61 = vmax.f32 %v2318_v24, 0.0  ;;  %4047 = vmatpush1.bf16.msra.mxu1 %v3728_v60  ;;  %v3426_v2 = vmin.f32 %v2974_v39, 6.0 }
 0x380   : > { %v2977_v0 = vmax.f32 %v2320_v48, 0.0  ;;  %v3427_v7 = vmin.f32 %v2975_v54, 6.0 }
 0x381   : > { %v3428_v44 = vmin.f32 %v2976_v61, 6.0 }
 0x382   : > { %v3429_v38 = vmin.f32 %v2977_v0, 6.0  ;;  %v2323_v37 = vpop.f32.mrb[60].mxu0 }
 0x383   : > { %v3730_v36 = vpack.c.bf16 %v3428_v44, %v3426_v2  ;;  %v2324_v62 = vadd.f32 %v2323_v37, %v5342_v4  ;;  %v2325_v50 = vpop.f32.mrb[61].mxu0 }
 0x384   : > { %v3731_v49 = vpack.c.bf16 %v3429_v38, %v3427_v7  ;;  %v2326_v26 = vadd.f32 %v2325_v50, %v5344_v5  ;;  %v2327_v40 = vpop.f32.mrb[62].mxu0 }
 0x385   : > { %v2978_v23 = vmax.f32 %v2324_v62, 0.0  ;;  %v2328_v1 = vadd.f32 %v2327_v40, %v5342_v4  ;;  %v2329_v57 = vpop.f32.mrb[63].mxu0 }
 0x386   : > { %v2979_v24 = vmax.f32 %v2326_v26, 0.0  ;;  %v2330_v60 = vadd.f32 %v2329_v57, %v5344_v5  ;;  %4048 = vmatprep.subr.bf16.mxu1 %v3731_v49  ;;  %v6473_v49 = vld [vmem:[%s6713_s3 + $0x28] sm:$0xff]  ;;  %v4693_v57 = vcombine.low %v6405_v20, %v6405_v20 }
 0x387   : > { %v2980_v39 = vmax.f32 %v2328_v1, 0.0  ;;  %4049 = vmatpush1.bf16.msra.mxu1 %v3730_v36  ;;  %v3430_v54 = vmin.f32 %v2978_v23, 6.0 }
 0x388   : > { %v2981_v33 = vmax.f32 %v2330_v60, 0.0  ;;  %v3431_v61 = vmin.f32 %v2979_v24, 6.0  ;;  %v4696_v60 = vcombine.high %v6473_v49, %v6473_v49 }
 0x389   : > { %v3432_v48 = vmin.f32 %v2980_v39, 6.0 }
 0x38a   : > { %v3433_v0 = vmin.f32 %v2981_v33, 6.0  ;;  %v2333_v2 = vpop.f32.mrb[64].mxu0 }
 0x38b   : > { %v3732_v44 = vpack.c.bf16 %v3432_v48, %v3430_v54  ;;  %v2334_v7 = vadd.f32 %v2333_v2, %v5342_v4  ;;  %v2335_v38 = vpop.f32.mrb[65].mxu0 }
 0x38c   : > { %v3733_v37 = vpack.c.bf16 %v3433_v0, %v3431_v61  ;;  %v2336_v62 = vadd.f32 %v2335_v38, %v5344_v5  ;;  %v2337_v50 = vpop.f32.mrb[66].mxu0 }
 0x38d   : > { %v2982_v36 = vmax.f32 %v2334_v7, 0.0  ;;  %v2338_v26 = vadd.f32 %v2337_v50, %v5342_v4  ;;  %v2339_v40 = vpop.f32.mrb[67].mxu0 }
 0x38e   : > { %v2983_v23 = vmax.f32 %v2336_v62, 0.0  ;;  %v2340_v1 = vadd.f32 %v2339_v40, %v5344_v5  ;;  %4050 = vmatprep.subr.bf16.mxu1 %v3733_v37 }
 0x38f   : > { %v2984_v24 = vmax.f32 %v2338_v26, 0.0  ;;  %4051 = vmatpush1.bf16.msra.mxu1 %v3732_v44  ;;  %v3434_v33 = vmin.f32 %v2982_v36, 6.0 }
 0x390   : > { %v2985_v39 = vmax.f32 %v2340_v1, 0.0  ;;  %v3435_v48 = vmin.f32 %v2983_v23, 6.0 }
 0x391   : > { %v3436_v54 = vmin.f32 %v2984_v24, 6.0 }
 0x392   : > { %v3437_v61 = vmin.f32 %v2985_v39, 6.0  ;;  %v2343_v0 = vpop.f32.mrb[68].mxu0  ;;  %4053 = vmatmul.mubr.bf16.vlgmr.msra.gmra.mrb[116].mxu1 %v4693_v57 }
 0x393   : > { %v3734_v2 = vpack.c.bf16 %v3436_v54, %v3434_v33  ;;  %v2344_v7 = vadd.f32 %v2343_v0, %v5342_v4  ;;  %v2345_v38 = vpop.f32.mrb[69].mxu0  ;;  %4093 = vmatprep.mubr.bf16.mxu1 %v4696_v60 }
 0x394   : > { %v3735_v37 = vpack.c.bf16 %v3437_v61, %v3435_v48  ;;  %v2346_v20 = vadd.f32 %v2345_v38, %v5344_v5  ;;  %v2347_v62 = vpop.f32.mrb[70].mxu0 }
 0x395   : > { %v2986_v44 = vmax.f32 %v2344_v7, 0.0  ;;  %v2348_v50 = vadd.f32 %v2347_v62, %v5342_v4  ;;  %v2349_v26 = vpop.f32.mrb[71].mxu0 }
 0x396   : > { %v2987_v40 = vmax.f32 %v2346_v20, 0.0  ;;  %v2350_v36 = vadd.f32 %v2349_v26, %v5344_v5  ;;  %4061 = vmatprep.subr.bf16.mxu1 %v3735_v37 }
 0x397   : > { %v2988_v23 = vmax.f32 %v2348_v50, 0.0  ;;  %4062 = vmatpush1.bf16.msra.mxu1 %v3734_v2  ;;  %v3438_v57 = vmin.f32 %v2986_v44, 6.0 }
 0x398   : > { %v2989_v1 = vmax.f32 %v2350_v36, 0.0  ;;  %v3439_v39 = vmin.f32 %v2987_v40, 6.0 }
 0x399   : > { %v3440_v24 = vmin.f32 %v2988_v23, 6.0 }
 0x39a   : > { %v3441_v33 = vmin.f32 %v2989_v1, 6.0  ;;  %v2353_v60 = vpop.f32.mrb[72].mxu0 }
 0x39b   : > { %v3736_v54 = vpack.c.bf16 %v3440_v24, %v3438_v57  ;;  %v2354_v48 = vadd.f32 %v2353_v60, %v5342_v4  ;;  %v2355_v61 = vpop.f32.mrb[73].mxu0 }
 0x39c   : > { %v3737_v0 = vpack.c.bf16 %v3441_v33, %v3439_v39  ;;  %v2356_v7 = vadd.f32 %v2355_v61, %v5344_v5  ;;  %v2357_v38 = vpop.f32.mrb[74].mxu0 }
 0x39d   : > { %v2990_v20 = vmax.f32 %v2354_v48, 0.0  ;;  %v2358_v62 = vadd.f32 %v2357_v38, %v5342_v4  ;;  %v2359_v37 = vpop.f32.mrb[75].mxu0 }
 0x39e   : > { %v2991_v50 = vmax.f32 %v2356_v7, 0.0  ;;  %v2360_v2 = vadd.f32 %v2359_v37, %v5344_v5  ;;  %4063 = vmatprep.subr.bf16.mxu1 %v3737_v0 }
 0x39f   : > { %v2992_v44 = vmax.f32 %v2358_v62, 0.0  ;;  %4064 = vmatpush1.bf16.msra.mxu1 %v3736_v54  ;;  %v3442_v40 = vmin.f32 %v2990_v20, 6.0 }
 0x3a0   : > { %v2993_v26 = vmax.f32 %v2360_v2, 0.0  ;;  %v3443_v23 = vmin.f32 %v2991_v50, 6.0 }
 0x3a1   : > { %v3444_v36 = vmin.f32 %v2992_v44, 6.0 }
 0x3a2   : > { %v3445_v1 = vmin.f32 %v2993_v26, 6.0  ;;  %v2363_v57 = vpop.f32.mrb[76].mxu0 }
 0x3a3   : > { %v3738_v24 = vpack.c.bf16 %v3444_v36, %v3442_v40  ;;  %v2364_v39 = vadd.f32 %v2363_v57, %v5342_v4  ;;  %v2365_v33 = vpop.f32.mrb[77].mxu0  ;;  %v6880_v57 = vpack.c.bf16 %v5746_v35, %v5741_v29  ;;  %v6890_v29 = vpack.c.bf16 %v5871_v31, %v5866_v25  ;;  %v6910_v31 = vld [vmem:[#allocation12_spill] sm:$0xff] }
 0x3a4   : > { %v3739_v60 = vpack.c.bf16 %v3445_v1, %v3443_v23  ;;  %v2366_v48 = vadd.f32 %v2365_v33, %v5344_v5  ;;  %v2367_v61 = vpop.f32.mrb[78].mxu0  ;;  %v6876_v23 = vpack.c.bf16 %v5696_v14, %v5688_v6  ;;  %v6879_v1 = vpack.c.bf16 %v5719_v51, %v5714_v45  ;;  %v6916_v33 = vld [vmem:[#allocation16_spill] sm:$0xff] }
 0x3a5   : > { %v2994_v7 = vmax.f32 %v2364_v39, 0.0  ;;  %v2368_v38 = vadd.f32 %v2367_v61, %v5342_v4  ;;  %v2369_v0 = vpop.f32.mrb[79].mxu0  ;;  %v6877_v4 = vpack.c.bf16 %v5694_v13, %v5686_v3  ;;  %v6881_v6 = vpack.c.bf16 %v5744_v34, %v5739_v28  ;;  %v6915_v39 = vld [vmem:[#allocation18_spill] sm:$0xff]  ;;  %v6919_v61 = vld [vmem:[#allocation21_spill] sm:$0xff] }
 0x3a6   : > { %v2995_v62 = vmax.f32 %v2366_v48, 0.0  ;;  %v2370_v54 = vadd.f32 %v2369_v0, %v5344_v5  ;;  %4065 = vmatprep.subr.bf16.mxu1 %v3739_v60  ;;  %v6878_v5 = vpack.c.bf16 %v5721_v52, %v5716_v46  ;;  %v6882_v3 = vpack.c.bf16 %v5771_v22, %v5766_v16  ;;  %v6894_v16 = vld [vmem:[#allocation7_spill] sm:$0xff] }
 0x3a7   : > { %v2996_v20 = vmax.f32 %v2368_v38, 0.0  ;;  %4066 = vmatpush1.bf16.msra.mxu1 %v3738_v24  ;;  %v3446_v50 = vmin.f32 %v2994_v7, 6.0  ;;  %v6883_v13 = vpack.c.bf16 %v5769_v21, %v5764_v15  ;;  %v6884_v14 = vpack.c.bf16 %v5796_v19, %v5791_v9  ;;  %v6895_v21 = vld [vmem:[#allocation5_spill] sm:$0xff]  ;;  %v6898_v9 = vld [vmem:[#allocation4_spill] sm:$0xff]  ;;  %v6900_v19 = vld [vmem:[#allocation11_spill] sm:$0xff] }
 0x3a8   : > { %v2997_v37 = vmax.f32 %v2370_v54, 0.0  ;;  %v3447_v44 = vmin.f32 %v2995_v62, 6.0  ;;  %v6885_v45 = vpack.c.bf16 %v5794_v18, %v5789_v8  ;;  %v6886_v46 = vpack.c.bf16 %v5821_v30, %v5816_v12  ;;  %v6897_v8 = vld [vmem:[#allocation6_spill] sm:$0xff]  ;;  %v6904_v30 = vld [vmem:[#allocation8_spill] sm:$0xff]  ;;  %v6918_v48 = vld [vmem:[#allocation23_spill] sm:$0xff] }
 0x3a9   : > { %v3448_v2 = vmin.f32 %v2996_v20, 6.0  ;;  %v6887_v51 = vpack.c.bf16 %v5819_v27, %v5814_v11  ;;  %v6888_v52 = vpack.c.bf16 %v5846_v56, %v5841_v47  ;;  %v6889_v28 = vpack.c.bf16 %v5844_v55, %v5839_v41  ;;  %v6901_v11 = vld [vmem:[#allocation9_spill] sm:$0xff]  ;;  %v6903_v27 = vld [vmem:[#allocation10_spill] sm:$0xff]  ;;  %v6906_v47 = vld [vmem:[#allocation15_spill] sm:$0xff] }
 0x3aa   : > { %v3449_v26 = vmin.f32 %v2997_v37, 6.0  ;;  %v6891_v34 = vpack.c.bf16 %v5869_v17, %v5864_v63  ;;  %v6892_v35 = vpack.c.bf16 %v5896_v42, %v5891_v58  ;;  %v6893_v15 = vpack.c.bf16 %v5894_v32, %v5889_v59  ;;  %v6907_v55 = vld [vmem:[#allocation13_spill] sm:$0xff]  ;;  %v6909_v17 = vld [vmem:[#allocation14_spill] sm:$0xff]  ;;  %v6912_v32 = vld [vmem:[#allocation19_spill] sm:$0xff] }
 0x3ab   : > { %v3740_v40 = vpack.c.bf16 %v3448_v2, %v3446_v50  ;;  %v6896_v22 = vpack.c.bf16 %v6894_v16, %v6895_v21  ;;  %v6899_v18 = vpack.c.bf16 %v6897_v8, %v6898_v9  ;;  %v6902_v12 = vpack.c.bf16 %v6900_v19, %v6901_v11  ;;  %v3572_v63 = vld [vmem:[%s6713_s3 + $0x30] sm:$0xff]  ;;  %v6922_v38 = vld [vmem:[#allocation20_spill] sm:$0xff]  ;;  %v6924_v62 = vld [vmem:[#allocation27_spill] sm:$0xff] }
 0x3ac   : > { %v3741_v36 = vpack.c.bf16 %v3449_v26, %v3447_v44  ;;  %v6905_v41 = vpack.c.bf16 %v6903_v27, %v6904_v30  ;;  %v6908_v56 = vpack.c.bf16 %v6906_v47, %v6907_v55  ;;  %v4695_v25 = vcombine.low %v6473_v49, %v6473_v49  ;;  %v6913_v42 = vld [vmem:[#allocation17_spill] sm:$0xff]  ;;  %v6921_v49 = vld [vmem:[#allocation22_spill] sm:$0xff]  ;;  %v6928_v50 = vld [vmem:[#allocation24_spill] sm:$0xff] }
 0x3ad   : > { %v6911_v59 = vpack.c.bf16 %v6909_v17, %v6910_v31  ;;  %v4698_v58 = vcombine.high %v3572_v63, %v3572_v63  ;;  %v6914_v24 = vpack.c.bf16 %v6912_v32, %v6913_v42  ;;  %v6917_v60 = vpack.c.bf16 %v6915_v39, %v6916_v33  ;;  %v6925_v54 = vld [vmem:[#allocation25_spill] sm:$0xff]  ;;  %v6927_v37 = vld [vmem:[#allocation26_spill] sm:$0xff]  ;;  %v6930_v44 = vld [vmem:[#allocation31_spill] sm:$0xff] }
 0x3ae   : > { %4067 = vmatprep.subr.bf16.mxu1 %v3741_v36  ;;  %v6920_v7 = vpack.c.bf16 %v6918_v48, %v6919_v61  ;;  %v6923_v0 = vpack.c.bf16 %v6921_v49, %v6922_v38  ;;  %v6926_v20 = vpack.c.bf16 %v6924_v62, %v6925_v54  ;;  %v6929_v2 = vpack.c.bf16 %v6927_v37, %v6928_v50  ;;  %v6931_v26 = vld [vmem:[#allocation29_spill] sm:$0xff]  ;;  %v6933_v36 = vld [vmem:[#allocation30_spill] sm:$0xff]  ;;  %v6954_v21 = vld [vmem:[#allocation44_spill] sm:$0xff] }
 0x3af   : > { %4068 = vmatpush1.bf16.msra.mxu1 %v3740_v40  ;;  %v6932_v40 = vpack.c.bf16 %v6930_v44, %v6931_v26  ;;  %v6953_v16 = vld [vmem:[#allocation46_spill] sm:$0xff]  ;;  %v6956_v8 = vld [vmem:[#allocation45_spill] sm:$0xff]  ;;  %v6957_v9 = vld [vmem:[#allocation43_spill] sm:$0xff] }
 0x3b0   : > { %4069 = vmatprep.subr.bf16.mxu1 %v6876_v23  ;;  %v6934_v23 = vld [vmem:[#allocation28_spill] sm:$0xff]  ;;  %v6959_v19 = vld [vmem:[#allocation50_spill] sm:$0xff]  ;;  %v6962_v27 = vld [vmem:[#allocation49_spill] sm:$0xff] }
 0x3b1   : > { %v6960_v11 = vld [vmem:[#allocation48_spill] sm:$0xff]  ;;  %v6963_v30 = vld [vmem:[#allocation47_spill] sm:$0xff]  ;;  %v6965_v47 = vld [vmem:[#allocation54_spill] sm:$0xff] }
 0x3b2   : > { %v6966_v55 = vld [vmem:[#allocation52_spill] sm:$0xff]  ;;  %v6969_v17 = vld [vmem:[#allocation51_spill] sm:$0xff]  ;;  %v6974_v42 = vld [vmem:[#allocation57_spill] sm:$0xff] }
 0x3b3   : > { %4070 = vmatpush1.bf16.msra.mxu1 %v6877_v4  ;;  %v6935_v4 = vpack.c.bf16 %v6933_v36, %v6934_v23  ;;  %v6977_v33 = vld [vmem:[#allocation62_spill] sm:$0xff]  ;;  %v6980_v61 = vld [vmem:[#allocation61_spill] sm:$0xff] }
 0x3b4   : > { %4071 = vmatprep.subr.bf16.mxu1 %v6878_v5  ;;  %v6936_v5 = vld [vmem:[#allocation33_spill] sm:$0xff]  ;;  %v6983_v38 = vld [vmem:[#allocation66_spill] sm:$0xff] }
 0x3b5   : > { %v6986_v54 = vld [vmem:[#allocation65_spill] sm:$0xff]  ;;  %v6989_v50 = vld [vmem:[#allocation70_spill] sm:$0xff] }
 0x3b6   : > { %v6992_v26 = vld [vmem:[#allocation69_spill] sm:$0xff]  ;;  %v6995_v23 = vld [vmem:[#allocation74_spill] sm:$0xff] }
 0x3b7   : > { %4072 = vmatpush1.bf16.msra.mxu1 %v6879_v1  ;;  %v6937_v1 = vpack.c.bf16 %v6102_v53, %v6936_v5 }
 0x3b8   : > { %4073 = vmatprep.subr.bf16.mxu1 %v6880_v57  ;;  %v6938_v57 = vld [vmem:[#allocation34_spill] sm:$0xff] }
 0x3bb   : > { %4074 = vmatpush1.bf16.msra.mxu1 %v6881_v6  ;;  %v6939_v6 = vld [vmem:[#allocation32_spill] sm:$0xff] }
 0x3bc   : > { %4075 = vmatprep.subr.bf16.mxu1 %v6882_v3  ;;  %v6940_v3 = vpack.c.bf16 %v6938_v57, %v6939_v6  ;;  %v6999_v57 = vld [vmem:[#allocation71_spill] sm:$0xff] }
 0x3bf   : > { %4076 = vmatpush1.bf16.msra.mxu1 %v6883_v13  ;;  %v6941_v13 = vld [vmem:[#allocation38_spill] sm:$0xff] }
 0x3c0   : > { %4077 = vmatprep.subr.bf16.mxu1 %v6884_v14  ;;  %v6942_v14 = vld [vmem:[#allocation36_spill] sm:$0xff] }
 0x3c3   : > { %4078 = vmatpush1.bf16.msra.mxu1 %v6885_v45  ;;  %v6943_v45 = vpack.c.bf16 %v6941_v13, %v6942_v14  ;;  %v7002_v13 = vld [vmem:[#allocation76_spill] sm:$0xff] }
 0x3c4   : > { %4079 = vmatprep.subr.bf16.mxu1 %v6886_v46  ;;  %v6944_v46 = vld [vmem:[#allocation37_spill] sm:$0xff] }
 0x3c7   : > { %4080 = vmatpush1.bf16.msra.mxu1 %v6887_v51  ;;  %v6945_v51 = vld [vmem:[#allocation35_spill] sm:$0xff] }
 0x3c8   : > { %4081 = vmatprep.subr.bf16.mxu1 %v6888_v52  ;;  %v6946_v52 = vpack.c.bf16 %v6944_v46, %v6945_v51  ;;  %v7004_v46 = vld [vmem:[#allocation77_spill] sm:$0xff]  ;;  %v7005_v51 = vld [vmem:[#allocation75_spill] sm:$0xff] }
 0x3cb   : > { %4082 = vmatpush1.bf16.msra.mxu1 %v6889_v28  ;;  %v6947_v28 = vld [vmem:[#allocation42_spill] sm:$0xff] }
 0x3cc   : > { %4083 = vmatprep.subr.bf16.mxu1 %v6890_v29  ;;  %v6948_v29 = vld [vmem:[#allocation40_spill] sm:$0xff] }
 0x3cf   : > { %4084 = vmatpush1.bf16.msra.mxu1 %v6891_v34  ;;  %v6949_v34 = vpack.c.bf16 %v6947_v28, %v6948_v29  ;;  %v7007_v28 = vpack.c.bf16 %v6378_v43, %v6373_v10  ;;  %v4936_v29 = vld [vmem:[%s5069_s26 + $0x40] sm:$0xff]   ;;  %v4938_v43 = vld [vmem:[%s5069_s26 + $0x48] sm:$0xff]  }
 0x3d0   : > { %4085 = vmatprep.subr.bf16.mxu1 %v6892_v35  ;;  %v6950_v35 = vld [vmem:[#allocation41_spill] sm:$0xff]  ;;  %v4937_v10 = vld [vmem:[%s5069_s26] sm:$0xff]  }
 0x3d3   : > { %4086 = vmatpush1.bf16.msra.mxu1 %v6893_v15  ;;  %v6951_v15 = vld [vmem:[#allocation39_spill] sm:$0xff] }
 0x3d4   : > { %4087 = vmatprep.subr.bf16.mxu1 %v6896_v22  ;;  %v6952_v53 = vpack.c.bf16 %v6950_v35, %v6951_v15  ;;  %v6955_v22 = vpack.c.bf16 %v6953_v16, %v6954_v21  ;;  %v7009_v35 = vld [vmem:[#allocation79_spill] sm:$0xff]  ;;  %v4939_v16 = vld [vmem:[%s5069_s26 + $0x8] sm:$0xff]   ;;  %v4940_v21 = vld [vmem:[%s5069_s26 + $0x50] sm:$0xff]  }
 0x3d7   : > { %4088 = vmatpush1.bf16.msra.mxu1 %v6899_v18  ;;  %v6958_v18 = vpack.c.bf16 %v6956_v8, %v6957_v9  ;;  %v4942_v8 = vld [vmem:[%s5069_s26 + $0x58] sm:$0xff]  }
 0x3d8   : > { %4089 = vmatprep.subr.bf16.mxu1 %v6902_v12  ;;  %v6961_v12 = vpack.c.bf16 %v6959_v19, %v6960_v11  ;;  %v4943_v9 = vld [vmem:[%s5069_s26 + $0x18] sm:$0xff]   ;;  %v4945_v19 = vld [vmem:[%s5069_s26 + $0x20] sm:$0xff]   ;;  %v4946_v11 = vld [vmem:[%s5069_s26 + $0x68] sm:$0xff]  }
 0x3db   : > { %4090 = vmatpush1.bf16.msra.mxu1 %v6905_v41  ;;  %v6964_v41 = vpack.c.bf16 %v6962_v27, %v6963_v30  ;;  %v4948_v27 = vld [vmem:[%s5069_s26 + $0x70] sm:$0xff]  }
 0x3dc   : > { %4091 = vmatprep.subr.bf16.mxu1 %v6908_v56  ;;  %v6967_v56 = vpack.c.bf16 %v6965_v47, %v6966_v55  ;;  %v4949_v30 = vld [vmem:[%s5069_s26 + $0x30] sm:$0xff]   ;;  %v4951_v47 = vld [vmem:[%s5069_s26 + $0x38] sm:$0xff]  }
 0x3df   : > { %4092 = vmatpush1.bf16.msra.mxu1 %v6911_v59  ;;  %v6971_v59 = vld [vmem:[#allocation58_spill] sm:$0xff] }
 0x3e0   : > { %4102 = vmatprep.subr.bf16.mxu1 %v6914_v24  ;;  %v6975_v24 = vld [vmem:[#allocation55_spill] sm:$0xff] }
 0x3e1   : > { %v6976_v39 = vpack.c.bf16 %v6974_v42, %v6975_v24 }
 0x3e2   : > { %4094 = vmatmul.mubr.bf16.vlgmr.msra.gmra.mrb[116].mxu1 %v4695_v25  ;;  %v6968_v25 = vld [vmem:[#allocation53_spill] sm:$0xff] }
 0x3e3   : > { %4103 = vmatpush1.bf16.msra.mxu1 %v6917_v60  ;;  %4134 = vmatprep.mubr.bf16.mxu1 %v4698_v58  ;;  %v6970_v31 = vpack.c.bf16 %v6968_v25, %v6969_v17  ;;  %v6972_v58 = vld [vmem:[#allocation56_spill] sm:$0xff] }
 0x3e4   : > { %4104 = vmatprep.subr.bf16.mxu1 %v6920_v7  ;;  %v6973_v32 = vpack.c.bf16 %v6971_v59, %v6972_v58  ;;  %v6978_v60 = vld [vmem:[#allocation60_spill] sm:$0xff]  ;;  %v6981_v7 = vld [vmem:[#allocation59_spill] sm:$0xff] }
 0x3e5   : > { %v6979_v48 = vpack.c.bf16 %v6977_v33, %v6978_v60  ;;  %v6982_v49 = vpack.c.bf16 %v6980_v61, %v6981_v7  ;;  %v4190_v33 = vld [vmem:[#allocation2] sm:$0xff] }
 0x3e7   : > { %4105 = vmatpush1.bf16.msra.mxu1 %v6923_v0  ;;  %v6984_v0 = vld [vmem:[#allocation64_spill] sm:$0xff] }
 0x3e8   : > { %4106 = vmatprep.subr.bf16.mxu1 %v6926_v20  ;;  %v6985_v62 = vpack.c.bf16 %v6983_v38, %v6984_v0  ;;  %v6987_v20 = vld [vmem:[#allocation63_spill] sm:$0xff] }
 0x3e9   : > { %v6988_v37 = vpack.c.bf16 %v6986_v54, %v6987_v20  ;;  %v4718_v0 = vld [vmem:[%s6715_s5] ss:$0 sm:$0xff] (!%p4717_p11) }
 0x3eb   : > { %4107 = vmatpush1.bf16.msra.mxu1 %v6929_v2  ;;  %v6990_v2 = vld [vmem:[#allocation68_spill] sm:$0xff] }
 0x3ec   : > { %4108 = vmatprep.subr.bf16.mxu1 %v6932_v40  ;;  %v6991_v44 = vpack.c.bf16 %v6989_v50, %v6990_v2  ;;  %v6993_v40 = vld [vmem:[#allocation67_spill] sm:$0xff] }
 0x3ed   : > { %v6994_v36 = vpack.c.bf16 %v6992_v26, %v6993_v40 }
 0x3ef   : > { %4109 = vmatpush1.bf16.msra.mxu1 %v6935_v4  ;;  %v6996_v4 = vld [vmem:[#allocation72_spill] sm:$0xff] }
 0x3f0   : > { %4110 = vmatprep.subr.bf16.mxu1 %v6937_v1  ;;  %v6997_v5 = vpack.c.bf16 %v6995_v23, %v6996_v4  ;;  %v6998_v1 = vld [vmem:[#allocation73_spill] sm:$0xff] }
 0x3f1   : > { %v7000_v6 = vpack.c.bf16 %v6998_v1, %v6999_v57 }
 0x3f3   : > { %4111 = vmatpush1.bf16.msra.mxu1 %v6940_v3  ;;  %v7001_v3 = vld [vmem:[#allocation78_spill] sm:$0xff] }
 0x3f4   : > { %4112 = vmatprep.subr.bf16.mxu1 %v6943_v45  ;;  %v7003_v14 = vpack.c.bf16 %v7001_v3, %v7002_v13  ;;  %v4697_v45 = vcombine.low %v3572_v63, %v3572_v63  ;;  %v4935_v63 = vld [vmem:[%s6713_s3 + $0x38] ss:$0 sps:$4 sm:$0xff]  }
 0x3f7   : > { %4113 = vmatpush1.bf16.msra.mxu1 %v6946_v52  ;;  %v7006_v52 = vpack.c.bf16 %v7004_v46, %v7005_v51 }
 0x3f8   : > { %4114 = vmatprep.subr.bf16.mxu1 %v6949_v34  ;;  %v7008_v34 = vld [vmem:[#allocation80_spill] sm:$0xff] }
 0x3f9   : > { %v7010_v15 = vpack.c.bf16 %v7008_v34, %v7009_v35 }
 0x3fb   : > { %4115 = vmatpush1.bf16.msra.mxu1 %v6952_v53  ;;  %v7011_v53 = vmov 0  }
 0x3fc   : > { %4116 = vmatprep.subr.bf16.mxu1 %v6955_v22  ;;  %v4941_v22 = vld [vmem:[%s5069_s26 + $0x10] sm:$0xff]  }
 0x3ff   : > { %4117 = vmatpush1.bf16.msra.mxu1 %v6958_v18  ;;  %v4944_v18 = vld [vmem:[%s5069_s26 + $0x60] sm:$0xff]  }
 0x400   : > { %4118 = vmatprep.subr.bf16.mxu1 %v6961_v12  ;;  %v4947_v12 = vld [vmem:[%s5069_s26 + $0x28] sm:$0xff]  }
 0x403   : > { %4119 = vmatpush1.bf16.msra.mxu1 %v6964_v41  ;;  %v4950_v41 = vld [vmem:[%s5069_s26 + $0x78] sm:$0xff]  }
 0x404   : > { %4120 = vmatprep.subr.bf16.mxu1 %v6967_v56 }
 0x407   : > { %4121 = vmatpush1.bf16.msra.mxu1 %v6970_v31 }
 0x408   : > { %4122 = vmatprep.subr.bf16.mxu1 %v6973_v32 }
 0x40b   : > { %4123 = vmatpush1.bf16.msra.mxu1 %v6976_v39 }
 0x40c   : > { %4124 = vmatprep.subr.bf16.mxu1 %v6979_v48 }
 0x40f   : > { %4125 = vmatpush1.bf16.msra.mxu1 %v6982_v49 }
 0x410   : > { %4126 = vmatprep.subr.bf16.mxu1 %v6985_v62  ;;  %v7012_v62 = vlaneseq (!%p4717_p11) }
 0x412   : > { %v4375_v54 = vand.u32 (!%p4717_p11), 127, %v7012_v62 }
 0x413   : > { %4127 = vmatpush1.bf16.msra.mxu1 %v6988_v37 }
 0x414   : > { %4128 = vmatprep.subr.bf16.mxu1 %v6991_v44  ;;  %vm4376_vm2 = vcmp.lt.s32.totalorder (!%p4717_p11), %v4375_v54, 10 }
 0x417   : > { %4129 = vmatpush1.bf16.msra.mxu1 %v6994_v36 }
 0x418   : > { %4130 = vmatprep.subr.bf16.mxu1 %v6997_v5 }
 0x41b   : > { %4131 = vmatpush1.bf16.msra.mxu1 %v7000_v6 }
 0x41c   : > { %4132 = vmatprep.subr.bf16.mxu1 %v7003_v14 }
 0x41f   : > { %4133 = vmatpush1.bf16.msra.mxu1 %v7006_v52 }
 0x420   : > { %4143 = vmatprep.subr.bf16.mxu1 %v7007_v28 }
 0x422   : > { %4135 = vmatmul.mubr.bf16.vlgmr.msra.gmra.mrb[116].mxu1 %v4697_v45 }
 0x423   : > { %4144 = vmatpush1.bf16.msra.mxu1 %v7010_v15  ;;  %4175 = vmatprep.mubr.bf16.mxu1 %v7011_v53 }
 0x424   : > { %4722 = vmatprep.subr.bf16.mxu1 %v4936_v29 }
 0x42e   : > { %4700 = vmatmul.mubr.msk.bf16.vlgmr.msra.gmra.mrb[116].mxu1 %vm3852_vm1, %v4935_v63 }
 0x42f   : > { %4723 = vmatpush3.bf16.msra.mxu1 %v4937_v10 }
 0x430   : > { %4724 = vmatprep.subr.bf16.mxu1 %v4938_v43 }
 0x433   : > { %4725 = vmatpush3.bf16.msra.mxu1 %v4939_v16 }
 0x434   : > { %4726 = vmatprep.subr.bf16.mxu1 %v4940_v21 }
 0x437   : > { %4727 = vmatpush3.bf16.msra.mxu1 %v4941_v22 }
 0x438   : > { %4728 = vmatprep.subr.bf16.mxu1 %v4942_v8 }
 0x43b   : > { %4729 = vmatpush3.bf16.msra.mxu1 %v4943_v9 }
 0x43c   : > { %4730 = vmatprep.subr.bf16.mxu1 %v4944_v18 }
 0x43f   : > { %4731 = vmatpush3.bf16.msra.mxu1 %v4945_v19 }
 0x440   : > { %4732 = vmatprep.subr.bf16.mxu1 %v4946_v11 }
 0x443   : > { %4733 = vmatpush3.bf16.msra.mxu1 %v4947_v12 }
 0x444   : > { %4734 = vmatprep.subr.bf16.mxu1 %v4948_v27 }
 0x447   : > { %4735 = vmatpush3.bf16.msra.mxu1 %v4949_v30 }
 0x448   : > { %4736 = vmatprep.subr.bf16.mxu1 %v4950_v41 }
 0x44b   : > { %4737 = vmatpush3.bf16.msra.mxu1 %v4951_v47 }
 0x501   : > { %v4177_v55 = vpop.f32.mrb[116].mxu1 }
 0x502   : > { %v4184_v56 = vmul.f32 0.0011111111, %v4177_v55  ;;  %v4179_v25 = vpop.f32.mrb[117].mxu1 }
 0x503   : > { %v4185_v17 = vmul.f32 0.0011111111, %v4179_v25  ;;  %v4181_v31 = vpop.f32.mrb[118].mxu1 }
 0x504   : > { %v4186_v59 = vmax.f32 %v4184_v56, 0.0  ;;  %v4182_v58 = vpop.f32.mrb[119].mxu1 }
 0x505   : > { %v4187_v32 = vmax.f32 %v4185_v17, 0.0 }
 0x506   : > { %v4188_v24 = vpack.c.bf16 %v4186_v59, %v4186_v59 }
 0x507   : > { %v4189_v42 = vpack.c.bf16 %v4187_v32, %v4187_v32 }
 0x509   : > { %4351 = vmatprep.mubr.bf16.mxu1 %v4189_v42 }
 0x50a   : > { %4352 = vmatmul.mubr.bf16.vlgmr.msra.gmra.mrb[120].mxu1 %v4188_v24 }
 0x5dd   : > { %v4738_v39 = vpop.f32.mrb[120].mxu1  ;;  %4364 = sbr.rel (%p4717_p11) target bundleno = 1831 (0x727), region = 90 }
 0x5de   : > { %v4739_v60 = vpop.f32.mrb[121].mxu1 }
 0x5df   : > { %v4740_v48 = vadd.f32 %v4739_v60, %v4738_v39  ;;  %v4741_v61 = vpop.f32.mrb[122].mxu1 }
 0x5e0   : > { %v4742_v7 = vpop.f32.mrb[123].mxu1 }
 0x5e1   : > { %v4359_v49 = vadd.f32 %v4740_v48, %v4190_v33 }
 0x5e3   : > { %4360 = vst [vmem:[#allocation2] sm:$0xff] %v4359_v49 }
 0x5ea   : > { %v4365_v38 = vld [vmem:[#allocation2] sm:$0xff] }
 0x5eb   : > { %v4373_v20 = vadd.f32 %v4718_v0, %v4365_v38 }
 0x5ed   : > { %v4377_v37 = vsel %vm4376_vm2, %v4373_v20, -1e+30 }
 0x5ee   : > { %4378 = vmax.xlane.f32.xlu0 %v4377_v37 }
 0x67b   : > { %v4379_v50 = vpop.xlane.xlu0 %4378 }
 0x67c   : > { %v4380_v2 = vsub.f32 %v4377_v37, %v4379_v50 }
 0x67e   : > { %v4381_v44 = vmul.f32 1.442695, %v4380_v2 }
 0x680   : > { %4954 = vpow2.f32 %v4381_v44 }
 0x68a   : > { %v4955_v26 = vpop.eup %4954 }
 0x68b   : > { %4383 = vadd.xlane.f32.xlu0 %v4955_v26 }
 0x718   : > { %v4384_v40 = vpop.xlane.xlu0 %4383 }
 0x719   : > { %4956 = vrcp.f32 %v4384_v40 }
 0x723   : > { %v4957_v36 = vpop.eup %4956 }
 0x724   : > { %v4386_v23 = vmul.f32 %v4957_v36, %v4955_v26 }
 0x726   : > { %4387 = vst [vmem:[%s6716_s6] sm:$0xff] %v4386_v23 }
 0x727 PF: > { %p13_p12 = scmp.ge.s32.totalorder %s5038_s25, 7   ;;  %s7013_s21 = smov %s4976_s22 }
 0x728   : > { %s7014_s22 = smov %s5047_s28  ;;  %s7015_s23 = smov %s5038_s25 }
 0x729   :  { %15 = sbr.rel (!%p13_p12) target bundleno = 2 (0x2), region = 127 }

</bundles_post_ra>
